<compile_context>
chip_gen: v5e
topology: v5e:2x2
jax: 0.10.0
libtpu: 0.0.40
codegen_flags: <defaults>
</compile_context>

<pallas_src>
import numpy as np

import jax
import jax.numpy as jnp
from jax.experimental import pallas as pl
from jax.experimental.pallas import tpu as pltpu


# ----------------------------------------------------------------------------
# One-time parameter packing (hoisted out of the forward pass)
# ----------------------------------------------------------------------------
def _expand_conv_weight(w, spatial_in):
    """Fold the H/W taps (and H/W zero padding) of a k=4, s=2, p=1 Conv3d into
    a dense matrix per depth tap.

    w: (Cout, Cin, 4, 4, 4) PyTorch OIDHW weight.
    Returns W3 of shape (4, H_in*W_in*Cin, H_out*W_out*Cout) such that
        out[(oh, ow, co)] = sum_kd  act(depth = 2*od + kd - 1)[(h, w, ci)] @ W3[kd]
    H/W padding is realised by omitting out-of-range taps; D padding is
    handled by explicit zero rows in the parity-split activation slab.
    """
    cout, cin, kd_, kh_, kw_ = w.shape
    h_in = w_in = spatial_in
    h_out = w_out = spatial_in // 2
    w3 = np.zeros((kd_, h_in * w_in * cin, h_out * w_out * cout), np.float32)
    for kd in range(kd_):
        for kh in range(kh_):
            for kw in range(kw_):
                blk = w[:, :, kd, kh, kw].T            # (Cin, Cout)
                for oh in range(h_out):
                    h = 2 * oh + kh - 1
                    if h < 0 or h >= h_in:
                        continue
                    for ow in range(w_out):
                        ww = 2 * ow + kw - 1
                        if ww < 0 or ww >= w_in:
                            continue
                        r0 = (h * w_in + ww) * cin
                        c0 = (oh * w_out + ow) * cout
                        w3[kd, r0:r0 + cin, c0:c0 + cout] = blk
    return w3


def prepack_discriminator(params, input_spatial, depth=4, dtype=jnp.bfloat16):
    """Pack PyTorch-layout params into MXU-ready matrices (done once).

    Per conv block the 4 depth taps are folded into two matrices:
      W_A = [w3[kd=1] ; w3[kd=0]]  (multiplies slab row od   = [even|odd] halves)
      W_B = [w3[kd=3] ; w3[kd=2]]  (multiplies slab row od+1)
    so a layer is  slab[0:M] @ W_A + slab[1:M+1] @ W_B  (+ bias, LeakyReLU),
    with all batches of a block folded into M.
    """
    packed = []
    s = input_spatial
    total_bytes = 0
    for d in range(depth):
        w, b = params[d]
        w = np.asarray(w, np.float32)
        b = np.asarray(b, np.float32)
        w3 = _expand_conv_weight(w, s)                    # (4, K, N)
        s //= 2
        cout = w.shape[0]
        n_cols = s * s * cout
        if d == depth - 1:
            # lane-dense last block (review #7): pad N up to a multiple of 128
            n_pad = max(((n_cols + 127) // 128) * 128, 128)
        else:
            assert n_cols % 128 == 0, "intermediate layer width must be lane aligned"
            n_pad = n_cols
        if n_pad != n_cols:
            w3 = np.concatenate(
                [w3, np.zeros((4, w3.shape[1], n_pad - n_cols), np.float32)], axis=2)
        b_exp = np.zeros((1, n_pad), np.float32)
        b_exp[0, :n_cols] = np.tile(b, s * s)             # (1, Npad), f32
        w_a = np.concatenate([w3[1], w3[0]], axis=0)      # (2K, Npad)
        w_b = np.concatenate([w3[3], w3[2]], axis=0)      # (2K, Npad)
        total_bytes += (w_a.size + w_b.size) * jnp.dtype(dtype).itemsize
        packed.append((jnp.asarray(w_a, dtype), jnp.asarray(w_b, dtype),
                       jnp.asarray(b_exp, jnp.float32)))

    # Guard the quadratic VMEM growth of the expanded weights (review #6).
    assert total_bytes < 24 * 1024 * 1024, (
        "expanded weights too large for whole-array VMEM residency; "
        "tile the N dim over a grid axis or stream from HBM (see TODO)")

    # Final Conv3d(C_last, 1, kernel_size=output_kernel, padding=0).
    w_out, b_out = params[depth]
    assert w_out.shape[2:] == (1, 1, 1) and s == 1, (
        "fused kernel assumes spatial collapses to 1 and output_kernel == 1")
    # TODO(synk): general output_kernel > 1 (needs one more folded conv stage).
    c_last = w_out.shape[1]
    c_pad = packed[-1][0].shape[1]                        # padded width (128)
    w_col = np.zeros((c_pad, 1), np.float32)
    w_col[:c_last, 0] = np.asarray(w_out, np.float32).reshape(-1)
    b_row = np.asarray(b_out, np.float32).reshape(1, 1)
    packed.append((jnp.asarray(w_col, jnp.float32), jnp.asarray(b_row, jnp.float32)))
    return packed


def _pack_input(x_ncdhw, dtype, num_blocks):
    """NCDHW input -> parity-split slab (num_blocks, bpb*seg + 1, 2*H*W*C).

    Per batch segment (seg = D//2 + 1 rows), row i holds
      cols [0:K)   activation at depth 2i      (row seg-1 = zero pad, depth D)
      cols [K:2K)  activation at depth 2i - 1  (row 0     = zero pad, depth -1)
    plus one trailing all-zero row per block so the shifted B-window stays in
    bounds.  Every conv depth tap becomes a contiguous unit-stride row window
    (no stride-2 access, no selection matmul).
    """
    n, c, d, h, w = x_ncdhw.shape
    assert n % num_blocks == 0
    bpb = n // num_blocks
    k = h * w * c
    seg = d // 2 + 1
    x = jnp.transpose(x_ncdhw, (0, 2, 3, 4, 1)).reshape(n, d, k)   # NDHWC -> (N,D,K)
    zrow = jnp.zeros((n, 1, k), x.dtype)
    even = jnp.concatenate([x[:, 0::2, :], zrow], axis=1)          # depth 2i
    odd = jnp.concatenate([zrow, x[:, 1::2, :]], axis=1)           # depth 2i-1
    slab = jnp.concatenate([even, odd], axis=-1)                   # (N, seg, 2K)
    slab = slab.reshape(num_blocks, bpb * seg, 2 * k)
    tail = jnp.zeros((num_blocks, 1, 2 * k), x.dtype)
    return jnp.concatenate([slab, tail], axis=1).astype(dtype)


# ----------------------------------------------------------------------------
# Fused whole-network Pallas kernel (single pallas_call, everything in VMEM)
# ----------------------------------------------------------------------------
def _make_fused_kernel(bpb, segs, Ks, depth):
    """bpb: batches per grid block.  segs[l], Ks[l]: slab geometry of layer l."""

    def kernel(*args):
        x_ref = args[0]
        wa = [args[1 + 3 * l] for l in range(depth)]
        wb = [args[2 + 3 * l] for l in range(depth)]
        bias = [args[3 + 3 * l] for l in range(depth)]
        w_out_ref = args[1 + 3 * depth]
        b_out_ref = args[2 + 3 * depth]
        out_ref = args[3 + 3 * depth]
        scratch = list(args[4 + 3 * depth:])

        act_dtype = x_ref.dtype
        slabs = [x_ref] + scratch

        # Zero ONLY the depth-padding rows of the scratch slabs (review #9);
        # all other rows are fully overwritten below.  The input slab's pads
        # were zeroed at pack time.
        for l in range(1, depth):
            slab, seg, k = slabs[l], segs[l], Ks[l]
            zhalf = jnp.zeros((1, k), act_dtype)
            for n in range(bpb):
                slab[n * seg:n * seg + 1, k:2 * k] = zhalf            # depth -1 pad
                slab[(n + 1) * seg - 1:(n + 1) * seg, 0:k] = zhalf    # depth D pad
            slab[bpb * seg:bpb * seg + 1, :] = jnp.zeros((1, 2 * k), act_dtype)

        feat = None
        for l in range(depth):
            slab, seg = slabs[l], segs[l]
            m = bpb * seg                                  # batch folded into M
            win_a = slab[0:m, :]                           # rows od   (all batches)
            win_b = slab[1:m + 1, :]                       # rows od+1 (all batches)
            acc = jnp.dot(win_a, wa[l][...], preferred_element_type=jnp.float32)
            acc = acc + jnp.dot(win_b, wb[l][...], preferred_element_type=jnp.float32)
            acc = acc + bias[l][...]                       # (1, N) f32 broadcast
            acc = jnp.where(acc >= 0, acc, 0.2 * acc)      # LeakyReLU(0.2)
            acc = acc.astype(act_dtype)

            d_out = seg - 1
            if l + 1 < depth:
                # Re-pack valid output rows into the next layer's parity slab.
                nxt, seg_n, k_n = slabs[l + 1], segs[l + 1], Ks[l + 1]
                for n in range(bpb):
                    for od in range(d_out):
                        row = acc[n * seg + od:n * seg + od + 1, :]
                        if od % 2 == 0:
                            r = n * seg_n + od // 2
                            nxt[r:r + 1, 0:k_n] = row             # even depths
                        else:
                            r = n * seg_n + (od + 1) // 2
                            nxt[r:r + 1, k_n:2 * k_n] = row       # odd depths
            else:
                # d_out == 1: collect the per-batch feature rows (lane-padded
                # to 128) for the coalesced final 1x1x1 conv (review #8).
                rows = [acc[n * seg:n * seg + 1, :] for n in range(bpb)]
                feat = rows[0] if bpb == 1 else jnp.concatenate(rows, axis=0)

        # Final Conv3d(C_last, 1, k=1): one (bpb, 128) @ (128, 1) matmul and a
        # single store of the whole output block.
        y = jnp.dot(feat.astype(jnp.float32), w_out_ref[...],
                    preferred_element_type=jnp.float32) + b_out_ref[...]
        out_ref[...] = y

    return kernel


def discriminator_forward(x_ncdhw, packed, depth=4, num_batch_blocks=1):
    """x_ncdhw: (N, 1, D, H, W) float32.  packed: output of prepack_discriminator.

    num_batch_blocks: number of grid steps along a "parallel" batch-block axis
    (review #4).  1 = maximal M per matmul (best on single-TC v5e/v6e at small
    batch); 2 lets v7x shard the batch across its two TensorCores.
    """
    dtype = packed[0][0].dtype
    n_batch = x_ncdhw.shape[0]
    spatial = x_ncdhw.shape[2]
    assert n_batch % num_batch_blocks == 0
    bpb = n_batch // num_batch_blocks

    # Per-layer geometry from the packed weights + input spatial size.
    Ks, Ns, segs = [], [], []
    for l in range(depth):
        Ks.append(packed[l][0].shape[0] // 2)
        Ns.append(packed[l][0].shape[1])
        segs.append((spatial // (2 ** l)) // 2 + 1)
    assert Ks[0] == spatial * spatial * x_ncdhw.shape[1]
    for l in range(depth - 1):
        assert Ns[l] == Ks[l + 1]

    x_slab = _pack_input(x_ncdhw, dtype, num_batch_blocks)
    rows_pb = bpb * segs[0] + 1
    assert x_slab.shape == (num_batch_blocks, rows_pb, 2 * Ks[0])

    flat_inputs = [x_slab]
    for l in range(depth):
        flat_inputs += [packed[l][0], packed[l][1], packed[l][2]]
    flat_inputs += [packed[depth][0], packed[depth][1]]

    def _const_spec(arr):
        nd = arr.ndim
        return pl.BlockSpec(arr.shape, lambda b, _nd=nd: (0,) * _nd)

    in_specs = [pl.BlockSpec((None, rows_pb, 2 * Ks[0]), lambda b: (b, 0, 0))]
    in_specs += [_const_spec(a) for a in flat_inputs[1:]]
    out_spec = pl.BlockSpec((None, bpb, 1), lambda b: (b, 0, 0))

    scratch_shapes = [pltpu.VMEM((bpb * segs[l] + 1, 2 * Ks[l]), dtype)
                      for l in range(1, depth)]

    out = pl.pallas_call(
        _make_fused_kernel(bpb, segs, Ks, depth),
        out_shape=jax.ShapeDtypeStruct((num_batch_blocks, bpb, 1), jnp.float32),
        grid=(num_batch_blocks,),
        in_specs=in_specs,
        out_specs=out_spec,
        scratch_shapes=scratch_shapes,
        compiler_params=pltpu.CompilerParams(
            dimension_semantics=("parallel",),
            vmem_limit_bytes=32 * 1024 * 1024),
    )(*flat_inputs)
    return out.reshape(n_batch, 1, 1, 1, 1)


# ----------------------------------------------------------------------------
# Deterministic param init (PyTorch OIDHW layout) + pure-JAX reference
# ----------------------------------------------------------------------------
def init_discriminator_params(key, output_kernel=1, depth=4, n_base_filters=8):
    params = []
    in_ch = 1
    for d in range(depth):
        n_filters = n_base_filters * 2 ** d
        key, kw, kb = jax.random.split(key, 3)
        w = jax.random.normal(kw, (n_filters, in_ch, 4, 4, 4), jnp.float32) * 0.05
        b = jax.random.normal(kb, (n_filters,), jnp.float32) * 0.01
        params.append((w, b))
        in_ch = n_filters
    key, kw, kb = jax.random.split(key, 3)
    ok = output_kernel
    w = jax.random.normal(kw, (1, in_ch, ok, ok, ok), jnp.float32) * 0.05
    b = jax.random.normal(kb, (1,), jnp.float32) * 0.01
    params.append((w, b))
    return params


def _reference_forward(x_ncdhw, params, depth=4):
    x = x_ncdhw.astype(jnp.float32)
    dn = ("NCDHW", "OIDHW", "NCDHW")
    for d in range(depth):
        w, b = params[d]
        x = jax.lax.conv_general_dilated(x, w, (2, 2, 2), [(1, 1)] * 3,
                                         dimension_numbers=dn)
        x = x + b.reshape(1, -1, 1, 1, 1)
        x = jnp.where(x >= 0, x, 0.2 * x)
    w, b = params[depth]
    x = jax.lax.conv_general_dilated(x, w, (1, 1, 1), [(0, 0)] * 3,
                                     dimension_numbers=dn)
    return x + b.reshape(1, -1, 1, 1, 1)


if __name__ == "__main__":
    key = jax.random.PRNGKey(0)
    key, kx = jax.random.split(key)
    # batch=2, channels=1 (required by the module), spatial=16 -> 8 -> 4 -> 2 -> 1
    x = jax.random.normal(kx, (2, 1, 16, 16, 16), jnp.float32)

    params = init_discriminator_params(jax.random.PRNGKey(42), output_kernel=1)
    ref = jax.block_until_ready(_reference_forward(x, params))

    fwd = jax.jit(discriminator_forward)
    fwd_2blk = jax.jit(lambda xx, pp: discriminator_forward(xx, pp, num_batch_blocks=2))

    # 1) f32 operands: tight check that the folded/fused conv math is exact.
    packed_f32 = prepack_discriminator(params, input_spatial=16, dtype=jnp.float32)
    out_f32 = jax.block_until_ready(fwd(x, packed_f32))
    assert out_f32.shape == (2, 1, 1, 1, 1), out_f32.shape
    assert jnp.allclose(out_f32, ref, atol=1e-3, rtol=1e-3), (
        float(jnp.max(jnp.abs(out_f32 - ref))))

    # 2) bf16 MXU operands, f32 accumulation (production path): bf16 tolerance.
    packed_bf16 = prepack_discriminator(params, input_spatial=16, dtype=jnp.bfloat16)
    out_bf16 = jax.block_until_ready(fwd(x, packed_bf16))
    assert out_bf16.shape == (2, 1, 1, 1, 1), out_bf16.shape
    assert jnp.allclose(out_bf16, ref, atol=3e-2, rtol=5e-2), (
        float(jnp.max(jnp.abs(out_bf16 - ref))))

    # 3) batch-block "parallel" grid path (2 blocks -> both v7x TensorCores).
    out_bf16_p = jax.block_until_ready(fwd_2blk(x, packed_bf16))
    assert out_bf16_p.shape == (2, 1, 1, 1, 1), out_bf16_p.shape
    assert jnp.allclose(out_bf16_p, ref, atol=3e-2, rtol=5e-2), (
        float(jnp.max(jnp.abs(out_bf16_p - ref))))

    print("KERNEL_OK")
</pallas_src>

<mosaic_0001>
module attributes {stable_mosaic.version = 11 : i64} {
  func.func @kernel(%arg0: i32, %arg1: memref<1x19x512xf32, #tpu.memory_space<vmem>>, %arg2: memref<512x512xf32, #tpu.memory_space<vmem>>, %arg3: memref<512x512xf32, #tpu.memory_space<vmem>>, %arg4: memref<1x512xf32, #tpu.memory_space<vmem>>, %arg5: memref<1024x256xf32, #tpu.memory_space<vmem>>, %arg6: memref<1024x256xf32, #tpu.memory_space<vmem>>, %arg7: memref<1x256xf32, #tpu.memory_space<vmem>>, %arg8: memref<512x128xf32, #tpu.memory_space<vmem>>, %arg9: memref<512x128xf32, #tpu.memory_space<vmem>>, %arg10: memref<1x128xf32, #tpu.memory_space<vmem>>, %arg11: memref<256x128xf32, #tpu.memory_space<vmem>>, %arg12: memref<256x128xf32, #tpu.memory_space<vmem>>, %arg13: memref<1x128xf32, #tpu.memory_space<vmem>>, %arg14: memref<128x1xf32, #tpu.memory_space<vmem>>, %arg15: memref<1x1xf32, #tpu.memory_space<vmem>>, %arg16: memref<1x2x1xf32, #tpu.memory_space<vmem>>, %arg17: memref<11x1024xf32, #tpu.memory_space<vmem>>, %arg18: memref<7x512xf32, #tpu.memory_space<vmem>>, %arg19: memref<5x256xf32, #tpu.memory_space<vmem>>) attributes {dimension_semantics = [#tpu.dimension_semantics<parallel>], iteration_bounds = array<i64: 1>, scalar_prefetch = 0 : i64, scratch_operands = 3 : i64, tpu.core_type = #tpu.core_type<tc>, window_params = [{transform_indices = @transform_0, window_bounds = array<i64: 1, 19, 512>}, {pipeline_mode = #tpu.pipeline_mode<synchronous>, transform_indices = @transform_1, window_bounds = array<i64: 512, 512>}, {pipeline_mode = #tpu.pipeline_mode<synchronous>, transform_indices = @transform_2, window_bounds = array<i64: 512, 512>}, {pipeline_mode = #tpu.pipeline_mode<synchronous>, transform_indices = @transform_3, window_bounds = array<i64: 1, 512>}, {pipeline_mode = #tpu.pipeline_mode<synchronous>, transform_indices = @transform_4, window_bounds = array<i64: 1024, 256>}, {pipeline_mode = #tpu.pipeline_mode<synchronous>, transform_indices = @transform_5, window_bounds = array<i64: 1024, 256>}, {pipeline_mode = #tpu.pipeline_mode<synchronous>, transform_indices = @transform_6, window_bounds = array<i64: 1, 256>}, {pipeline_mode = #tpu.pipeline_mode<synchronous>, transform_indices = @transform_7, window_bounds = array<i64: 512, 128>}, {pipeline_mode = #tpu.pipeline_mode<synchronous>, transform_indices = @transform_8, window_bounds = array<i64: 512, 128>}, {pipeline_mode = #tpu.pipeline_mode<synchronous>, transform_indices = @transform_9, window_bounds = array<i64: 1, 128>}, {pipeline_mode = #tpu.pipeline_mode<synchronous>, transform_indices = @transform_10, window_bounds = array<i64: 256, 128>}, {pipeline_mode = #tpu.pipeline_mode<synchronous>, transform_indices = @transform_11, window_bounds = array<i64: 256, 128>}, {pipeline_mode = #tpu.pipeline_mode<synchronous>, transform_indices = @transform_12, window_bounds = array<i64: 1, 128>}, {pipeline_mode = #tpu.pipeline_mode<synchronous>, transform_indices = @transform_13, window_bounds = array<i64: 128, 1>}, {pipeline_mode = #tpu.pipeline_mode<synchronous>, transform_indices = @transform_14, window_bounds = array<i64: 1, 1>}, {transform_indices = @transform_15, window_bounds = array<i64: 1, 2, 1>}]} {
    %cst = arith.constant 0.000000e+00 : f32
    %0 = vector.broadcast %cst : f32 to vector<1x512xf32>
    %c0 = arith.constant 0 : index
    %c512 = arith.constant 512 : index
    %1 = vector.load %arg17[%c0, %c512] : memref<11x1024xf32, #tpu.memory_space<vmem>>, vector<1x512xf32>
    tpu.vector_store %arg17[%c0, %c512], %0 {strides = array<i32>} : memref<11x1024xf32, #tpu.memory_space<vmem>>, vector<1x512xf32>,
    %c4 = arith.constant 4 : index
    %c0_0 = arith.constant 0 : index
    %2 = vector.load %arg17[%c4, %c0_0] : memref<11x1024xf32, #tpu.memory_space<vmem>>, vector<1x512xf32>
    tpu.vector_store %arg17[%c4, %c0_0], %0 {strides = array<i32>} : memref<11x1024xf32, #tpu.memory_space<vmem>>, vector<1x512xf32>,
    %c5 = arith.constant 5 : index
    %c512_1 = arith.constant 512 : index
    %3 = vector.load %arg17[%c5, %c512_1] : memref<11x1024xf32, #tpu.memory_space<vmem>>, vector<1x512xf32>
    tpu.vector_store %arg17[%c5, %c512_1], %0 {strides = array<i32>} : memref<11x1024xf32, #tpu.memory_space<vmem>>, vector<1x512xf32>,
    %c9 = arith.constant 9 : index
    %c0_2 = arith.constant 0 : index
    %4 = vector.load %arg17[%c9, %c0_2] : memref<11x1024xf32, #tpu.memory_space<vmem>>, vector<1x512xf32>
    tpu.vector_store %arg17[%c9, %c0_2], %0 {strides = array<i32>} : memref<11x1024xf32, #tpu.memory_space<vmem>>, vector<1x512xf32>,
    %cst_3 = arith.constant 0.000000e+00 : f32
    %5 = vector.broadcast %cst_3 : f32 to vector<1x1024xf32>
    %c10 = arith.constant 10 : index
    %c0_4 = arith.constant 0 : index
    %6 = vector.load %arg17[%c10, %c0_4] : memref<11x1024xf32, #tpu.memory_space<vmem>>, vector<1x1024xf32>
    tpu.vector_store %arg17[%c10, %c0_4], %5 {strides = array<i32>} : memref<11x1024xf32, #tpu.memory_space<vmem>>, vector<1x1024xf32>,
    %cst_5 = arith.constant 0.000000e+00 : f32
    %7 = vector.broadcast %cst_5 : f32 to vector<1x256xf32>
    %c0_6 = arith.constant 0 : index
    %c256 = arith.constant 256 : index
    %8 = vector.load %arg18[%c0_6, %c256] : memref<7x512xf32, #tpu.memory_space<vmem>>, vector<1x256xf32>
    tpu.vector_store %arg18[%c0_6, %c256], %7 {strides = array<i32>} : memref<7x512xf32, #tpu.memory_space<vmem>>, vector<1x256xf32>,
    %c2 = arith.constant 2 : index
    %c0_7 = arith.constant 0 : index
    %9 = vector.load %arg18[%c2, %c0_7] : memref<7x512xf32, #tpu.memory_space<vmem>>, vector<1x256xf32>
    tpu.vector_store %arg18[%c2, %c0_7], %7 {strides = array<i32>} : memref<7x512xf32, #tpu.memory_space<vmem>>, vector<1x256xf32>,
    %c3 = arith.constant 3 : index
    %c256_8 = arith.constant 256 : index
    %10 = vector.load %arg18[%c3, %c256_8] : memref<7x512xf32, #tpu.memory_space<vmem>>, vector<1x256xf32>
    tpu.vector_store %arg18[%c3, %c256_8], %7 {strides = array<i32>} : memref<7x512xf32, #tpu.memory_space<vmem>>, vector<1x256xf32>,
    %c5_9 = arith.constant 5 : index
    %c0_10 = arith.constant 0 : index
    %11 = vector.load %arg18[%c5_9, %c0_10] : memref<7x512xf32, #tpu.memory_space<vmem>>, vector<1x256xf32>
    tpu.vector_store %arg18[%c5_9, %c0_10], %7 {strides = array<i32>} : memref<7x512xf32, #tpu.memory_space<vmem>>, vector<1x256xf32>,
    %cst_11 = arith.constant 0.000000e+00 : f32
    %12 = vector.broadcast %cst_11 : f32 to vector<1x512xf32>
    %c6 = arith.constant 6 : index
    %c0_12 = arith.constant 0 : index
    %13 = vector.load %arg18[%c6, %c0_12] : memref<7x512xf32, #tpu.memory_space<vmem>>, vector<1x512xf32>
    tpu.vector_store %arg18[%c6, %c0_12], %12 {strides = array<i32>} : memref<7x512xf32, #tpu.memory_space<vmem>>, vector<1x512xf32>,
    %cst_13 = arith.constant 0.000000e+00 : f32
    %14 = vector.broadcast %cst_13 : f32 to vector<1x128xf32>
    %c0_14 = arith.constant 0 : index
    %c128 = arith.constant 128 : index
    %15 = vector.load %arg19[%c0_14, %c128] : memref<5x256xf32, #tpu.memory_space<vmem>>, vector<1x128xf32>
    tpu.vector_store %arg19[%c0_14, %c128], %14 {strides = array<i32>} : memref<5x256xf32, #tpu.memory_space<vmem>>, vector<1x128xf32>,
    %c1 = arith.constant 1 : index
    %c0_15 = arith.constant 0 : index
    %16 = vector.load %arg19[%c1, %c0_15] : memref<5x256xf32, #tpu.memory_space<vmem>>, vector<1x128xf32>
    tpu.vector_store %arg19[%c1, %c0_15], %14 {strides = array<i32>} : memref<5x256xf32, #tpu.memory_space<vmem>>, vector<1x128xf32>,
    %c2_16 = arith.constant 2 : index
    %c128_17 = arith.constant 128 : index
    %17 = vector.load %arg19[%c2_16, %c128_17] : memref<5x256xf32, #tpu.memory_space<vmem>>, vector<1x128xf32>
    tpu.vector_store %arg19[%c2_16, %c128_17], %14 {strides = array<i32>} : memref<5x256xf32, #tpu.memory_space<vmem>>, vector<1x128xf32>,
    %c3_18 = arith.constant 3 : index
    %c0_19 = arith.constant 0 : index
    %18 = vector.load %arg19[%c3_18, %c0_19] : memref<5x256xf32, #tpu.memory_space<vmem>>, vector<1x128xf32>
    tpu.vector_store %arg19[%c3_18, %c0_19], %14 {strides = array<i32>} : memref<5x256xf32, #tpu.memory_space<vmem>>, vector<1x128xf32>,
    %cst_20 = arith.constant 0.000000e+00 : f32
    %19 = vector.broadcast %cst_20 : f32 to vector<1x256xf32>
    %c4_21 = arith.constant 4 : index
    %c0_22 = arith.constant 0 : index
    %20 = vector.load %arg19[%c4_21, %c0_22] : memref<5x256xf32, #tpu.memory_space<vmem>>, vector<1x256xf32>
    tpu.vector_store %arg19[%c4_21, %c0_22], %19 {strides = array<i32>} : memref<5x256xf32, #tpu.memory_space<vmem>>, vector<1x256xf32>,
    %c0_23 = arith.constant 0 : index
    %c0_24 = arith.constant 0 : index
    %c0_25 = arith.constant 0 : index
    %21 = vector.load %arg1[%c0_23, %c0_24, %c0_25] : memref<1x19x512xf32, #tpu.memory_space<vmem>>, vector<1x18x512xf32>
    %22 = vector.shape_cast %21 : vector<1x18x512xf32> to vector<18x512xf32>
    %c0_26 = arith.constant 0 : index
    %c1_27 = arith.constant 1 : index
    %c0_28 = arith.constant 0 : index
    %23 = vector.load %arg1[%c0_26, %c1_27, %c0_28] : memref<1x19x512xf32, #tpu.memory_space<vmem>>, vector<1x18x512xf32>
    %24 = vector.shape_cast %23 : vector<1x18x512xf32> to vector<18x512xf32>
    %c0_29 = arith.constant 0 : index
    %c0_30 = arith.constant 0 : index
    %25 = vector.load %arg2[%c0_29, %c0_30] : memref<512x512xf32, #tpu.memory_space<vmem>>, vector<512x512xf32>
    %cst_31 = arith.constant dense<0.000000e+00> : vector<18x512xf32>
    %26 = tpu.matmul %22, %25, %cst_31 {dimension_numbers = #tpu.dot_dimension_numbers<[1], [0], [0], [1], [0, 0, 1, 1], [], []>} : vector<18x512xf32>, vector<512x512xf32>, vector<18x512xf32> -> vector<18x512xf32>
    %c0_32 = arith.constant 0 : index
    %c0_33 = arith.constant 0 : index
    %27 = vector.load %arg3[%c0_32, %c0_33] : memref<512x512xf32, #tpu.memory_space<vmem>>, vector<512x512xf32>
    %cst_34 = arith.constant dense<0.000000e+00> : vector<18x512xf32>
    %28 = tpu.matmul %24, %27, %cst_34 {dimension_numbers = #tpu.dot_dimension_numbers<[1], [0], [0], [1], [0, 0, 1, 1], [], []>} : vector<18x512xf32>, vector<512x512xf32>, vector<18x512xf32> -> vector<18x512xf32>
    %29 = arith.addf %26, %28 : vector<18x512xf32>
    %c0_35 = arith.constant 0 : index
    %c0_36 = arith.constant 0 : index
    %30 = vector.load %arg4[%c0_35, %c0_36] : memref<1x512xf32, #tpu.memory_space<vmem>>, vector<1x512xf32>
    %31 = vector.broadcast %30 : vector<1x512xf32> to vector<18x512xf32>
    %32 = arith.addf %29, %31 : vector<18x512xf32>
    %cst_37 = arith.constant 0.000000e+00 : f32
    %33 = vector.broadcast %cst_37 : f32 to vector<18x512xf32>
    %34 = arith.cmpf oge, %32, %33 : vector<18x512xf32>
    %cst_38 = arith.constant 2.000000e-01 : f32
    %35 = vector.broadcast %cst_38 : f32 to vector<18x512xf32>
    %36 = arith.mulf %35, %32 : vector<18x512xf32>
    %37 = arith.select %34, %32, %36 : vector<18x512xi1>, vector<18x512xf32>
    %38 = vector.extract_strided_slice %37 {offsets = [0, 0], sizes = [1, 512], strides = [1, 1]} : vector<18x512xf32> to vector<1x512xf32>
    %c0_39 = arith.constant 0 : index
    %c0_40 = arith.constant 0 : index
    %39 = vector.load %arg17[%c0_39, %c0_40] : memref<11x1024xf32, #tpu.memory_space<vmem>>, vector<1x512xf32>
    tpu.vector_store %arg17[%c0_39, %c0_40], %38 {strides = array<i32>} : memref<11x1024xf32, #tpu.memory_space<vmem>>, vector<1x512xf32>,
    %40 = vector.extract_strided_slice %37 {offsets = [1, 0], sizes = [1, 512], strides = [1, 1]} : vector<18x512xf32> to vector<1x512xf32>
    %c1_41 = arith.constant 1 : index
    %c512_42 = arith.constant 512 : index
    %41 = vector.load %arg17[%c1_41, %c512_42] : memref<11x1024xf32, #tpu.memory_space<vmem>>, vector<1x512xf32>
    tpu.vector_store %arg17[%c1_41, %c512_42], %40 {strides = array<i32>} : memref<11x1024xf32, #tpu.memory_space<vmem>>, vector<1x512xf32>,
    %42 = vector.extract_strided_slice %37 {offsets = [2, 0], sizes = [1, 512], strides = [1, 1]} : vector<18x512xf32> to vector<1x512xf32>
    %c1_43 = arith.constant 1 : index
    %c0_44 = arith.constant 0 : index
    %43 = vector.load %arg17[%c1_43, %c0_44] : memref<11x1024xf32, #tpu.memory_space<vmem>>, vector<1x512xf32>
    tpu.vector_store %arg17[%c1_43, %c0_44], %42 {strides = array<i32>} : memref<11x1024xf32, #tpu.memory_space<vmem>>, vector<1x512xf32>,
    %44 = vector.extract_strided_slice %37 {offsets = [3, 0], sizes = [1, 512], strides = [1, 1]} : vector<18x512xf32> to vector<1x512xf32>
    %c2_45 = arith.constant 2 : index
    %c512_46 = arith.constant 512 : index
    %45 = vector.load %arg17[%c2_45, %c512_46] : memref<11x1024xf32, #tpu.memory_space<vmem>>, vector<1x512xf32>
    tpu.vector_store %arg17[%c2_45, %c512_46], %44 {strides = array<i32>} : memref<11x1024xf32, #tpu.memory_space<vmem>>, vector<1x512xf32>,
    %46 = vector.extract_strided_slice %37 {offsets = [4, 0], sizes = [1, 512], strides = [1, 1]} : vector<18x512xf32> to vector<1x512xf32>
    %c2_47 = arith.constant 2 : index
    %c0_48 = arith.constant 0 : index
    %47 = vector.load %arg17[%c2_47, %c0_48] : memref<11x1024xf32, #tpu.memory_space<vmem>>, vector<1x512xf32>
    tpu.vector_store %arg17[%c2_47, %c0_48], %46 {strides = array<i32>} : memref<11x1024xf32, #tpu.memory_space<vmem>>, vector<1x512xf32>,
    %48 = vector.extract_strided_slice %37 {offsets = [5, 0], sizes = [1, 512], strides = [1, 1]} : vector<18x512xf32> to vector<1x512xf32>
    %c3_49 = arith.constant 3 : index
    %c512_50 = arith.constant 512 : index
    %49 = vector.load %arg17[%c3_49, %c512_50] : memref<11x1024xf32, #tpu.memory_space<vmem>>, vector<1x512xf32>
    tpu.vector_store %arg17[%c3_49, %c512_50], %48 {strides = array<i32>} : memref<11x1024xf32, #tpu.memory_space<vmem>>, vector<1x512xf32>,
    %50 = vector.extract_strided_slice %37 {offsets = [6, 0], sizes = [1, 512], strides = [1, 1]} : vector<18x512xf32> to vector<1x512xf32>
    %c3_51 = arith.constant 3 : index
    %c0_52 = arith.constant 0 : index
    %51 = vector.load %arg17[%c3_51, %c0_52] : memref<11x1024xf32, #tpu.memory_space<vmem>>, vector<1x512xf32>
    tpu.vector_store %arg17[%c3_51, %c0_52], %50 {strides = array<i32>} : memref<11x1024xf32, #tpu.memory_space<vmem>>, vector<1x512xf32>,
    %52 = vector.extract_strided_slice %37 {offsets = [7, 0], sizes = [1, 512], strides = [1, 1]} : vector<18x512xf32> to vector<1x512xf32>
    %c4_53 = arith.constant 4 : index
    %c512_54 = arith.constant 512 : index
    %53 = vector.load %arg17[%c4_53, %c512_54] : memref<11x1024xf32, #tpu.memory_space<vmem>>, vector<1x512xf32>
    tpu.vector_store %arg17[%c4_53, %c512_54], %52 {strides = array<i32>} : memref<11x1024xf32, #tpu.memory_space<vmem>>, vector<1x512xf32>,
    %54 = vector.extract_strided_slice %37 {offsets = [9, 0], sizes = [1, 512], strides = [1, 1]} : vector<18x512xf32> to vector<1x512xf32>
    %c5_55 = arith.constant 5 : index
    %c0_56 = arith.constant 0 : index
    %55 = vector.load %arg17[%c5_55, %c0_56] : memref<11x1024xf32, #tpu.memory_space<vmem>>, vector<1x512xf32>
    tpu.vector_store %arg17[%c5_55, %c0_56], %54 {strides = array<i32>} : memref<11x1024xf32, #tpu.memory_space<vmem>>, vector<1x512xf32>,
    %56 = vector.extract_strided_slice %37 {offsets = [10, 0], sizes = [1, 512], strides = [1, 1]} : vector<18x512xf32> to vector<1x512xf32>
    %c6_57 = arith.constant 6 : index
    %c512_58 = arith.constant 512 : index
    %57 = vector.load %arg17[%c6_57, %c512_58] : memref<11x1024xf32, #tpu.memory_space<vmem>>, vector<1x512xf32>
    tpu.vector_store %arg17[%c6_57, %c512_58], %56 {strides = array<i32>} : memref<11x1024xf32, #tpu.memory_space<vmem>>, vector<1x512xf32>,
    %58 = vector.extract_strided_slice %37 {offsets = [11, 0], sizes = [1, 512], strides = [1, 1]} : vector<18x512xf32> to vector<1x512xf32>
    %c6_59 = arith.constant 6 : index
    %c0_60 = arith.constant 0 : index
    %59 = vector.load %arg17[%c6_59, %c0_60] : memref<11x1024xf32, #tpu.memory_space<vmem>>, vector<1x512xf32>
    tpu.vector_store %arg17[%c6_59, %c0_60], %58 {strides = array<i32>} : memref<11x1024xf32, #tpu.memory_space<vmem>>, vector<1x512xf32>,
    %60 = vector.extract_strided_slice %37 {offsets = [12, 0], sizes = [1, 512], strides = [1, 1]} : vector<18x512xf32> to vector<1x512xf32>
    %c7 = arith.constant 7 : index
    %c512_61 = arith.constant 512 : index
    %61 = vector.load %arg17[%c7, %c512_61] : memref<11x1024xf32, #tpu.memory_space<vmem>>, vector<1x512xf32>
    tpu.vector_store %arg17[%c7, %c512_61], %60 {strides = array<i32>} : memref<11x1024xf32, #tpu.memory_space<vmem>>, vector<1x512xf32>,
    %62 = vector.extract_strided_slice %37 {offsets = [13, 0], sizes = [1, 512], strides = [1, 1]} : vector<18x512xf32> to vector<1x512xf32>
    %c7_62 = arith.constant 7 : index
    %c0_63 = arith.constant 0 : index
    %63 = vector.load %arg17[%c7_62, %c0_63] : memref<11x1024xf32, #tpu.memory_space<vmem>>, vector<1x512xf32>
    tpu.vector_store %arg17[%c7_62, %c0_63], %62 {strides = array<i32>} : memref<11x1024xf32, #tpu.memory_space<vmem>>, vector<1x512xf32>,
    %64 = vector.extract_strided_slice %37 {offsets = [14, 0], sizes = [1, 512], strides = [1, 1]} : vector<18x512xf32> to vector<1x512xf32>
    %c8 = arith.constant 8 : index
    %c512_64 = arith.constant 512 : index
    %65 = vector.load %arg17[%c8, %c512_64] : memref<11x1024xf32, #tpu.memory_space<vmem>>, vector<1x512xf32>
    tpu.vector_store %arg17[%c8, %c512_64], %64 {strides = array<i32>} : memref<11x1024xf32, #tpu.memory_space<vmem>>, vector<1x512xf32>,
    %66 = vector.extract_strided_slice %37 {offsets = [15, 0], sizes = [1, 512], strides = [1, 1]} : vector<18x512xf32> to vector<1x512xf32>
    %c8_65 = arith.constant 8 : index
    %c0_66 = arith.constant 0 : index
    %67 = vector.load %arg17[%c8_65, %c0_66] : memref<11x1024xf32, #tpu.memory_space<vmem>>, vector<1x512xf32>
    tpu.vector_store %arg17[%c8_65, %c0_66], %66 {strides = array<i32>} : memref<11x1024xf32, #tpu.memory_space<vmem>>, vector<1x512xf32>,
    %68 = vector.extract_strided_slice %37 {offsets = [16, 0], sizes = [1, 512], strides = [1, 1]} : vector<18x512xf32> to vector<1x512xf32>
    %c9_67 = arith.constant 9 : index
    %c512_68 = arith.constant 512 : index
    %69 = vector.load %arg17[%c9_67, %c512_68] : memref<11x1024xf32, #tpu.memory_space<vmem>>, vector<1x512xf32>
    tpu.vector_store %arg17[%c9_67, %c512_68], %68 {strides = array<i32>} : memref<11x1024xf32, #tpu.memory_space<vmem>>, vector<1x512xf32>,
    %c0_69 = arith.constant 0 : index
    %c0_70 = arith.constant 0 : index
    %70 = vector.load %arg17[%c0_69, %c0_70] : memref<11x1024xf32, #tpu.memory_space<vmem>>, vector<10x1024xf32>
    %c1_71 = arith.constant 1 : index
    %c0_72 = arith.constant 0 : index
    %71 = vector.load %arg17[%c1_71, %c0_72] : memref<11x1024xf32, #tpu.memory_space<vmem>>, vector<10x1024xf32>
    %c0_73 = arith.constant 0 : index
    %c0_74 = arith.constant 0 : index
    %72 = vector.load %arg5[%c0_73, %c0_74] : memref<1024x256xf32, #tpu.memory_space<vmem>>, vector<1024x256xf32>
    %cst_75 = arith.constant dense<0.000000e+00> : vector<10x256xf32>
    %73 = tpu.matmul %70, %72, %cst_75 {dimension_numbers = #tpu.dot_dimension_numbers<[1], [0], [0], [1], [0, 0, 1, 1], [], []>} : vector<10x1024xf32>, vector<1024x256xf32>, vector<10x256xf32> -> vector<10x256xf32>
    %c0_76 = arith.constant 0 : index
    %c0_77 = arith.constant 0 : index
    %74 = vector.load %arg6[%c0_76, %c0_77] : memref<1024x256xf32, #tpu.memory_space<vmem>>, vector<1024x256xf32>
    %cst_78 = arith.constant dense<0.000000e+00> : vector<10x256xf32>
    %75 = tpu.matmul %71, %74, %cst_78 {dimension_numbers = #tpu.dot_dimension_numbers<[1], [0], [0], [1], [0, 0, 1, 1], [], []>} : vector<10x1024xf32>, vector<1024x256xf32>, vector<10x256xf32> -> vector<10x256xf32>
    %76 = arith.addf %73, %75 : vector<10x256xf32>
    %c0_79 = arith.constant 0 : index
    %c0_80 = arith.constant 0 : index
    %77 = vector.load %arg7[%c0_79, %c0_80] : memref<1x256xf32, #tpu.memory_space<vmem>>, vector<1x256xf32>
    %78 = vector.broadcast %77 : vector<1x256xf32> to vector<10x256xf32>
    %79 = arith.addf %76, %78 : vector<10x256xf32>
    %cst_81 = arith.constant 0.000000e+00 : f32
    %80 = vector.broadcast %cst_81 : f32 to vector<10x256xf32>
    %81 = arith.cmpf oge, %79, %80 : vector<10x256xf32>
    %cst_82 = arith.constant 2.000000e-01 : f32
    %82 = vector.broadcast %cst_82 : f32 to vector<10x256xf32>
    %83 = arith.mulf %82, %79 : vector<10x256xf32>
    %84 = arith.select %81, %79, %83 : vector<10x256xi1>, vector<10x256xf32>
    %85 = vector.extract_strided_slice %84 {offsets = [0, 0], sizes = [1, 256], strides = [1, 1]} : vector<10x256xf32> to vector<1x256xf32>
    %c0_83 = arith.constant 0 : index
    %c0_84 = arith.constant 0 : index
    %86 = vector.load %arg18[%c0_83, %c0_84] : memref<7x512xf32, #tpu.memory_space<vmem>>, vector<1x256xf32>
    tpu.vector_store %arg18[%c0_83, %c0_84], %85 {strides = array<i32>} : memref<7x512xf32, #tpu.memory_space<vmem>>, vector<1x256xf32>,
    %87 = vector.extract_strided_slice %84 {offsets = [1, 0], sizes = [1, 256], strides = [1, 1]} : vector<10x256xf32> to vector<1x256xf32>
    %c1_85 = arith.constant 1 : index
    %c256_86 = arith.constant 256 : index
    %88 = vector.load %arg18[%c1_85, %c256_86] : memref<7x512xf32, #tpu.memory_space<vmem>>, vector<1x256xf32>
    tpu.vector_store %arg18[%c1_85, %c256_86], %87 {strides = array<i32>} : memref<7x512xf32, #tpu.memory_space<vmem>>, vector<1x256xf32>,
    %89 = vector.extract_strided_slice %84 {offsets = [2, 0], sizes = [1, 256], strides = [1, 1]} : vector<10x256xf32> to vector<1x256xf32>
    %c1_87 = arith.constant 1 : index
    %c0_88 = arith.constant 0 : index
    %90 = vector.load %arg18[%c1_87, %c0_88] : memref<7x512xf32, #tpu.memory_space<vmem>>, vector<1x256xf32>
    tpu.vector_store %arg18[%c1_87, %c0_88], %89 {strides = array<i32>} : memref<7x512xf32, #tpu.memory_space<vmem>>, vector<1x256xf32>,
    %91 = vector.extract_strided_slice %84 {offsets = [3, 0], sizes = [1, 256], strides = [1, 1]} : vector<10x256xf32> to vector<1x256xf32>
    %c2_89 = arith.constant 2 : index
    %c256_90 = arith.constant 256 : index
    %92 = vector.load %arg18[%c2_89, %c256_90] : memref<7x512xf32, #tpu.memory_space<vmem>>, vector<1x256xf32>
    tpu.vector_store %arg18[%c2_89, %c256_90], %91 {strides = array<i32>} : memref<7x512xf32, #tpu.memory_space<vmem>>, vector<1x256xf32>,
    %93 = vector.extract_strided_slice %84 {offsets = [5, 0], sizes = [1, 256], strides = [1, 1]} : vector<10x256xf32> to vector<1x256xf32>
    %c3_91 = arith.constant 3 : index
    %c0_92 = arith.constant 0 : index
    %94 = vector.load %arg18[%c3_91, %c0_92] : memref<7x512xf32, #tpu.memory_space<vmem>>, vector<1x256xf32>
    tpu.vector_store %arg18[%c3_91, %c0_92], %93 {strides = array<i32>} : memref<7x512xf32, #tpu.memory_space<vmem>>, vector<1x256xf32>,
    %95 = vector.extract_strided_slice %84 {offsets = [6, 0], sizes = [1, 256], strides = [1, 1]} : vector<10x256xf32> to vector<1x256xf32>
    %c4_93 = arith.constant 4 : index
    %c256_94 = arith.constant 256 : index
    %96 = vector.load %arg18[%c4_93, %c256_94] : memref<7x512xf32, #tpu.memory_space<vmem>>, vector<1x256xf32>
    tpu.vector_store %arg18[%c4_93, %c256_94], %95 {strides = array<i32>} : memref<7x512xf32, #tpu.memory_space<vmem>>, vector<1x256xf32>,
    %97 = vector.extract_strided_slice %84 {offsets = [7, 0], sizes = [1, 256], strides = [1, 1]} : vector<10x256xf32> to vector<1x256xf32>
    %c4_95 = arith.constant 4 : index
    %c0_96 = arith.constant 0 : index
    %98 = vector.load %arg18[%c4_95, %c0_96] : memref<7x512xf32, #tpu.memory_space<vmem>>, vector<1x256xf32>
    tpu.vector_store %arg18[%c4_95, %c0_96], %97 {strides = array<i32>} : memref<7x512xf32, #tpu.memory_space<vmem>>, vector<1x256xf32>,
    %99 = vector.extract_strided_slice %84 {offsets = [8, 0], sizes = [1, 256], strides = [1, 1]} : vector<10x256xf32> to vector<1x256xf32>
    %c5_97 = arith.constant 5 : index
    %c256_98 = arith.constant 256 : index
    %100 = vector.load %arg18[%c5_97, %c256_98] : memref<7x512xf32, #tpu.memory_space<vmem>>, vector<1x256xf32>
    tpu.vector_store %arg18[%c5_97, %c256_98], %99 {strides = array<i32>} : memref<7x512xf32, #tpu.memory_space<vmem>>, vector<1x256xf32>,
    %c0_99 = arith.constant 0 : index
    %c0_100 = arith.constant 0 : index
    %101 = vector.load %arg18[%c0_99, %c0_100] : memref<7x512xf32, #tpu.memory_space<vmem>>, vector<6x512xf32>
    %c1_101 = arith.constant 1 : index
    %c0_102 = arith.constant 0 : index
    %102 = vector.load %arg18[%c1_101, %c0_102] : memref<7x512xf32, #tpu.memory_space<vmem>>, vector<6x512xf32>
    %c0_103 = arith.constant 0 : index
    %c0_104 = arith.constant 0 : index
    %103 = vector.load %arg8[%c0_103, %c0_104] : memref<512x128xf32, #tpu.memory_space<vmem>>, vector<512x128xf32>
    %cst_105 = arith.constant dense<0.000000e+00> : vector<6x128xf32>
    %104 = tpu.matmul %101, %103, %cst_105 {dimension_numbers = #tpu.dot_dimension_numbers<[1], [0], [0], [1], [0, 0, 1, 1], [], []>} : vector<6x512xf32>, vector<512x128xf32>, vector<6x128xf32> -> vector<6x128xf32>
    %c0_106 = arith.constant 0 : index
    %c0_107 = arith.constant 0 : index
    %105 = vector.load %arg9[%c0_106, %c0_107] : memref<512x128xf32, #tpu.memory_space<vmem>>, vector<512x128xf32>
    %cst_108 = arith.constant dense<0.000000e+00> : vector<6x128xf32>
    %106 = tpu.matmul %102, %105, %cst_108 {dimension_numbers = #tpu.dot_dimension_numbers<[1], [0], [0], [1], [0, 0, 1, 1], [], []>} : vector<6x512xf32>, vector<512x128xf32>, vector<6x128xf32> -> vector<6x128xf32>
    %107 = arith.addf %104, %106 : vector<6x128xf32>
    %c0_109 = arith.constant 0 : index
    %c0_110 = arith.constant 0 : index
    %108 = vector.load %arg10[%c0_109, %c0_110] : memref<1x128xf32, #tpu.memory_space<vmem>>, vector<1x128xf32>
    %109 = vector.broadcast %108 : vector<1x128xf32> to vector<6x128xf32>
    %110 = arith.addf %107, %109 : vector<6x128xf32>
    %cst_111 = arith.constant 0.000000e+00 : f32
    %111 = vector.broadcast %cst_111 : f32 to vector<6x128xf32>
    %112 = arith.cmpf oge, %110, %111 : vector<6x128xf32>
    %cst_112 = arith.constant 2.000000e-01 : f32
    %113 = vector.broadcast %cst_112 : f32 to vector<6x128xf32>
    %114 = arith.mulf %113, %110 : vector<6x128xf32>
    %115 = arith.select %112, %110, %114 : vector<6x128xi1>, vector<6x128xf32>
    %116 = vector.extract_strided_slice %115 {offsets = [0, 0], sizes = [1, 128], strides = [1, 1]} : vector<6x128xf32> to vector<1x128xf32>
    %c0_113 = arith.constant 0 : index
    %c0_114 = arith.constant 0 : index
    %117 = vector.load %arg19[%c0_113, %c0_114] : memref<5x256xf32, #tpu.memory_space<vmem>>, vector<1x128xf32>
    tpu.vector_store %arg19[%c0_113, %c0_114], %116 {strides = array<i32>} : memref<5x256xf32, #tpu.memory_space<vmem>>, vector<1x128xf32>,
    %118 = vector.extract_strided_slice %115 {offsets = [1, 0], sizes = [1, 128], strides = [1, 1]} : vector<6x128xf32> to vector<1x128xf32>
    %c1_115 = arith.constant 1 : index
    %c128_116 = arith.constant 128 : index
    %119 = vector.load %arg19[%c1_115, %c128_116] : memref<5x256xf32, #tpu.memory_space<vmem>>, vector<1x128xf32>
    tpu.vector_store %arg19[%c1_115, %c128_116], %118 {strides = array<i32>} : memref<5x256xf32, #tpu.memory_space<vmem>>, vector<1x128xf32>,
    %120 = vector.extract_strided_slice %115 {offsets = [3, 0], sizes = [1, 128], strides = [1, 1]} : vector<6x128xf32> to vector<1x128xf32>
    %c2_117 = arith.constant 2 : index
    %c0_118 = arith.constant 0 : index
    %121 = vector.load %arg19[%c2_117, %c0_118] : memref<5x256xf32, #tpu.memory_space<vmem>>, vector<1x128xf32>
    tpu.vector_store %arg19[%c2_117, %c0_118], %120 {strides = array<i32>} : memref<5x256xf32, #tpu.memory_space<vmem>>, vector<1x128xf32>,
    %122 = vector.extract_strided_slice %115 {offsets = [4, 0], sizes = [1, 128], strides = [1, 1]} : vector<6x128xf32> to vector<1x128xf32>
    %c3_119 = arith.constant 3 : index
    %c128_120 = arith.constant 128 : index
    %123 = vector.load %arg19[%c3_119, %c128_120] : memref<5x256xf32, #tpu.memory_space<vmem>>, vector<1x128xf32>
    tpu.vector_store %arg19[%c3_119, %c128_120], %122 {strides = array<i32>} : memref<5x256xf32, #tpu.memory_space<vmem>>, vector<1x128xf32>,
    %c0_121 = arith.constant 0 : index
    %c0_122 = arith.constant 0 : index
    %124 = vector.load %arg19[%c0_121, %c0_122] : memref<5x256xf32, #tpu.memory_space<vmem>>, vector<4x256xf32>
    %c1_123 = arith.constant 1 : index
    %c0_124 = arith.constant 0 : index
    %125 = vector.load %arg19[%c1_123, %c0_124] : memref<5x256xf32, #tpu.memory_space<vmem>>, vector<4x256xf32>
    %c0_125 = arith.constant 0 : index
    %c0_126 = arith.constant 0 : index
    %126 = vector.load %arg11[%c0_125, %c0_126] : memref<256x128xf32, #tpu.memory_space<vmem>>, vector<256x128xf32>
    %cst_127 = arith.constant dense<0.000000e+00> : vector<4x128xf32>
    %127 = tpu.matmul %124, %126, %cst_127 {dimension_numbers = #tpu.dot_dimension_numbers<[1], [0], [0], [1], [0, 0, 1, 1], [], []>} : vector<4x256xf32>, vector<256x128xf32>, vector<4x128xf32> -> vector<4x128xf32>
    %c0_128 = arith.constant 0 : index
    %c0_129 = arith.constant 0 : index
    %128 = vector.load %arg12[%c0_128, %c0_129] : memref<256x128xf32, #tpu.memory_space<vmem>>, vector<256x128xf32>
    %cst_130 = arith.constant dense<0.000000e+00> : vector<4x128xf32>
    %129 = tpu.matmul %125, %128, %cst_130 {dimension_numbers = #tpu.dot_dimension_numbers<[1], [0], [0], [1], [0, 0, 1, 1], [], []>} : vector<4x256xf32>, vector<256x128xf32>, vector<4x128xf32> -> vector<4x128xf32>
    %130 = arith.addf %127, %129 : vector<4x128xf32>
    %c0_131 = arith.constant 0 : index
    %c0_132 = arith.constant 0 : index
    %131 = vector.load %arg13[%c0_131, %c0_132] : memref<1x128xf32, #tpu.memory_space<vmem>>, vector<1x128xf32>
    %132 = vector.broadcast %131 : vector<1x128xf32> to vector<4x128xf32>
    %133 = arith.addf %130, %132 : vector<4x128xf32>
    %cst_133 = arith.constant 0.000000e+00 : f32
    %134 = vector.broadcast %cst_133 : f32 to vector<4x128xf32>
    %135 = arith.cmpf oge, %133, %134 : vector<4x128xf32>
    %cst_134 = arith.constant 2.000000e-01 : f32
    %136 = vector.broadcast %cst_134 : f32 to vector<4x128xf32>
    %137 = arith.mulf %136, %133 : vector<4x128xf32>
    %138 = arith.select %135, %133, %137 : vector<4x128xi1>, vector<4x128xf32>
    %139 = vector.extract_strided_slice %138 {offsets = [0, 0], sizes = [1, 128], strides = [1, 1]} : vector<4x128xf32> to vector<1x128xf32>
    %140 = vector.extract_strided_slice %138 {offsets = [2, 0], sizes = [1, 128], strides = [1, 1]} : vector<4x128xf32> to vector<1x128xf32>
    %141 = tpu.concatenate %139, %140 in 0 : vector<1x128xf32>, vector<1x128xf32> -> vector<2x128xf32>
    %c0_135 = arith.constant 0 : index
    %c0_136 = arith.constant 0 : index
    %142 = vector.load %arg14[%c0_135, %c0_136] : memref<128x1xf32, #tpu.memory_space<vmem>>, vector<128x1xf32>
    %cst_137 = arith.constant dense<0.000000e+00> : vector<2x1xf32>
    %143 = tpu.matmul %141, %142, %cst_137 {dimension_numbers = #tpu.dot_dimension_numbers<[1], [0], [0], [1], [0, 0, 1, 1], [], []>} : vector<2x128xf32>, vector<128x1xf32>, vector<2x1xf32> -> vector<2x1xf32>
    %c0_138 = arith.constant 0 : index
    %c0_139 = arith.constant 0 : index
    %144 = vector.load %arg15[%c0_138, %c0_139] : memref<1x1xf32, #tpu.memory_space<vmem>>, vector<1x1xf32>
    %145 = vector.broadcast %144 : vector<1x1xf32> to vector<2x1xf32>
    %146 = arith.addf %143, %145 : vector<2x1xf32>
    %c0_140 = arith.constant 0 : index
    %c0_141 = arith.constant 0 : index
    %c0_142 = arith.constant 0 : index
    %147 = vector.load %arg16[%c0_140, %c0_141, %c0_142] : memref<1x2x1xf32, #tpu.memory_space<vmem>>, vector<1x2x1xf32>
    %148 = vector.shape_cast %147 : vector<1x2x1xf32> to vector<2x1xf32>
    %149 = vector.shape_cast %146 : vector<2x1xf32> to vector<1x2x1xf32>
    tpu.vector_store %arg16[%c0_140, %c0_141, %c0_142], %149 {strides = array<i32>} : memref<1x2x1xf32, #tpu.memory_space<vmem>>, vector<1x2x1xf32>,
    return
  }
  func.func @transform_0(%arg0: i32) -> (i32, i32, i32) {
    %c0_i32 = arith.constant 0 : i32
    %c0_i32_0 = arith.constant 0 : i32
    %c0_i32_1 = arith.constant 0 : i32
    return %arg0, %c0_i32, %c0_i32_0 : i32, i32, i32
  }
  func.func @transform_1(%arg0: i32) -> (i32, i32) {
    %c0_i32 = arith.constant 0 : i32
    %c0_i32_0 = arith.constant 0 : i32
    %c0_i32_1 = arith.constant 0 : i32
    return %c0_i32, %c0_i32_0 : i32, i32
  }
  func.func @transform_2(%arg0: i32) -> (i32, i32) {
    %c0_i32 = arith.constant 0 : i32
    %c0_i32_0 = arith.constant 0 : i32
    %c0_i32_1 = arith.constant 0 : i32
    return %c0_i32, %c0_i32_0 : i32, i32
  }
  func.func @transform_3(%arg0: i32) -> (i32, i32) {
    %c0_i32 = arith.constant 0 : i32
    %c0_i32_0 = arith.constant 0 : i32
    %c0_i32_1 = arith.constant 0 : i32
    return %c0_i32, %c0_i32_0 : i32, i32
  }
  func.func @transform_4(%arg0: i32) -> (i32, i32) {
    %c0_i32 = arith.constant 0 : i32
    %c0_i32_0 = arith.constant 0 : i32
    %c0_i32_1 = arith.constant 0 : i32
    return %c0_i32, %c0_i32_0 : i32, i32
  }
  func.func @transform_5(%arg0: i32) -> (i32, i32) {
    %c0_i32 = arith.constant 0 : i32
    %c0_i32_0 = arith.constant 0 : i32
    %c0_i32_1 = arith.constant 0 : i32
    return %c0_i32, %c0_i32_0 : i32, i32
  }
  func.func @transform_6(%arg0: i32) -> (i32, i32) {
    %c0_i32 = arith.constant 0 : i32
    %c0_i32_0 = arith.constant 0 : i32
    %c0_i32_1 = arith.constant 0 : i32
    return %c0_i32, %c0_i32_0 : i32, i32
  }
  func.func @transform_7(%arg0: i32) -> (i32, i32) {
    %c0_i32 = arith.constant 0 : i32
    %c0_i32_0 = arith.constant 0 : i32
    %c0_i32_1 = arith.constant 0 : i32
    return %c0_i32, %c0_i32_0 : i32, i32
  }
  func.func @transform_8(%arg0: i32) -> (i32, i32) {
    %c0_i32 = arith.constant 0 : i32
    %c0_i32_0 = arith.constant 0 : i32
    %c0_i32_1 = arith.constant 0 : i32
    return %c0_i32, %c0_i32_0 : i32, i32
  }
  func.func @transform_9(%arg0: i32) -> (i32, i32) {
    %c0_i32 = arith.constant 0 : i32
    %c0_i32_0 = arith.constant 0 : i32
    %c0_i32_1 = arith.constant 0 : i32
    return %c0_i32, %c0_i32_0 : i32, i32
  }
  func.func @transform_10(%arg0: i32) -> (i32, i32) {
    %c0_i32 = arith.constant 0 : i32
    %c0_i32_0 = arith.constant 0 : i32
    %c0_i32_1 = arith.constant 0 : i32
    return %c0_i32, %c0_i32_0 : i32, i32
  }
  func.func @transform_11(%arg0: i32) -> (i32, i32) {
    %c0_i32 = arith.constant 0 : i32
    %c0_i32_0 = arith.constant 0 : i32
    %c0_i32_1 = arith.constant 0 : i32
    return %c0_i32, %c0_i32_0 : i32, i32
  }
  func.func @transform_12(%arg0: i32) -> (i32, i32) {
    %c0_i32 = arith.constant 0 : i32
    %c0_i32_0 = arith.constant 0 : i32
    %c0_i32_1 = arith.constant 0 : i32
    return %c0_i32, %c0_i32_0 : i32, i32
  }
  func.func @transform_13(%arg0: i32) -> (i32, i32) {
    %c0_i32 = arith.constant 0 : i32
    %c0_i32_0 = arith.constant 0 : i32
    %c0_i32_1 = arith.constant 0 : i32
    return %c0_i32, %c0_i32_0 : i32, i32
  }
  func.func @transform_14(%arg0: i32) -> (i32, i32) {
    %c0_i32 = arith.constant 0 : i32
    %c0_i32_0 = arith.constant 0 : i32
    %c0_i32_1 = arith.constant 0 : i32
    return %c0_i32, %c0_i32_0 : i32, i32
  }
  func.func @transform_15(%arg0: i32) -> (i32, i32, i32) {
    %c0_i32 = arith.constant 0 : i32
    %c0_i32_0 = arith.constant 0 : i32
    %c0_i32_1 = arith.constant 0 : i32
    return %arg0, %c0_i32, %c0_i32_0 : i32, i32, i32
  }
}

</mosaic_0001>

<bundles_post_ra>
// kernel: discriminator_forward.1
= control target key start
LH: loop header
LB: loop body
LE: loop exit
PB: predicated region body
PF: predicated region fallthrough
CT: control target
= control target key end

     0   :  { %s5445_s0 = inlined_call_operand.vmem [shape: f32[1,19,512], index: 0, kind: input, shape index: {}]   ;;  %s5446_s1 = inlined_call_operand.hbm [shape: f32[512,512], index: 1, kind: input, shape index: {}]   ;;  %s5447_s2 = inlined_call_operand.hbm [shape: f32[512,512], index: 2, kind: input, shape index: {}]   ;;  %s5448_s3 = inlined_call_operand.vmem [shape: f32[1,512], index: 3, kind: input, shape index: {}]   ;;  %s5449_s4 = inlined_call_operand.hbm [shape: f32[1024,256], index: 4, kind: input, shape index: {}]   ;;  %s5450_s5 = inlined_call_operand.hbm [shape: f32[1024,256], index: 5, kind: input, shape index: {}]   ;;  %s5451_s6 = inlined_call_operand.vmem [shape: f32[1,256], index: 6, kind: input, shape index: {}]   ;;  %s5452_s7 = inlined_call_operand.vmem [shape: f32[512,128], index: 7, kind: input, shape index: {}]   ;;  %s5453_s8 = inlined_call_operand.vmem [shape: f32[512,128], index: 8, kind: input, shape index: {}]   ;;  %s5454_s9 = inlined_call_operand.vmem [shape: f32[1,128], index: 9, kind: input, shape index: {}]   ;;  %s5455_s10 = inlined_call_operand.vmem [shape: f32[256,128], index: 10, kind: input, shape index: {}]   ;;  %s5456_s11 = inlined_call_operand.hbm [shape: f32[256,128], index: 11, kind: input, shape index: {}]   ;;  %s5457_s12 = inlined_call_operand.vmem [shape: f32[1,128], index: 12, kind: input, shape index: {}]   ;;  %s5458_s13 = inlined_call_operand.vmem [shape: f32[128,1], index: 13, kind: input, shape index: {}]   ;;  %s5459_s14 = inlined_call_operand.<no memory space> [shape: f32[1,1], index: 14, kind: input, shape index: {}]   ;;  %s5460_s15 = inlined_call_operand.vmem [shape: f32[1,2,1], index: 15, kind: output, shape index: {}]  }
   0x1   :  { %v20_v0 = vstv %s5459_s14 }
   0x2   :  { %21 = vst [vmem:[#allocation5] sm:$0x1] %v20_v0 }
   0x3   :  { %22 = vsyncpa [#allocation7], 0 }
   0x4   :  { %23 = vsyncpa [#allocation9], 0 }
   0x5   :  { %24 = vsyncpa [#allocation12], 0  ;;  %s44_s22 = sshll.u32 %s5447_s2, 4  ;;  %s3922_s23 = smov [#allocation8]   ;;  %s45_s22 = int_to_ptr.hbm [resolvable:$true] %s44_s22 }
   0x6   :  { %s46_s24 = sshll.u32 %s3922_s23, 4  ;;  %s3923_s25 = smov 512   ;;  %s47_s24 = int_to_ptr.vmem [resolvable:$true] %s46_s24 }
   0x7   :  { %s3924_s26 = smov 32   ;;  %s72_s29 = sshll.u32 %s5450_s5, 4  ;;  %s73_s29 = int_to_ptr.hbm [resolvable:$true] %s72_s29 }
   0x8   :  { %52 = dma.hbm_to_vmem [thread:$0]  %s45_s22, 32768, %s47_s24, [#allocation9], %s3923_s25, %s3923_s25, %s3924_s26  }
   0x9   :  { %s3925_s14 = smov [#allocation11]   ;;  %s31_s18 = sshll.u32 %s5446_s1, 4  ;;  %s32_s18 = int_to_ptr.hbm [resolvable:$true] %s31_s18 }
   0xa   :  { %s74_s30 = sshll.u32 %s3925_s14, 4  ;;  %s3926_s2 = smov 256   ;;  %s75_s30 = int_to_ptr.vmem [resolvable:$true] %s74_s30 }
   0xb   :  { %s3927_s19 = smov 16   ;;  %s59_s22 = sshll.u32 %s5449_s4, 4  ;;  %s60_s22 = int_to_ptr.hbm [resolvable:$true] %s59_s22 }
   0xc   :  { %80 = dma.hbm_to_vmem [thread:$0]  %s73_s29, 32768, %s75_s30, [#allocation12], %s3926_s2, %s3926_s2, %s3927_s19  }
   0xd   :  { %s3928_s23 = smov [#allocation6]   ;;  %s3929_s5 = smov [#allocation10]  }
   0xe   :  { %s33_s24 = sshll.u32 %s3928_s23, 4  ;;  %s61_s27 = sshll.u32 %s3929_s5, 4  ;;  %s34_s24 = int_to_ptr.vmem [resolvable:$true] %s33_s24  ;;  %s62_s27 = int_to_ptr.vmem [resolvable:$true] %s61_s27 }
   0xf   :  { %39 = dma.hbm_to_vmem [thread:$0]  %s32_s18, 32768, %s34_s24, [#allocation7], %s3923_s25, %s3923_s25, %s3924_s26  }
  0x10   :  { %s95_s1 = sshll.u32 %s5456_s11, 4  ;;  %s3930_s16 = smov [#allocation13]   ;;  %s96_s1 = int_to_ptr.hbm [resolvable:$true] %s95_s1 }
  0x11   :  { %67 = dma.hbm_to_vmem [thread:$0]  %s60_s22, 32768, %s62_s27, [#allocation9], %s3926_s2, %s3926_s2, %s3927_s19  }
  0x12   :  { %s97_s29 = sshll.u32 %s3930_s16, 4  ;;  %s3931_s30 = smov 128   ;;  %s98_s29 = int_to_ptr.vmem [resolvable:$true] %s97_s29 }
  0x13   :  { %s3932_s17 = smov 8  }
  0x14   :  { %103 = dma.hbm_to_vmem [thread:$0]  %s96_s1, 4096, %s98_s29, [#allocation12], %s3931_s30, %s3931_s30, %s3932_s17  }
  0x15   :  { %3916 = dma.done.wait [#allocation7], 32768  }
  0x16   :  { %3917 = vsyncadd [#allocation7], 4294934528 }
  0x17   :  { %3918 = dma.done.wait [#allocation9], 65536  }
  0x18   :  { %3919 = vsyncadd [#allocation9], 4294901760 }
  0x19   :  { %3920 = dma.done.wait [#allocation12], 36864  }
  0x1a   :  { %3921 = vsyncadd [#allocation12], 4294930432  ;;  %v509_v1 = vld [vmem:[#allocation8 + $0x1e0] sm:$0xff]  ;;  %v510_v63 = vld [vmem:[#allocation8 + $0x1e8] sm:$0xff]  ;;  %vm717_vm0 = vcmask 1046528   ;;  %vm1647_vm5 = vcmask 1040384  }
  0x1b   :  { %v637_v2 = vld [vmem:[#allocation8 + $0x5e0] sm:$0xff]  ;;  %750 = vmatpush.msra.mxu0 %v509_v1  ;;  %v638_v0 = vld [vmem:[#allocation8 + $0x5e8] sm:$0xff]  ;;  %vm1649_vm8 = vcmask 1042434   ;;  %vm1651_vm9 = vcmask 1041408  }
  0x1c   :  { %v505_v3 = vld [vmem:[#allocation8 + $0x1c0] sm:$0xff]  ;;  %802 = vmatpush.msra.mxu2 %v637_v2 }
  0x1d   :  { %v573_v4 = vld [vmem:[#allocation8 + $0x3e0] sm:$0xff]  ;;  %751 = vmatpush.msra.mxu0 %v505_v3  ;;  %v506_v3 = vld [vmem:[#allocation8 + $0x1c8] sm:$0xff] }
  0x1e   :  { %v633_v5 = vld [vmem:[#allocation8 + $0x5c0] sm:$0xff]  ;;  %776 = vmatpush.msra.mxu1 %v573_v4  ;;  %v574_v4 = vld [vmem:[#allocation8 + $0x3e8] sm:$0xff] }
  0x1f   :  { %v701_v6 = vld [vmem:[#allocation8 + $0x7e0] sm:$0xff]  ;;  %803 = vmatpush.msra.mxu2 %v633_v5  ;;  %v634_v5 = vld [vmem:[#allocation8 + $0x5c8] sm:$0xff] }
  0x20   :  { %828 = vmatpush.msra.mxu3 %v701_v6  ;;  %v501_v7 = vld [vmem:[#allocation8 + $0x1a0] sm:$0xff]  ;;  %v702_v6 = vld [vmem:[#allocation8 + $0x7e8] sm:$0xff] }
  0x21   :  { %v569_v8 = vld [vmem:[#allocation8 + $0x3c0] sm:$0xff]  ;;  %752 = vmatpush.msra.mxu0 %v501_v7  ;;  %v502_v7 = vld [vmem:[#allocation8 + $0x1a8] sm:$0xff] }
  0x22   :  { %v629_v9 = vld [vmem:[#allocation8 + $0x5a0] sm:$0xff]  ;;  %777 = vmatpush.msra.mxu1 %v569_v8  ;;  %v570_v8 = vld [vmem:[#allocation8 + $0x3c8] sm:$0xff] }
  0x23   :  { %v697_v10 = vld [vmem:[#allocation8 + $0x7c0] sm:$0xff]  ;;  %804 = vmatpush.msra.mxu2 %v629_v9  ;;  %v630_v9 = vld [vmem:[#allocation8 + $0x5a8] sm:$0xff] }
  0x24   :  { %v565_v11 = vld [vmem:[#allocation8 + $0x3a0] sm:$0xff]  ;;  %829 = vmatpush.msra.mxu3 %v697_v10  ;;  %v698_v10 = vld [vmem:[#allocation8 + $0x7c8] sm:$0xff] }
  0x25   :  { %v497_v12 = vld [vmem:[#allocation8 + $0x180] sm:$0xff]  ;;  %778 = vmatpush.msra.mxu1 %v565_v11  ;;  %v498_v11 = vld [vmem:[#allocation8 + $0x188] sm:$0xff] }
  0x26   :  { %v625_v13 = vld [vmem:[#allocation8 + $0x580] sm:$0xff]  ;;  %753 = vmatpush.msra.mxu0 %v497_v12  ;;  %v566_v12 = vld [vmem:[#allocation8 + $0x3a8] sm:$0xff] }
  0x27   :  { %v693_v14 = vld [vmem:[#allocation8 + $0x7a0] sm:$0xff]  ;;  %805 = vmatpush.msra.mxu2 %v625_v13  ;;  %v626_v13 = vld [vmem:[#allocation8 + $0x588] sm:$0xff] }
  0x28   :  { %v561_v15 = vld [vmem:[#allocation8 + $0x380] sm:$0xff]  ;;  %830 = vmatpush.msra.mxu3 %v693_v14  ;;  %v694_v14 = vld [vmem:[#allocation8 + $0x7a8] sm:$0xff] }
  0x29   :  { %v689_v16 = vld [vmem:[#allocation8 + $0x780] sm:$0xff]  ;;  %779 = vmatpush.msra.mxu1 %v561_v15  ;;  %v494_v15 = vld [vmem:[#allocation8 + $0x168] sm:$0xff] }
  0x2a   :  { %v493_v17 = vld [vmem:[#allocation8 + $0x160] sm:$0xff]  ;;  %831 = vmatpush.msra.mxu3 %v689_v16  ;;  %v562_v16 = vld [vmem:[#allocation8 + $0x388] sm:$0xff] }
  0x2b   :  { %v621_v18 = vld [vmem:[#allocation8 + $0x560] sm:$0xff]  ;;  %754 = vmatpush.msra.mxu0 %v493_v17  ;;  %v622_v17 = vld [vmem:[#allocation8 + $0x568] sm:$0xff] }
  0x2c   :  { %v557_v19 = vld [vmem:[#allocation8 + $0x360] sm:$0xff]  ;;  %806 = vmatpush.msra.mxu2 %v621_v18  ;;  %v690_v18 = vld [vmem:[#allocation8 + $0x788] sm:$0xff] }
  0x2d   :  { %v685_v20 = vld [vmem:[#allocation8 + $0x760] sm:$0xff]  ;;  %780 = vmatpush.msra.mxu1 %v557_v19  ;;  %v490_v19 = vld [vmem:[#allocation8 + $0x148] sm:$0xff] }
  0x2e   :  { %v489_v21 = vld [vmem:[#allocation8 + $0x140] sm:$0xff]  ;;  %832 = vmatpush.msra.mxu3 %v685_v20  ;;  %v558_v20 = vld [vmem:[#allocation8 + $0x368] sm:$0xff] }
  0x2f   :  { %v617_v22 = vld [vmem:[#allocation8 + $0x540] sm:$0xff]  ;;  %755 = vmatpush.msra.mxu0 %v489_v21  ;;  %v618_v21 = vld [vmem:[#allocation8 + $0x548] sm:$0xff] }
  0x30   :  { %v553_v23 = vld [vmem:[#allocation8 + $0x340] sm:$0xff]  ;;  %807 = vmatpush.msra.mxu2 %v617_v22  ;;  %v686_v22 = vld [vmem:[#allocation8 + $0x768] sm:$0xff] }
  0x31   :  { %v681_v24 = vld [vmem:[#allocation8 + $0x740] sm:$0xff]  ;;  %781 = vmatpush.msra.mxu1 %v553_v23  ;;  %v486_v23 = vld [vmem:[#allocation8 + $0x128] sm:$0xff] }
  0x32   :  { %v485_v25 = vld [vmem:[#allocation8 + $0x120] sm:$0xff]  ;;  %833 = vmatpush.msra.mxu3 %v681_v24  ;;  %v554_v24 = vld [vmem:[#allocation8 + $0x348] sm:$0xff] }
  0x33   :  { %v613_v26 = vld [vmem:[#allocation8 + $0x520] sm:$0xff]  ;;  %756 = vmatpush.msra.mxu0 %v485_v25  ;;  %v614_v25 = vld [vmem:[#allocation8 + $0x528] sm:$0xff] }
  0x34   :  { %v549_v27 = vld [vmem:[#allocation8 + $0x320] sm:$0xff]  ;;  %808 = vmatpush.msra.mxu2 %v613_v26  ;;  %v682_v26 = vld [vmem:[#allocation8 + $0x748] sm:$0xff] }
  0x35   :  { %v677_v28 = vld [vmem:[#allocation8 + $0x720] sm:$0xff]  ;;  %782 = vmatpush.msra.mxu1 %v549_v27  ;;  %v482_v27 = vld [vmem:[#allocation8 + $0x108] sm:$0xff] }
  0x36   :  { %v481_v29 = vld [vmem:[#allocation8 + $0x100] sm:$0xff]  ;;  %834 = vmatpush.msra.mxu3 %v677_v28  ;;  %v550_v28 = vld [vmem:[#allocation8 + $0x328] sm:$0xff] }
  0x37   :  { %v609_v30 = vld [vmem:[#allocation8 + $0x500] sm:$0xff]  ;;  %757 = vmatpush.msra.mxu0 %v481_v29  ;;  %v610_v29 = vld [vmem:[#allocation8 + $0x508] sm:$0xff] }
  0x38   :  { %v545_v31 = vld [vmem:[#allocation8 + $0x300] sm:$0xff]  ;;  %809 = vmatpush.msra.mxu2 %v609_v30  ;;  %v678_v30 = vld [vmem:[#allocation8 + $0x728] sm:$0xff] }
  0x39   :  { %v673_v32 = vld [vmem:[#allocation8 + $0x700] sm:$0xff]  ;;  %783 = vmatpush.msra.mxu1 %v545_v31  ;;  %v478_v31 = vld [vmem:[#allocation8 + $0xe8] sm:$0xff] }
  0x3a   :  { %v477_v33 = vld [vmem:[#allocation8 + $0xe0] sm:$0xff]  ;;  %835 = vmatpush.msra.mxu3 %v673_v32  ;;  %v546_v32 = vld [vmem:[#allocation8 + $0x308] sm:$0xff] }
  0x3b   :  { %v605_v34 = vld [vmem:[#allocation8 + $0x4e0] sm:$0xff]  ;;  %758 = vmatpush.msra.mxu0 %v477_v33  ;;  %v606_v33 = vld [vmem:[#allocation8 + $0x4e8] sm:$0xff] }
  0x3c   :  { %v541_v35 = vld [vmem:[#allocation8 + $0x2e0] sm:$0xff]  ;;  %810 = vmatpush.msra.mxu2 %v605_v34  ;;  %v674_v34 = vld [vmem:[#allocation8 + $0x708] sm:$0xff] }
  0x3d   :  { %v669_v36 = vld [vmem:[#allocation8 + $0x6e0] sm:$0xff]  ;;  %784 = vmatpush.msra.mxu1 %v541_v35  ;;  %v474_v35 = vld [vmem:[#allocation8 + $0xc8] sm:$0xff] }
  0x3e   :  { %v473_v37 = vld [vmem:[#allocation8 + $0xc0] sm:$0xff]  ;;  %836 = vmatpush.msra.mxu3 %v669_v36  ;;  %v542_v36 = vld [vmem:[#allocation8 + $0x2e8] sm:$0xff] }
  0x3f   :  { %v601_v38 = vld [vmem:[#allocation8 + $0x4c0] sm:$0xff]  ;;  %759 = vmatpush.msra.mxu0 %v473_v37  ;;  %v602_v37 = vld [vmem:[#allocation8 + $0x4c8] sm:$0xff] }
  0x40   :  { %v537_v39 = vld [vmem:[#allocation8 + $0x2c0] sm:$0xff]  ;;  %811 = vmatpush.msra.mxu2 %v601_v38  ;;  %v670_v38 = vld [vmem:[#allocation8 + $0x6e8] sm:$0xff] }
  0x41   :  { %v665_v40 = vld [vmem:[#allocation8 + $0x6c0] sm:$0xff]  ;;  %785 = vmatpush.msra.mxu1 %v537_v39  ;;  %v470_v39 = vld [vmem:[#allocation8 + $0xa8] sm:$0xff] }
  0x42   :  { %v469_v41 = vld [vmem:[#allocation8 + $0xa0] sm:$0xff]  ;;  %837 = vmatpush.msra.mxu3 %v665_v40  ;;  %v538_v40 = vld [vmem:[#allocation8 + $0x2c8] sm:$0xff] }
  0x43   :  { %v597_v42 = vld [vmem:[#allocation8 + $0x4a0] sm:$0xff]  ;;  %760 = vmatpush.msra.mxu0 %v469_v41  ;;  %v598_v41 = vld [vmem:[#allocation8 + $0x4a8] sm:$0xff] }
  0x44   :  { %v533_v43 = vld [vmem:[#allocation8 + $0x2a0] sm:$0xff]  ;;  %812 = vmatpush.msra.mxu2 %v597_v42 }
  0x45   :  { %v661_v44 = vld [vmem:[#allocation8 + $0x6a0] sm:$0xff]  ;;  %786 = vmatpush.msra.mxu1 %v533_v43  ;;  %v185_v43 = vld [vmem:[%s5445_s0] sm:$0xfe] }
  0x46   :  { %v465_v45 = vld [vmem:[#allocation8 + $0x80] sm:$0xff]  ;;  %838 = vmatpush.msra.mxu3 %v661_v44  ;;  %v187_v44 = vld [vmem:[%s5445_s0 + $0x10] sm:$0xfe] }
  0x47   :  { %v593_v46 = vld [vmem:[#allocation8 + $0x480] sm:$0xff]  ;;  %761 = vmatpush.msra.mxu0 %v465_v45  ;;  %v666_v45 = vld [vmem:[#allocation8 + $0x6c8] sm:$0xff] }
  0x48   :  { %v529_v47 = vld [vmem:[#allocation8 + $0x280] sm:$0xff]  ;;  %813 = vmatpush.msra.mxu2 %v593_v46  ;;  %v466_v46 = vld [vmem:[#allocation8 + $0x88] sm:$0xff] }
  0x49   :  { %v657_v48 = vld [vmem:[#allocation8 + $0x680] sm:$0xff]  ;;  %787 = vmatpush.msra.mxu1 %v529_v47  ;;  %v4046_v47 = vld [vmem:[%s5445_s0 + $0x30] sm:$0xff] }
  0x4a   :  { %v461_v49 = vld [vmem:[#allocation8 + $0x60] sm:$0xff]  ;;  %839 = vmatpush.msra.mxu3 %v657_v48  ;;  %v534_v48 = vld [vmem:[#allocation8 + $0x2a8] sm:$0xff] }
  0x4b   :  { %v589_v50 = vld [vmem:[#allocation8 + $0x460] sm:$0xff]  ;;  %762 = vmatpush.msra.mxu0 %v461_v49  ;;  %v594_v49 = vld [vmem:[#allocation8 + $0x488] sm:$0xff] }
  0x4c   :  { %v525_v51 = vld [vmem:[#allocation8 + $0x260] sm:$0xff]  ;;  %814 = vmatpush.msra.mxu2 %v589_v50  ;;  %v662_v50 = vld [vmem:[#allocation8 + $0x6a8] sm:$0xff] }
  0x4d   :  { %v653_v52 = vld [vmem:[#allocation8 + $0x660] sm:$0xff]  ;;  %788 = vmatpush.msra.mxu1 %v525_v51  ;;  %v462_v51 = vld [vmem:[#allocation8 + $0x68] sm:$0xff] }
  0x4e   :  { %v457_v53 = vld [vmem:[#allocation8 + $0x40] sm:$0xff]  ;;  %840 = vmatpush.msra.mxu3 %v653_v52  ;;  %v530_v52 = vld [vmem:[#allocation8 + $0x288] sm:$0xff] }
  0x4f   :  { %v585_v54 = vld [vmem:[#allocation8 + $0x440] sm:$0xff]  ;;  %763 = vmatpush.msra.mxu0 %v457_v53  ;;  %v718_v53 = vrot.slane %v185_v43, 1  ;;  %v567_v43 = vld [vmem:[#allocation8 + $0x3b0] sm:$0xff] }
  0x50   :  { %v521_v55 = vld [vmem:[#allocation8 + $0x240] sm:$0xff]  ;;  %815 = vmatpush.msra.mxu2 %v585_v54 }
  0x51   :  { %v649_v56 = vld [vmem:[#allocation8 + $0x640] sm:$0xff]  ;;  %789 = vmatpush.msra.mxu1 %v521_v55  ;;  %v724_v55 = vrot.slane %v187_v44, 1  ;;  %v627_v44 = vld [vmem:[#allocation8 + $0x590] sm:$0xff] }
  0x52   :  { %v453_v57 = vld [vmem:[#allocation8 + $0x20] sm:$0xff]  ;;  %841 = vmatpush.msra.mxu3 %v649_v56  ;;  %v4052_v56 = vld [vmem:[%s5445_s0 + $0x28] sm:$0xff] }
  0x53   :  { %v581_v58 = vld [vmem:[#allocation8 + $0x420] sm:$0xff]  ;;  %764 = vmatpush.msra.mxu0 %v453_v57  ;;  %v725_v57 = vrot.slane %v4046_v47, 1  ;;  %v495_v47 = vld [vmem:[#allocation8 + $0x170] sm:$0xff] }
  0x54   :  { %v517_v59 = vld [vmem:[#allocation8 + $0x220] sm:$0xff]  ;;  %816 = vmatpush.msra.mxu2 %v581_v58  ;;  %v186_v58 = vld [vmem:[%s5445_s0 + $0x8] sm:$0xfe] }
  0x55   :  { %v645_v60 = vld [vmem:[#allocation8 + $0x620] sm:$0xff]  ;;  %790 = vmatpush.msra.mxu1 %v517_v59 }
  0x56   :  { %v449_v61 = vld [vmem:[#allocation8] sm:$0xff]  ;;  %842 = vmatpush.msra.mxu3 %v645_v60 }
  0x57   :  { %v577_v62 = vld [vmem:[#allocation8 + $0x400] sm:$0xff]  ;;  %765 = vmatpush.msra.mxu0 %v449_v61  ;;  %v590_v61 = vld [vmem:[#allocation8 + $0x468] sm:$0xff] }
  0x58   :  { %v513_v1 = vld [vmem:[#allocation8 + $0x200] sm:$0xff]  ;;  %817 = vmatpush.msra.mxu2 %v577_v62  ;;  %v658_v62 = vld [vmem:[#allocation8 + $0x688] sm:$0xff] }
  0x59   :  { %v641_v2 = vld [vmem:[#allocation8 + $0x600] sm:$0xff]  ;;  %854 = vmatpush.msrb.mxu0 %v510_v63  ;;  %791 = vmatpush.msra.mxu1 %v513_v1  ;;  %v458_v63 = vld [vmem:[#allocation8 + $0x48] sm:$0xff] }
  0x5a   :  { %906 = vmatpush.msrb.mxu2 %v638_v0  ;;  %843 = vmatpush.msra.mxu3 %v641_v2  ;;  %v4035_v42 = vld [vmem:[%s5445_s0 + $0x20] sm:$0xff]  ;;  %v4061_v59 = vld [vmem:[%s5445_s0 + $0x38] sm:$0xff] }
  0x5b   :  { %855 = vmatpush.msrb.mxu0 %v506_v3  ;;  %880 = vmatpush.msrb.mxu1 %v574_v4  ;;  %v719_v54 = vrot.slane %v4035_v42, 1  ;;  %v188_v60 = vld [vmem:[%s5445_s0 + $0x18] sm:$0xfe]  ;;  %v526_v0 = vld [vmem:[#allocation8 + $0x268] sm:$0xff]  ;;  %v721_v3 = vrot.slane %v186_v58, 1  ;;  %v722_v4 = vrot.slane %v4052_v56, 1 }
  0x5c   :  { %907 = vmatpush.msrb.mxu2 %v634_v5  ;;  %932 = vmatpush.msrb.mxu3 %v702_v6  ;;  %v586_v1 = vld [vmem:[#allocation8 + $0x448] sm:$0xff]  ;;  %v727_v5 = vrot.slane %v188_v60, 1  ;;  %v728_v6 = vrot.slane %v4061_v59, 1  ;;  %v555_v56 = vld [vmem:[#allocation8 + $0x350] sm:$0xff] }
  0x5d   :  { %856 = vmatpush.msrb.mxu0 %v502_v7  ;;  %881 = vmatpush.msrb.mxu1 %v570_v8  ;;  %v654_v2 = vld [vmem:[#allocation8 + $0x668] sm:$0xff]  ;;  %v4071_v7 = vsel %vm717_vm0, %v718_v53, %v719_v54  ;;  %v4076_v8 = vsel %vm717_vm0, %v724_v55, %v725_v57  ;;  %v619_v53 = vld [vmem:[#allocation8 + $0x550] sm:$0xff] }
  0x5e   :  { %908 = vmatpush.msrb.mxu2 %v630_v9  ;;  %933 = vmatpush.msrb.mxu3 %v698_v10  ;;  %v454_v9 = vld [vmem:[#allocation8 + $0x28] sm:$0xff]  ;;  %v487_v55 = vld [vmem:[#allocation8 + $0x130] sm:$0xff] }
  0x5f   :  { %857 = vmatpush.msrb.mxu0 %v498_v11  ;;  %882 = vmatpush.msrb.mxu1 %v566_v12  ;;  %v522_v10 = vld [vmem:[#allocation8 + $0x248] sm:$0xff]  ;;  %v683_v58 = vld [vmem:[#allocation8 + $0x750] sm:$0xff] }
  0x60   :  { %909 = vmatpush.msrb.mxu2 %v626_v13  ;;  %934 = vmatpush.msrb.mxu3 %v694_v14  ;;  %v582_v11 = vld [vmem:[#allocation8 + $0x428] sm:$0xff]  ;;  %v4083_v13 = vsel %vm717_vm0, %v721_v3, %v722_v4  ;;  %v4088_v14 = vsel %vm717_vm0, %v727_v5, %v728_v6  ;;  %v483_v59 = vld [vmem:[#allocation8 + $0x110] sm:$0xff] }
  0x61   :  { %858 = vmatpush.msrb.mxu0 %v494_v15  ;;  %883 = vmatpush.msrb.mxu1 %v562_v16  ;;  %v650_v12 = vld [vmem:[#allocation8 + $0x648] sm:$0xff]  ;;  %v551_v60 = vld [vmem:[#allocation8 + $0x330] sm:$0xff] }
  0x62   :  { %910 = vmatpush.msrb.mxu2 %v622_v17  ;;  %935 = vmatpush.msrb.mxu3 %v690_v18  ;;  %v450_v15 = vld [vmem:[#allocation8 + $0x8] sm:$0xff]  ;;  %v475_v3 = vld [vmem:[#allocation8 + $0xd0] sm:$0xff] }
  0x63   :  { %859 = vmatpush.msrb.mxu0 %v490_v19  ;;  %884 = vmatpush.msrb.mxu1 %v558_v20  ;;  %v518_v16 = vld [vmem:[#allocation8 + $0x228] sm:$0xff]  ;;  %v511_v19 = vld [vmem:[#allocation8 + $0x1f0] sm:$0xff] }
  0x64   :  { %911 = vmatpush.msrb.mxu2 %v618_v21  ;;  %936 = vmatpush.msrb.mxu3 %v686_v22  ;;  %v578_v17 = vld [vmem:[#allocation8 + $0x408] sm:$0xff]  ;;  %v191_v21 = vld [vmem:[%s5445_s0 + $0x50] sm:$0x7] }
  0x65   :  { %860 = vmatpush.msrb.mxu0 %v486_v23  ;;  %885 = vmatpush.msrb.mxu1 %v554_v24  ;;  %v646_v18 = vld [vmem:[#allocation8 + $0x628] sm:$0xff]  ;;  %v639_v22 = vld [vmem:[#allocation8 + $0x5f0] sm:$0xff] }
  0x66   :  { %912 = vmatpush.msrb.mxu2 %v614_v25  ;;  %937 = vmatpush.msrb.mxu3 %v682_v26  ;;  %v189_v20 = vld [vmem:[%s5445_s0 + $0x40] sm:$0x7]  ;;  %v507_v25 = vld [vmem:[#allocation8 + $0x1d0] sm:$0xff] }
  0x67   :  { %861 = vmatpush.msrb.mxu0 %v482_v27  ;;  %886 = vmatpush.msrb.mxu1 %v550_v28  ;;  %v514_v23 = vld [vmem:[#allocation8 + $0x208] sm:$0xff]  ;;  %v575_v26 = vld [vmem:[#allocation8 + $0x3f0] sm:$0xff]  ;;  %v4098_v27 = vrot.slane %v189_v20, 1  ;;  %v4100_v28 = vrot.slane %v191_v21, 1 }
  0x68   :  { %913 = vmatpush.msrb.mxu2 %v610_v29  ;;  %938 = vmatpush.msrb.mxu3 %v678_v30  ;;  %v642_v24 = vld [vmem:[#allocation8 + $0x608] sm:$0xff]  ;;  %v192_v30 = vld [vmem:[%s5445_s0 + $0x58] sm:$0x7]  ;;  %v603_v5 = vld [vmem:[#allocation8 + $0x4d0] sm:$0xff] }
  0x69   :  { %862 = vmatpush.msrb.mxu0 %v478_v31  ;;  %887 = vmatpush.msrb.mxu1 %v546_v32  ;;  %v190_v29 = vld [vmem:[%s5445_s0 + $0x48] sm:$0x7] }
  0x6a   :  { %914 = vmatpush.msrb.mxu2 %v606_v33  ;;  %939 = vmatpush.msrb.mxu3 %v674_v34  ;;  %v635_v31 = vld [vmem:[#allocation8 + $0x5d0] sm:$0xff] }
  0x6b   :  { %863 = vmatpush.msrb.mxu0 %v474_v35  ;;  %888 = vmatpush.msrb.mxu1 %v542_v36  ;;  %v703_v32 = vld [vmem:[#allocation8 + $0x7f0] sm:$0xff] }
  0x6c   :  { %915 = vmatpush.msrb.mxu2 %v602_v37  ;;  %940 = vmatpush.msrb.mxu3 %v670_v38  ;;  %v503_v33 = vld [vmem:[#allocation8 + $0x1b0] sm:$0xff]  ;;  %v4108_v37 = vrot.slane %v190_v29, 1  ;;  %v4110_v38 = vrot.slane %v192_v30, 1 }
  0x6d   :  { %864 = vmatpush.msrb.mxu0 %v470_v39  ;;  %889 = vmatpush.msrb.mxu1 %v538_v40  ;;  %v571_v34 = vld [vmem:[#allocation8 + $0x3d0] sm:$0xff]  ;;  %v4116_v39 = vsel %vm717_vm0, %v719_v54, %v4098_v27  ;;  %v4122_v40 = vsel %vm717_vm0, %v725_v57, %v4100_v28 }
  0x6e   :  { %916 = vmatpush.msrb.mxu2 %v598_v41  ;;  %941 = vmatpush.msrb.mxu3 %v666_v45  ;;  %v631_v35 = vld [vmem:[#allocation8 + $0x5b0] sm:$0xff]  ;;  %v4130_v42 = vsel %vm717_vm0, %v722_v4, %v4108_v37 }
  0x6f   :  { %865 = vmatpush.msrb.mxu0 %v466_v46  ;;  %890 = vmatpush.msrb.mxu1 %v534_v48  ;;  %v699_v36 = vld [vmem:[#allocation8 + $0x7d0] sm:$0xff]  ;;  %v4136_v46 = vsel %vm717_vm0, %v728_v6, %v4110_v38 }
  0x70   :  { %917 = vmatpush.msrb.mxu2 %v594_v49  ;;  %942 = vmatpush.msrb.mxu3 %v662_v50  ;;  %v499_v41 = vld [vmem:[#allocation8 + $0x190] sm:$0xff] }
  0x71   :  { %866 = vmatpush.msrb.mxu0 %v462_v51  ;;  %891 = vmatpush.msrb.mxu1 %v530_v52  ;;  %v695_v45 = vld [vmem:[#allocation8 + $0x7b0] sm:$0xff] }
  0x72   :  { %918 = vmatpush.msrb.mxu2 %v590_v61  ;;  %943 = vmatpush.msrb.mxu3 %v658_v62  ;;  %v563_v48 = vld [vmem:[#allocation8 + $0x390] sm:$0xff] }
  0x73   :  { %867 = vmatpush.msrb.mxu0 %v458_v63  ;;  %892 = vmatpush.msrb.mxu1 %v526_v0  ;;  %v623_v49 = vld [vmem:[#allocation8 + $0x570] sm:$0xff] }
  0x74   :  { %919 = vmatpush.msrb.mxu2 %v586_v1  ;;  %944 = vmatpush.msrb.mxu3 %v654_v2  ;;  %v691_v50 = vld [vmem:[#allocation8 + $0x790] sm:$0xff] }
  0x75   :  { %766 = vmatmul.f32.vlgmr.msra.gmra.mxu0 %v4071_v7  ;;  %818 = vmatmul.f32.vlgmr.msra.gmra.mxu2 %v4076_v8  ;;  %v491_v51 = vld [vmem:[#allocation8 + $0x150] sm:$0xff] }
  0x76   :  { %868 = vmatpush.msrb.mxu0 %v454_v9  ;;  %893 = vmatpush.msrb.mxu1 %v522_v10  ;;  %v559_v52 = vld [vmem:[#allocation8 + $0x370] sm:$0xff] }
  0x77   :  { %920 = vmatpush.msrb.mxu2 %v582_v11  ;;  %945 = vmatpush.msrb.mxu3 %v650_v12  ;;  %v687_v54 = vld [vmem:[#allocation8 + $0x770] sm:$0xff] }
  0x78   :  { %792 = vmatmul.f32.vlgmr.msra.gmra.mxu1 %v4083_v13  ;;  %844 = vmatmul.f32.vlgmr.msra.gmra.mxu3 %v4088_v14  ;;  %v615_v57 = vld [vmem:[#allocation8 + $0x530] sm:$0xff] }
  0x79   :  { %869 = vmatpush.msrb.mxu0 %v450_v15  ;;  %894 = vmatpush.msrb.mxu1 %v518_v16  ;;  %v611_v61 = vld [vmem:[#allocation8 + $0x510] sm:$0xff] }
  0x7a   :  { %921 = vmatpush.msrb.mxu2 %v578_v17  ;;  %946 = vmatpush.msrb.mxu3 %v646_v18  ;;  %v679_v62 = vld [vmem:[#allocation8 + $0x730] sm:$0xff] }
  0x7b   :  { %958 = vmatpush.msra.mxu0 %v511_v19  ;;  %895 = vmatpush.msrb.mxu1 %v514_v23  ;;  %v479_v63 = vld [vmem:[#allocation8 + $0xf0] sm:$0xff] }
  0x7c   :  { %1010 = vmatpush.msra.mxu2 %v639_v22  ;;  %947 = vmatpush.msrb.mxu3 %v642_v24  ;;  %v547_v0 = vld [vmem:[#allocation8 + $0x310] sm:$0xff] }
  0x7d   :  { %959 = vmatpush.msra.mxu0 %v507_v25  ;;  %984 = vmatpush.msra.mxu1 %v575_v26  ;;  %v607_v1 = vld [vmem:[#allocation8 + $0x4f0] sm:$0xff] }
  0x7e   :  { %1011 = vmatpush.msra.mxu2 %v635_v31  ;;  %1036 = vmatpush.msra.mxu3 %v703_v32  ;;  %v675_v2 = vld [vmem:[#allocation8 + $0x710] sm:$0xff] }
  0x7f   :  { %960 = vmatpush.msra.mxu0 %v503_v33  ;;  %985 = vmatpush.msra.mxu1 %v571_v34  ;;  %v543_v4 = vld [vmem:[#allocation8 + $0x2f0] sm:$0xff] }
  0x80   :  { %1012 = vmatpush.msra.mxu2 %v631_v35  ;;  %1037 = vmatpush.msra.mxu3 %v699_v36  ;;  %v671_v6 = vld [vmem:[#allocation8 + $0x6f0] sm:$0xff] }
  0x81   :  { %769 = vmatmul.f32.gmra.mxu0 %v4116_v39  ;;  %821 = vmatmul.f32.gmra.mxu2 %v4122_v40  ;;  %v471_v9 = vld [vmem:[#allocation8 + $0xb0] sm:$0xff] }
  0x82   :  { %961 = vmatpush.msra.mxu0 %v499_v41  ;;  %986 = vmatpush.msra.mxu1 %v567_v43  ;;  %v539_v10 = vld [vmem:[#allocation8 + $0x2d0] sm:$0xff]  ;;  %v512_v41 = vld [vmem:[#allocation8 + $0x1f8] sm:$0xff] }
  0x83   :  { %1013 = vmatpush.msra.mxu2 %v627_v44  ;;  %1038 = vmatpush.msra.mxu3 %v695_v45  ;;  %v599_v11 = vld [vmem:[#allocation8 + $0x4b0] sm:$0xff]  ;;  %v640_v43 = vld [vmem:[#allocation8 + $0x5f8] sm:$0xff] }
  0x84   :  { %795 = vmatmul.f32.gmra.mxu1 %v4130_v42  ;;  %847 = vmatmul.f32.gmra.mxu3 %v4136_v46  ;;  %v667_v12 = vld [vmem:[#allocation8 + $0x6d0] sm:$0xff] }
  0x85   :  { %962 = vmatpush.msra.mxu0 %v495_v47  ;;  %987 = vmatpush.msra.mxu1 %v563_v48  ;;  %v467_v15 = vld [vmem:[#allocation8 + $0x90] sm:$0xff]  ;;  %v508_v47 = vld [vmem:[#allocation8 + $0x1d8] sm:$0xff] }
  0x86   :  { %1014 = vmatpush.msra.mxu2 %v623_v49  ;;  %1039 = vmatpush.msra.mxu3 %v691_v50  ;;  %v535_v16 = vld [vmem:[#allocation8 + $0x2b0] sm:$0xff]  ;;  %v576_v48 = vld [vmem:[#allocation8 + $0x3f8] sm:$0xff] }
  0x87   :  { %963 = vmatpush.msra.mxu0 %v491_v51  ;;  %988 = vmatpush.msra.mxu1 %v559_v52  ;;  %v595_v17 = vld [vmem:[#allocation8 + $0x490] sm:$0xff]  ;;  %v636_v49 = vld [vmem:[#allocation8 + $0x5d8] sm:$0xff] }
  0x88   :  { %1015 = vmatpush.msra.mxu2 %v619_v53  ;;  %1040 = vmatpush.msra.mxu3 %v687_v54  ;;  %v663_v18 = vld [vmem:[#allocation8 + $0x6b0] sm:$0xff]  ;;  %v704_v50 = vld [vmem:[#allocation8 + $0x7f8] sm:$0xff] }
  0x89   :  { %964 = vmatpush.msra.mxu0 %v487_v55  ;;  %989 = vmatpush.msra.mxu1 %v555_v56  ;;  %v463_v19 = vld [vmem:[#allocation8 + $0x70] sm:$0xff]  ;;  %v504_v51 = vld [vmem:[#allocation8 + $0x1b8] sm:$0xff] }
  0x8a   :  { %1016 = vmatpush.msra.mxu2 %v615_v57  ;;  %1041 = vmatpush.msra.mxu3 %v683_v58  ;;  %v531_v20 = vld [vmem:[#allocation8 + $0x290] sm:$0xff]  ;;  %v572_v52 = vld [vmem:[#allocation8 + $0x3d8] sm:$0xff] }
  0x8b   :  { %772 = vmatmul.f32.gmra.mxu0 %v4098_v27  ;;  %824 = vmatmul.f32.gmra.mxu2 %v4100_v28  ;;  %v591_v21 = vld [vmem:[#allocation8 + $0x470] sm:$0xff]  ;;  %v632_v53 = vld [vmem:[#allocation8 + $0x5b8] sm:$0xff] }
  0x8c   :  { %965 = vmatpush.msra.mxu0 %v483_v59  ;;  %990 = vmatpush.msra.mxu1 %v551_v60  ;;  %v659_v22 = vld [vmem:[#allocation8 + $0x690] sm:$0xff]  ;;  %v700_v54 = vld [vmem:[#allocation8 + $0x7d8] sm:$0xff] }
  0x8d   :  { %1017 = vmatpush.msra.mxu2 %v611_v61  ;;  %1042 = vmatpush.msra.mxu3 %v679_v62  ;;  %v459_v23 = vld [vmem:[#allocation8 + $0x50] sm:$0xff]  ;;  %v500_v55 = vld [vmem:[#allocation8 + $0x198] sm:$0xff] }
  0x8e   :  { %798 = vmatmul.f32.gmra.mxu1 %v4108_v37  ;;  %850 = vmatmul.f32.gmra.mxu3 %v4110_v38  ;;  %v527_v24 = vld [vmem:[#allocation8 + $0x270] sm:$0xff]  ;;  %v568_v56 = vld [vmem:[#allocation8 + $0x3b8] sm:$0xff] }
  0x8f   :  { %966 = vmatpush.msra.mxu0 %v479_v63  ;;  %991 = vmatpush.msra.mxu1 %v547_v0  ;;  %v587_v25 = vld [vmem:[#allocation8 + $0x450] sm:$0xff]  ;;  %v628_v57 = vld [vmem:[#allocation8 + $0x598] sm:$0xff] }
  0x90   :  { %1018 = vmatpush.msra.mxu2 %v607_v1  ;;  %1043 = vmatpush.msra.mxu3 %v675_v2  ;;  %v655_v26 = vld [vmem:[#allocation8 + $0x670] sm:$0xff]  ;;  %v696_v58 = vld [vmem:[#allocation8 + $0x7b8] sm:$0xff] }
  0x91   :  { %967 = vmatpush.msra.mxu0 %v475_v3  ;;  %992 = vmatpush.msra.mxu1 %v543_v4  ;;  %v455_v29 = vld [vmem:[#allocation8 + $0x30] sm:$0xff]  ;;  %v496_v59 = vld [vmem:[#allocation8 + $0x178] sm:$0xff] }
  0x92   :  { %1019 = vmatpush.msra.mxu2 %v603_v5  ;;  %1044 = vmatpush.msra.mxu3 %v671_v6  ;;  %v523_v30 = vld [vmem:[#allocation8 + $0x250] sm:$0xff]  ;;  %v564_v60 = vld [vmem:[#allocation8 + $0x398] sm:$0xff] }
  0x93   :  { %968 = vmatpush.msra.mxu0 %v471_v9  ;;  %993 = vmatpush.msra.mxu1 %v539_v10  ;;  %v583_v31 = vld [vmem:[#allocation8 + $0x430] sm:$0xff]  ;;  %v624_v61 = vld [vmem:[#allocation8 + $0x578] sm:$0xff] }
  0x94   :  { %1020 = vmatpush.msra.mxu2 %v599_v11  ;;  %1045 = vmatpush.msra.mxu3 %v667_v12  ;;  %v651_v32 = vld [vmem:[#allocation8 + $0x650] sm:$0xff]  ;;  %v692_v62 = vld [vmem:[#allocation8 + $0x798] sm:$0xff] }
  0x95   :  { %870 = vmatmul.f32.vlgmr.msrb.gmra.mxu0 %v4071_v7  ;;  %922 = vmatmul.f32.vlgmr.msrb.gmra.mxu2 %v4076_v8  ;;  %v451_v33 = vld [vmem:[#allocation8 + $0x10] sm:$0xff]  ;;  %v492_v63 = vld [vmem:[#allocation8 + $0x158] sm:$0xff] }
  0x96   :  { %969 = vmatpush.msra.mxu0 %v467_v15  ;;  %994 = vmatpush.msra.mxu1 %v535_v16  ;;  %v519_v34 = vld [vmem:[#allocation8 + $0x230] sm:$0xff]  ;;  %v560_v0 = vld [vmem:[#allocation8 + $0x378] sm:$0xff] }
  0x97   :  { %1021 = vmatpush.msra.mxu2 %v595_v17  ;;  %1046 = vmatpush.msra.mxu3 %v663_v18  ;;  %v579_v35 = vld [vmem:[#allocation8 + $0x410] sm:$0xff]  ;;  %v620_v1 = vld [vmem:[#allocation8 + $0x558] sm:$0xff] }
  0x98   :  { %896 = vmatmul.f32.vlgmr.msrb.gmra.mxu1 %v4083_v13  ;;  %948 = vmatmul.f32.vlgmr.msrb.gmra.mxu3 %v4088_v14  ;;  %v647_v36 = vld [vmem:[#allocation8 + $0x630] sm:$0xff]  ;;  %v688_v2 = vld [vmem:[#allocation8 + $0x778] sm:$0xff] }
  0x99   :  { %970 = vmatpush.msra.mxu0 %v463_v19  ;;  %995 = vmatpush.msra.mxu1 %v531_v20  ;;  %v515_v44 = vld [vmem:[#allocation8 + $0x210] sm:$0xff]  ;;  %v488_v3 = vld [vmem:[#allocation8 + $0x138] sm:$0xff] }
  0x9a   :  { %1022 = vmatpush.msra.mxu2 %v591_v21  ;;  %1047 = vmatpush.msra.mxu3 %v659_v22  ;;  %v643_v45 = vld [vmem:[#allocation8 + $0x610] sm:$0xff]  ;;  %v556_v4 = vld [vmem:[#allocation8 + $0x358] sm:$0xff] }
  0x9b   :  { %971 = vmatpush.msra.mxu0 %v459_v23  ;;  %996 = vmatpush.msra.mxu1 %v527_v24  ;;  %v616_v5 = vld [vmem:[#allocation8 + $0x538] sm:$0xff] }
  0x9c   :  { %1023 = vmatpush.msra.mxu2 %v587_v25  ;;  %1048 = vmatpush.msra.mxu3 %v655_v26  ;;  %v684_v6 = vld [vmem:[#allocation8 + $0x758] sm:$0xff] }
  0x9d   :  { %972 = vmatpush.msra.mxu0 %v455_v29  ;;  %997 = vmatpush.msra.mxu1 %v523_v30  ;;  %v484_v9 = vld [vmem:[#allocation8 + $0x118] sm:$0xff] }
  0x9e   :  { %1024 = vmatpush.msra.mxu2 %v583_v31  ;;  %1049 = vmatpush.msra.mxu3 %v651_v32  ;;  %v552_v10 = vld [vmem:[#allocation8 + $0x338] sm:$0xff] }
  0x9f   :  { %873 = vmatmul.f32.gmra.mxu0 %v4116_v39  ;;  %925 = vmatmul.f32.gmra.mxu2 %v4122_v40  ;;  %v612_v11 = vld [vmem:[#allocation8 + $0x518] sm:$0xff] }
  0xa0   :  { %973 = vmatpush.msra.mxu0 %v451_v33  ;;  %998 = vmatpush.msra.mxu1 %v519_v34  ;;  %v680_v12 = vld [vmem:[#allocation8 + $0x738] sm:$0xff] }
  0xa1   :  { %1025 = vmatpush.msra.mxu2 %v579_v35  ;;  %1050 = vmatpush.msra.mxu3 %v647_v36  ;;  %v480_v15 = vld [vmem:[#allocation8 + $0xf8] sm:$0xff] }
  0xa2   :  { %899 = vmatmul.f32.gmra.mxu1 %v4130_v42  ;;  %951 = vmatmul.f32.gmra.mxu3 %v4136_v46  ;;  %v548_v16 = vld [vmem:[#allocation8 + $0x318] sm:$0xff] }
  0xa3   :  { %1062 = vmatpush.msrb.mxu0 %v512_v41  ;;  %1114 = vmatpush.msrb.mxu2 %v640_v43  ;;  %v608_v17 = vld [vmem:[#allocation8 + $0x4f8] sm:$0xff] }
  0xa4   :  { %999 = vmatpush.msra.mxu1 %v515_v44  ;;  %1051 = vmatpush.msra.mxu3 %v643_v45  ;;  %v676_v18 = vld [vmem:[#allocation8 + $0x718] sm:$0xff] }
  0xa5   :  { %1063 = vmatpush.msrb.mxu0 %v508_v47  ;;  %1115 = vmatpush.msrb.mxu2 %v636_v49  ;;  %v476_v19 = vld [vmem:[#allocation8 + $0xd8] sm:$0xff] }
  0xa6   :  { %1088 = vmatpush.msrb.mxu1 %v576_v48  ;;  %1140 = vmatpush.msrb.mxu3 %v704_v50  ;;  %v544_v20 = vld [vmem:[#allocation8 + $0x2f8] sm:$0xff] }
  0xa7   :  { %1064 = vmatpush.msrb.mxu0 %v504_v51  ;;  %1116 = vmatpush.msrb.mxu2 %v632_v53  ;;  %v604_v21 = vld [vmem:[#allocation8 + $0x4d8] sm:$0xff] }
  0xa8   :  { %1089 = vmatpush.msrb.mxu1 %v572_v52  ;;  %1141 = vmatpush.msrb.mxu3 %v700_v54  ;;  %v672_v22 = vld [vmem:[#allocation8 + $0x6f8] sm:$0xff] }
  0xa9   :  { %876 = vmatmul.f32.gmra.mxu0 %v4098_v27  ;;  %928 = vmatmul.f32.gmra.mxu2 %v4100_v28  ;;  %v472_v23 = vld [vmem:[#allocation8 + $0xb8] sm:$0xff] }
  0xaa   :  { %1065 = vmatpush.msrb.mxu0 %v500_v55  ;;  %1090 = vmatpush.msrb.mxu1 %v568_v56  ;;  %v540_v24 = vld [vmem:[#allocation8 + $0x2d8] sm:$0xff]  ;;  %v253_v55 = vld [vmem:[#allocation6 + $0x1e0] sm:$0xff] }
  0xab   :  { %1117 = vmatpush.msrb.mxu2 %v628_v57  ;;  %1142 = vmatpush.msrb.mxu3 %v696_v58  ;;  %v600_v25 = vld [vmem:[#allocation8 + $0x4b8] sm:$0xff]  ;;  %v381_v56 = vld [vmem:[#allocation6 + $0x5e0] sm:$0xff] }
  0xac   :  { %902 = vmatmul.f32.gmra.mxu1 %v4108_v37  ;;  %954 = vmatmul.f32.gmra.mxu3 %v4110_v38  ;;  %v668_v26 = vld [vmem:[#allocation8 + $0x6d8] sm:$0xff] }
  0xad   :  { %1066 = vmatpush.msrb.mxu0 %v496_v59  ;;  %1091 = vmatpush.msrb.mxu1 %v564_v60  ;;  %v468_v29 = vld [vmem:[#allocation8 + $0x98] sm:$0xff]  ;;  %v249_v59 = vld [vmem:[#allocation6 + $0x1c0] sm:$0xff] }
  0xae   :  { %1118 = vmatpush.msrb.mxu2 %v624_v61  ;;  %1143 = vmatpush.msrb.mxu3 %v692_v62  ;;  %v536_v30 = vld [vmem:[#allocation8 + $0x2b8] sm:$0xff]  ;;  %v317_v60 = vld [vmem:[#allocation6 + $0x3e0] sm:$0xff] }
  0xaf   :  { %1067 = vmatpush.msrb.mxu0 %v492_v63  ;;  %1092 = vmatpush.msrb.mxu1 %v560_v0  ;;  %v596_v31 = vld [vmem:[#allocation8 + $0x498] sm:$0xff]  ;;  %v377_v61 = vld [vmem:[#allocation6 + $0x5c0] sm:$0xff] }
  0xb0   :  { %1119 = vmatpush.msrb.mxu2 %v620_v1  ;;  %1144 = vmatpush.msrb.mxu3 %v688_v2  ;;  %v664_v32 = vld [vmem:[#allocation8 + $0x6b8] sm:$0xff]  ;;  %v445_v62 = vld [vmem:[#allocation6 + $0x7e0] sm:$0xff] }
  0xb1   :  { %1068 = vmatpush.msrb.mxu0 %v488_v3  ;;  %1093 = vmatpush.msrb.mxu1 %v556_v4  ;;  %v464_v33 = vld [vmem:[#allocation8 + $0x78] sm:$0xff]  ;;  %v245_v63 = vld [vmem:[#allocation6 + $0x1a0] sm:$0xff] }
  0xb2   :  { %1120 = vmatpush.msrb.mxu2 %v616_v5  ;;  %1145 = vmatpush.msrb.mxu3 %v684_v6  ;;  %v532_v34 = vld [vmem:[#allocation8 + $0x298] sm:$0xff]  ;;  %v313_v0 = vld [vmem:[#allocation6 + $0x3c0] sm:$0xff] }
  0xb3   :  { %974 = vmatmul.f32.vlgmr.msra.gmra.mxu0 %v4071_v7  ;;  %1026 = vmatmul.f32.vlgmr.msra.gmra.mxu2 %v4076_v8  ;;  %v592_v35 = vld [vmem:[#allocation8 + $0x478] sm:$0xff]  ;;  %v373_v1 = vld [vmem:[#allocation6 + $0x5a0] sm:$0xff] }
  0xb4   :  { %1069 = vmatpush.msrb.mxu0 %v484_v9  ;;  %1094 = vmatpush.msrb.mxu1 %v552_v10  ;;  %v660_v36 = vld [vmem:[#allocation8 + $0x698] sm:$0xff]  ;;  %v441_v2 = vld [vmem:[#allocation6 + $0x7c0] sm:$0xff] }
  0xb5   :  { %1121 = vmatpush.msrb.mxu2 %v612_v11  ;;  %1146 = vmatpush.msrb.mxu3 %v680_v12  ;;  %v460_v41 = vld [vmem:[#allocation8 + $0x58] sm:$0xff]  ;;  %v241_v3 = vld [vmem:[#allocation6 + $0x180] sm:$0xff] }
  0xb6   :  { %1000 = vmatmul.f32.vlgmr.msra.gmra.mxu1 %v4083_v13  ;;  %1052 = vmatmul.f32.vlgmr.msra.gmra.mxu3 %v4088_v14  ;;  %v528_v43 = vld [vmem:[#allocation8 + $0x278] sm:$0xff]  ;;  %v309_v4 = vld [vmem:[#allocation6 + $0x3a0] sm:$0xff] }
  0xb7   :  { %1070 = vmatpush.msrb.mxu0 %v480_v15  ;;  %1095 = vmatpush.msrb.mxu1 %v548_v16  ;;  %v588_v44 = vld [vmem:[#allocation8 + $0x458] sm:$0xff]  ;;  %v369_v5 = vld [vmem:[#allocation6 + $0x580] sm:$0xff] }
  0xb8   :  { %1122 = vmatpush.msrb.mxu2 %v608_v17  ;;  %1147 = vmatpush.msrb.mxu3 %v676_v18  ;;  %v656_v45 = vld [vmem:[#allocation8 + $0x678] sm:$0xff]  ;;  %v437_v6 = vld [vmem:[#allocation6 + $0x7a0] sm:$0xff] }
  0xb9   :  { %1071 = vmatpush.msrb.mxu0 %v476_v19  ;;  %1096 = vmatpush.msrb.mxu1 %v544_v20  ;;  %v456_v47 = vld [vmem:[#allocation8 + $0x38] sm:$0xff]  ;;  %v237_v9 = vld [vmem:[#allocation6 + $0x160] sm:$0xff] }
  0xba   :  { %1123 = vmatpush.msrb.mxu2 %v604_v21  ;;  %1148 = vmatpush.msrb.mxu3 %v672_v22  ;;  %v524_v48 = vld [vmem:[#allocation8 + $0x258] sm:$0xff]  ;;  %v305_v10 = vld [vmem:[#allocation6 + $0x380] sm:$0xff] }
  0xbb   :  { %1072 = vmatpush.msrb.mxu0 %v472_v23  ;;  %1097 = vmatpush.msrb.mxu1 %v540_v24  ;;  %v584_v49 = vld [vmem:[#allocation8 + $0x438] sm:$0xff]  ;;  %v365_v11 = vld [vmem:[#allocation6 + $0x560] sm:$0xff] }
  0xbc   :  { %1124 = vmatpush.msrb.mxu2 %v600_v25  ;;  %1149 = vmatpush.msrb.mxu3 %v668_v26  ;;  %v652_v50 = vld [vmem:[#allocation8 + $0x658] sm:$0xff]  ;;  %v433_v12 = vld [vmem:[#allocation6 + $0x780] sm:$0xff] }
  0xbd   :  { %977 = vmatmul.f32.gmra.mxu0 %v4116_v39  ;;  %1029 = vmatmul.f32.gmra.mxu2 %v4122_v40  ;;  %v452_v51 = vld [vmem:[#allocation8 + $0x18] sm:$0xff]  ;;  %v233_v15 = vld [vmem:[#allocation6 + $0x140] sm:$0xff] }
  0xbe   :  { %1073 = vmatpush.msrb.mxu0 %v468_v29  ;;  %1098 = vmatpush.msrb.mxu1 %v536_v30  ;;  %v520_v52 = vld [vmem:[#allocation8 + $0x238] sm:$0xff]  ;;  %v301_v16 = vld [vmem:[#allocation6 + $0x360] sm:$0xff] }
  0xbf   :  { %1125 = vmatpush.msrb.mxu2 %v596_v31  ;;  %1150 = vmatpush.msrb.mxu3 %v664_v32  ;;  %v580_v53 = vld [vmem:[#allocation8 + $0x418] sm:$0xff]  ;;  %v361_v17 = vld [vmem:[#allocation6 + $0x540] sm:$0xff] }
  0xc0   :  { %1003 = vmatmul.f32.gmra.mxu1 %v4130_v42  ;;  %1055 = vmatmul.f32.gmra.mxu3 %v4136_v46  ;;  %v648_v54 = vld [vmem:[#allocation8 + $0x638] sm:$0xff]  ;;  %v429_v18 = vld [vmem:[#allocation6 + $0x760] sm:$0xff] }
  0xc1   :  { %1074 = vmatpush.msrb.mxu0 %v464_v33  ;;  %1099 = vmatpush.msrb.mxu1 %v532_v34  ;;  %v516_v57 = vld [vmem:[#allocation8 + $0x218] sm:$0xff]  ;;  %v229_v19 = vld [vmem:[#allocation6 + $0x120] sm:$0xff] }
  0xc2   :  { %1126 = vmatpush.msrb.mxu2 %v592_v35  ;;  %1151 = vmatpush.msrb.mxu3 %v660_v36  ;;  %v644_v58 = vld [vmem:[#allocation8 + $0x618] sm:$0xff]  ;;  %v297_v20 = vld [vmem:[#allocation6 + $0x340] sm:$0xff] }
  0xc3   :  { %1075 = vmatpush.msrb.mxu0 %v460_v41  ;;  %1100 = vmatpush.msrb.mxu1 %v528_v43  ;;  %v357_v21 = vld [vmem:[#allocation6 + $0x520] sm:$0xff] }
  0xc4   :  { %1127 = vmatpush.msrb.mxu2 %v588_v44  ;;  %1152 = vmatpush.msrb.mxu3 %v656_v45  ;;  %v293_v22 = vld [vmem:[#allocation6 + $0x320] sm:$0xff] }
  0xc5   :  { %1076 = vmatpush.msrb.mxu0 %v456_v47  ;;  %1101 = vmatpush.msrb.mxu1 %v524_v48  ;;  %v353_v23 = vld [vmem:[#allocation6 + $0x500] sm:$0xff] }
  0xc6   :  { %1128 = vmatpush.msrb.mxu2 %v584_v49  ;;  %1153 = vmatpush.msrb.mxu3 %v652_v50  ;;  %v421_v24 = vld [vmem:[#allocation6 + $0x720] sm:$0xff] }
  0xc7   :  { %980 = vmatmul.f32.gmra.mxu0 %v4098_v27  ;;  %1032 = vmatmul.f32.gmra.mxu2 %v4100_v28  ;;  %v349_v25 = vld [vmem:[#allocation6 + $0x4e0] sm:$0xff] }
  0xc8   :  { %1077 = vmatpush.msrb.mxu0 %v452_v51  ;;  %1102 = vmatpush.msrb.mxu1 %v520_v52  ;;  %v417_v26 = vld [vmem:[#allocation6 + $0x700] sm:$0xff] }
  0xc9   :  { %1129 = vmatpush.msrb.mxu2 %v580_v53  ;;  %1154 = vmatpush.msrb.mxu3 %v648_v54  ;;  %v217_v29 = vld [vmem:[#allocation6 + $0xc0] sm:$0xff] }
  0xca   :  { %1166 = vmatpush.msra.mxu0 %v253_v55  ;;  %1006 = vmatmul.f32.gmra.mxu1 %v4108_v37  ;;  %v285_v30 = vld [vmem:[#allocation6 + $0x2e0] sm:$0xff] }
  0xcb   :  { %1218 = vmatpush.msra.mxu2 %v381_v56  ;;  %1058 = vmatmul.f32.gmra.mxu3 %v4110_v38  ;;  %v345_v31 = vld [vmem:[#allocation6 + $0x4c0] sm:$0xff] }
  0xcc   :  { %1103 = vmatpush.msrb.mxu1 %v516_v57  ;;  %1155 = vmatpush.msrb.mxu3 %v644_v58  ;;  %v413_v32 = vld [vmem:[#allocation6 + $0x6e0] sm:$0xff]  ;;  %v254_v57 = vld [vmem:[#allocation6 + $0x1e8] sm:$0xff] }
  0xcd   :  { %1167 = vmatpush.msra.mxu0 %v249_v59  ;;  %1219 = vmatpush.msra.mxu2 %v377_v61  ;;  %v213_v33 = vld [vmem:[#allocation6 + $0xa0] sm:$0xff]  ;;  %v382_v58 = vld [vmem:[#allocation6 + $0x5e8] sm:$0xff] }
  0xce   :  { %1192 = vmatpush.msra.mxu1 %v317_v60  ;;  %1244 = vmatpush.msra.mxu3 %v445_v62  ;;  %v281_v34 = vld [vmem:[#allocation6 + $0x2c0] sm:$0xff]  ;;  %v4195_v61 = vld [vmem:[%s5445_s0 + $0x8] sm:$0xff] }
  0xcf   :  { %1168 = vmatpush.msra.mxu0 %v245_v63  ;;  %1220 = vmatpush.msra.mxu2 %v373_v1  ;;  %v341_v35 = vld [vmem:[#allocation6 + $0x4a0] sm:$0xff]  ;;  %v250_v63 = vld [vmem:[#allocation6 + $0x1c8] sm:$0xff] }
  0xd0   :  { %1193 = vmatpush.msra.mxu1 %v313_v0  ;;  %1245 = vmatpush.msra.mxu3 %v441_v2  ;;  %v277_v36 = vld [vmem:[#allocation6 + $0x2a0] sm:$0xff]  ;;  %v318_v0 = vld [vmem:[#allocation6 + $0x3e8] sm:$0xff] }
  0xd1   :  { %1169 = vmatpush.msra.mxu0 %v241_v3  ;;  %1221 = vmatpush.msra.mxu2 %v369_v5  ;;  %v337_v41 = vld [vmem:[#allocation6 + $0x480] sm:$0xff]  ;;  %v378_v1 = vld [vmem:[#allocation6 + $0x5c8] sm:$0xff] }
  0xd2   :  { %1194 = vmatpush.msra.mxu1 %v309_v4  ;;  %1246 = vmatpush.msra.mxu3 %v437_v6  ;;  %v405_v43 = vld [vmem:[#allocation6 + $0x6a0] sm:$0xff]  ;;  %v446_v2 = vld [vmem:[#allocation6 + $0x7e8] sm:$0xff] }
  0xd3   :  { %1078 = vmatmul.f32.vlgmr.msrb.gmra.mxu0 %v4071_v7  ;;  %1130 = vmatmul.f32.vlgmr.msrb.gmra.mxu2 %v4076_v8  ;;  %v425_v7 = vld [vmem:[#allocation6 + $0x740] sm:$0xff]  ;;  %v246_v3 = vld [vmem:[#allocation6 + $0x1a8] sm:$0xff] }
  0xd4   :  { %1170 = vmatpush.msra.mxu0 %v237_v9  ;;  %1195 = vmatpush.msra.mxu1 %v305_v10  ;;  %v225_v8 = vld [vmem:[#allocation6 + $0x100] sm:$0xff]  ;;  %v314_v4 = vld [vmem:[#allocation6 + $0x3c8] sm:$0xff] }
  0xd5   :  { %1222 = vmatpush.msra.mxu2 %v365_v11  ;;  %1247 = vmatpush.msra.mxu3 %v433_v12  ;;  %v333_v44 = vld [vmem:[#allocation6 + $0x460] sm:$0xff]  ;;  %v374_v5 = vld [vmem:[#allocation6 + $0x5a8] sm:$0xff] }
  0xd6   :  { %1104 = vmatmul.f32.vlgmr.msrb.gmra.mxu1 %v4083_v13  ;;  %1156 = vmatmul.f32.vlgmr.msrb.gmra.mxu3 %v4088_v14  ;;  %v221_v13 = vld [vmem:[#allocation6 + $0xe0] sm:$0xff]  ;;  %v442_v6 = vld [vmem:[#allocation6 + $0x7c8] sm:$0xff] }
  0xd7   :  { %1171 = vmatpush.msra.mxu0 %v233_v15  ;;  %1196 = vmatpush.msra.mxu1 %v301_v16  ;;  %v289_v14 = vld [vmem:[#allocation6 + $0x300] sm:$0xff]  ;;  %v242_v9 = vld [vmem:[#allocation6 + $0x188] sm:$0xff] }
  0xd8   :  { %1223 = vmatpush.msra.mxu2 %v361_v17  ;;  %1248 = vmatpush.msra.mxu3 %v429_v18  ;;  %v401_v45 = vld [vmem:[#allocation6 + $0x680] sm:$0xff]  ;;  %v310_v10 = vld [vmem:[#allocation6 + $0x3a8] sm:$0xff] }
  0xd9   :  { %1172 = vmatpush.msra.mxu0 %v229_v19  ;;  %1197 = vmatpush.msra.mxu1 %v297_v20  ;;  %v201_v47 = vld [vmem:[#allocation6 + $0x40] sm:$0xff]  ;;  %v370_v12 = vld [vmem:[#allocation6 + $0x588] sm:$0xff] }
  0xda   :  { %1224 = vmatpush.msra.mxu2 %v357_v21  ;;  %1249 = vmatpush.msra.mxu3 %v425_v7  ;;  %v269_v48 = vld [vmem:[#allocation6 + $0x260] sm:$0xff]  ;;  %v438_v15 = vld [vmem:[#allocation6 + $0x7a8] sm:$0xff]  ;;  %v4217_v7 = vld [vmem:[%s5445_s0 + $0x30] sm:$0xff] }
  0xdb   :  { %1173 = vmatpush.msra.mxu0 %v225_v8  ;;  %1198 = vmatpush.msra.mxu1 %v293_v22  ;;  %v329_v49 = vld [vmem:[#allocation6 + $0x440] sm:$0xff]  ;;  %v238_v16 = vld [vmem:[#allocation6 + $0x168] sm:$0xff] }
  0xdc   :  { %1225 = vmatpush.msra.mxu2 %v353_v23  ;;  %1250 = vmatpush.msra.mxu3 %v421_v24  ;;  %v397_v50 = vld [vmem:[#allocation6 + $0x660] sm:$0xff]  ;;  %v306_v17 = vld [vmem:[#allocation6 + $0x388] sm:$0xff] }
  0xdd   :  { %1081 = vmatmul.f32.gmra.mxu0 %v4116_v39  ;;  %1133 = vmatmul.f32.gmra.mxu2 %v4122_v40  ;;  %v409_v39 = vld [vmem:[#allocation6 + $0x6c0] sm:$0xff]  ;;  %v366_v19 = vld [vmem:[#allocation6 + $0x568] sm:$0xff] }
  0xde   :  { %1174 = vmatpush.msra.mxu0 %v221_v13  ;;  %1199 = vmatpush.msra.mxu1 %v289_v14  ;;  %v209_v40 = vld [vmem:[#allocation6 + $0x80] sm:$0xff]  ;;  %v434_v20 = vld [vmem:[#allocation6 + $0x788] sm:$0xff] }
  0xdf   :  { %1226 = vmatpush.msra.mxu2 %v349_v25  ;;  %1251 = vmatpush.msra.mxu3 %v417_v26  ;;  %v197_v51 = vld [vmem:[#allocation6 + $0x20] sm:$0xff]  ;;  %v234_v8 = vld [vmem:[#allocation6 + $0x148] sm:$0xff] }
  0xe0   :  { %1107 = vmatmul.f32.gmra.mxu1 %v4130_v42  ;;  %1159 = vmatmul.f32.gmra.mxu3 %v4136_v46  ;;  %v205_v42 = vld [vmem:[#allocation6 + $0x60] sm:$0xff]  ;;  %v302_v22 = vld [vmem:[#allocation6 + $0x368] sm:$0xff] }
  0xe1   :  { %1175 = vmatpush.msra.mxu0 %v217_v29  ;;  %1200 = vmatpush.msra.mxu1 %v285_v30  ;;  %v273_v46 = vld [vmem:[#allocation6 + $0x280] sm:$0xff]  ;;  %v362_v24 = vld [vmem:[#allocation6 + $0x548] sm:$0xff] }
  0xe2   :  { %1227 = vmatpush.msra.mxu2 %v345_v31  ;;  %1252 = vmatpush.msra.mxu3 %v413_v32  ;;  %v265_v52 = vld [vmem:[#allocation6 + $0x240] sm:$0xff]  ;;  %v430_v13 = vld [vmem:[#allocation6 + $0x768] sm:$0xff] }
  0xe3   :  { %1176 = vmatpush.msra.mxu0 %v213_v33  ;;  %1201 = vmatpush.msra.mxu1 %v281_v34  ;;  %v325_v53 = vld [vmem:[#allocation6 + $0x420] sm:$0xff]  ;;  %v4225_v14 = vld [vmem:[%s5445_s0 + $0x28] sm:$0xff] }
  0xe4   :  { %1228 = vmatpush.msra.mxu2 %v341_v35  ;;  %1253 = vmatpush.msra.mxu3 %v409_v39  ;;  %v261_v54 = vld [vmem:[#allocation6 + $0x220] sm:$0xff]  ;;  %v230_v26 = vld [vmem:[#allocation6 + $0x128] sm:$0xff] }
  0xe5   :  { %1177 = vmatpush.msra.mxu0 %v209_v40  ;;  %1202 = vmatpush.msra.mxu1 %v277_v36  ;;  %v321_v55 = vld [vmem:[#allocation6 + $0x400] sm:$0xff]  ;;  %v298_v29 = vld [vmem:[#allocation6 + $0x348] sm:$0xff] }
  0xe6   :  { %1229 = vmatpush.msra.mxu2 %v337_v41  ;;  %1254 = vmatpush.msra.mxu3 %v405_v43  ;;  %v389_v56 = vld [vmem:[#allocation6 + $0x620] sm:$0xff]  ;;  %v358_v30 = vld [vmem:[#allocation6 + $0x528] sm:$0xff]  ;;  %v4246_v41 = vld [vmem:[%s5445_s0 + $0x50] sm:$0x3] }
  0xe7   :  { %1084 = vmatmul.f32.gmra.mxu0 %v4098_v27  ;;  %1136 = vmatmul.f32.gmra.mxu2 %v4100_v28  ;;  %v393_v27 = vld [vmem:[#allocation6 + $0x640] sm:$0xff]  ;;  %v426_v31 = vld [vmem:[#allocation6 + $0x748] sm:$0xff] }
  0xe8   :  { %1178 = vmatpush.msra.mxu0 %v205_v42  ;;  %1203 = vmatpush.msra.mxu1 %v273_v46  ;;  %v193_v28 = vld [vmem:[#allocation6] sm:$0xff]  ;;  %v226_v33 = vld [vmem:[#allocation6 + $0x108] sm:$0xff] }
  0xe9   :  { %1230 = vmatpush.msra.mxu2 %v333_v44  ;;  %1255 = vmatpush.msra.mxu3 %v401_v45  ;;  %v257_v59 = vld [vmem:[#allocation6 + $0x200] sm:$0xff]  ;;  %v294_v34 = vld [vmem:[#allocation6 + $0x328] sm:$0xff] }
  0xea   :  { %1110 = vmatmul.f32.gmra.mxu1 %v4108_v37  ;;  %1162 = vmatmul.f32.gmra.mxu3 %v4110_v38  ;;  %v4183_v37 = vld [vmem:[%s5445_s0] sm:$0xff]  ;;  %v4188_v38 = vld [vmem:[%s5445_s0 + $0x10] sm:$0xff]  ;;  %v4200_v62 = vld [vmem:[%s5445_s0 + $0x18] sm:$0xff] }
  0xeb   :  { %1179 = vmatpush.msra.mxu0 %v201_v47  ;;  %1204 = vmatpush.msra.mxu1 %v269_v48  ;;  %v385_v60 = vld [vmem:[#allocation6 + $0x600] sm:$0xff]  ;;  %v354_v39 = vld [vmem:[#allocation6 + $0x508] sm:$0xff] }
  0xec   :  { %1231 = vmatpush.msra.mxu2 %v329_v49  ;;  %1256 = vmatpush.msra.mxu3 %v397_v50  ;;  %v4211_v21 = vld [vmem:[%s5445_s0 + $0x20] sm:$0xff]  ;;  %v4231_v25 = vld [vmem:[%s5445_s0 + $0x38] sm:$0xff]  ;;  %v4255_v47 = vld [vmem:[%s5445_s0 + $0x48] sm:$0x3] }
  0xed   :  { %1180 = vmatpush.msra.mxu0 %v197_v51  ;;  %1205 = vmatpush.msra.mxu1 %v265_v52  ;;  %v422_v40 = vld [vmem:[#allocation6 + $0x728] sm:$0xff]  ;;  %v4260_v48 = vld [vmem:[%s5445_s0 + $0x58] sm:$0x3] }
  0xee   :  { %1232 = vmatpush.msra.mxu2 %v325_v53  ;;  %1257 = vmatpush.msra.mxu3 %v393_v27  ;;  %v4241_v36 = vld [vmem:[%s5445_s0 + $0x40] sm:$0x3] }
  0xef   :  { %1181 = vmatpush.msra.mxu0 %v193_v28  ;;  %1206 = vmatpush.msra.mxu1 %v261_v54  ;;  %v222_v43 = vld [vmem:[#allocation6 + $0xe8] sm:$0xff] }
  0xf0   :  { %1233 = vmatpush.msra.mxu2 %v321_v55  ;;  %1258 = vmatpush.msra.mxu3 %v389_v56  ;;  %v290_v42 = vld [vmem:[#allocation6 + $0x308] sm:$0xff] }
  0xf1   :  { %1182 = vmatmul.f32.vlgmr.msra.gmra.mxu0 %v4183_v37  ;;  %1234 = vmatmul.f32.vlgmr.msra.gmra.mxu2 %v4188_v38  ;;  %v350_v44 = vld [vmem:[#allocation6 + $0x4e8] sm:$0xff] }
  0xf2   :  { %1270 = vmatpush.msrb.mxu0 %v254_v57  ;;  %1322 = vmatpush.msrb.mxu2 %v382_v58  ;;  %v4204_v11 = vpop.f32.mrf.mxu0  ;;  %v418_v45 = vld [vmem:[#allocation6 + $0x708] sm:$0xff] }
  0xf3   :  { %1207 = vmatpush.msra.mxu1 %v257_v59  ;;  %1259 = vmatpush.msra.mxu3 %v385_v60  ;;  %v218_v49 = vld [vmem:[#allocation6 + $0xc8] sm:$0xff] }
  0xf4   :  { %1208 = vmatmul.f32.vlgmr.msra.gmra.mxu1 %v4195_v61  ;;  %1260 = vmatmul.f32.vlgmr.msra.gmra.mxu3 %v4200_v62  ;;  %v286_v50 = vld [vmem:[#allocation6 + $0x2e8] sm:$0xff] }
  0xf5   :  { %1271 = vmatpush.msrb.mxu0 %v250_v63  ;;  %1296 = vmatpush.msrb.mxu1 %v318_v0  ;;  %v4206_v18 = vpop.f32.mrf.mxu1  ;;  %v346_v52 = vld [vmem:[#allocation6 + $0x4c8] sm:$0xff] }
  0xf6   :  { %1323 = vmatpush.msrb.mxu2 %v378_v1  ;;  %1348 = vmatpush.msrb.mxu3 %v446_v2  ;;  %v414_v53 = vld [vmem:[#allocation6 + $0x6e8] sm:$0xff] }
  0xf7   :  { %1272 = vmatpush.msrb.mxu0 %v246_v3  ;;  %1297 = vmatpush.msrb.mxu1 %v314_v4  ;;  %v214_v27 = vld [vmem:[#allocation6 + $0xa8] sm:$0xff] }
  0xf8   :  { %1324 = vmatpush.msrb.mxu2 %v374_v5  ;;  %1349 = vmatpush.msrb.mxu3 %v442_v6  ;;  %v4220_v23 = vpop.f32.mrf.mxu2  ;;  %v282_v28 = vld [vmem:[#allocation6 + $0x2c8] sm:$0xff] }
  0xf9   :  { %1273 = vmatpush.msrb.mxu0 %v242_v9  ;;  %1298 = vmatpush.msrb.mxu1 %v310_v10  ;;  %v342_v54 = vld [vmem:[#allocation6 + $0x4a8] sm:$0xff] }
  0xfa   :  { %1325 = vmatpush.msrb.mxu2 %v370_v12  ;;  %1350 = vmatpush.msrb.mxu3 %v438_v15  ;;  %v410_v55 = vld [vmem:[#allocation6 + $0x6c8] sm:$0xff] }
  0xfb   :  { %1185 = vmatmul.f32.gmra.mxu0 %v4211_v21  ;;  %1237 = vmatmul.f32.gmra.mxu2 %v4217_v7  ;;  %v4234_v32 = vpop.f32.mrf.mxu3  ;;  %v210_v57 = vld [vmem:[#allocation6 + $0x88] sm:$0xff] }
  0xfc   :  { %1274 = vmatpush.msrb.mxu0 %v238_v16  ;;  %1299 = vmatpush.msrb.mxu1 %v306_v17  ;;  %v278_v58 = vld [vmem:[#allocation6 + $0x2a8] sm:$0xff] }
  0xfd   :  { %1326 = vmatpush.msrb.mxu2 %v366_v19  ;;  %1351 = vmatpush.msrb.mxu3 %v434_v20  ;;  %v338_v60 = vld [vmem:[#allocation6 + $0x488] sm:$0xff] }
  0xfe   :  { %1211 = vmatmul.f32.gmra.mxu1 %v4225_v14  ;;  %1263 = vmatmul.f32.gmra.mxu3 %v4231_v25  ;;  %v4236_v35 = vpop.f32.mrf.mxu0  ;;  %v406_v63 = vld [vmem:[#allocation6 + $0x6a8] sm:$0xff] }
  0xff   :  { %1275 = vmatpush.msrb.mxu0 %v234_v8  ;;  %1300 = vmatpush.msrb.mxu1 %v302_v22  ;;  %v206_v0 = vld [vmem:[#allocation6 + $0x68] sm:$0xff] }
 0x100   :  { %1327 = vmatpush.msrb.mxu2 %v362_v24  ;;  %1352 = vmatpush.msrb.mxu3 %v430_v13  ;;  %v274_v1 = vld [vmem:[#allocation6 + $0x288] sm:$0xff] }
 0x101   :  { %1276 = vmatpush.msrb.mxu0 %v230_v26  ;;  %1301 = vmatpush.msrb.mxu1 %v298_v29  ;;  %v4248_v46 = vpop.f32.mrf.mxu1  ;;  %v334_v2 = vld [vmem:[#allocation6 + $0x468] sm:$0xff]  ;;  %v255_v29 = vld [vmem:[#allocation6 + $0x1f0] sm:$0xff] }
 0x102   :  { %1328 = vmatpush.msrb.mxu2 %v358_v30  ;;  %1353 = vmatpush.msrb.mxu3 %v426_v31  ;;  %v402_v3 = vld [vmem:[#allocation6 + $0x688] sm:$0xff]  ;;  %v383_v30 = vld [vmem:[#allocation6 + $0x5f0] sm:$0xff] }
 0x103   :  { %1277 = vmatpush.msrb.mxu0 %v226_v33  ;;  %1302 = vmatpush.msrb.mxu1 %v294_v34  ;;  %v202_v5 = vld [vmem:[#allocation6 + $0x48] sm:$0xff] }
 0x104   :  { %1329 = vmatpush.msrb.mxu2 %v354_v39  ;;  %1354 = vmatpush.msrb.mxu3 %v422_v40  ;;  %v4262_v51 = vpop.f32.mrf.mxu2  ;;  %v270_v6 = vld [vmem:[#allocation6 + $0x268] sm:$0xff]  ;;  %v251_v39 = vld [vmem:[#allocation6 + $0x1d0] sm:$0xff] }
 0x105   :  { %1188 = vmatmul.f32.gmra.mxu0 %v4241_v36  ;;  %1240 = vmatmul.f32.gmra.mxu2 %v4246_v41  ;;  %5461 = vst [vmem:[#allocation17_spill] sm:$0xff] %v4262_v51  ;;  %v330_v9 = vld [vmem:[#allocation6 + $0x448] sm:$0xff]  ;;  %v319_v40 = vld [vmem:[#allocation6 + $0x3f0] sm:$0xff] }
 0x106   :  { %1278 = vmatpush.msrb.mxu0 %v222_v43  ;;  %1303 = vmatpush.msrb.mxu1 %v290_v42  ;;  %v398_v10 = vld [vmem:[#allocation6 + $0x668] sm:$0xff]  ;;  %v379_v43 = vld [vmem:[#allocation6 + $0x5d0] sm:$0xff] }
 0x107   :  { %1330 = vmatpush.msrb.mxu2 %v350_v44  ;;  %1355 = vmatpush.msrb.mxu3 %v418_v45  ;;  %v4266_v56 = vpop.f32.mrf.mxu3  ;;  %v198_v12 = vld [vmem:[#allocation6 + $0x28] sm:$0xff]  ;;  %v447_v42 = vld [vmem:[#allocation6 + $0x7f0] sm:$0xff] }
 0x108   :  { %1214 = vmatmul.f32.gmra.mxu1 %v4255_v47  ;;  %1266 = vmatmul.f32.gmra.mxu3 %v4260_v48  ;;  %5462 = vst [vmem:[#allocation18_spill] sm:$0xff] %v4266_v56  ;;  %v4268_v59 = vpop.f32.mrf.mxu0  ;;  %v266_v15 = vld [vmem:[#allocation6 + $0x248] sm:$0xff]  ;;  %v247_v44 = vld [vmem:[#allocation6 + $0x1b0] sm:$0xff] }
 0x109   :  { %1279 = vmatpush.msrb.mxu0 %v218_v49  ;;  %1304 = vmatpush.msrb.mxu1 %v286_v50  ;;  %v326_v17 = vld [vmem:[#allocation6 + $0x428] sm:$0xff]  ;;  %v315_v45 = vld [vmem:[#allocation6 + $0x3d0] sm:$0xff] }
 0x10a   :  { %1331 = vmatpush.msrb.mxu2 %v346_v52  ;;  %1356 = vmatpush.msrb.mxu3 %v414_v53  ;;  %v394_v19 = vld [vmem:[#allocation6 + $0x648] sm:$0xff]  ;;  %v375_v50 = vld [vmem:[#allocation6 + $0x5b0] sm:$0xff] }
 0x10b   :  { %1280 = vmatpush.msrb.mxu0 %v214_v27  ;;  %1305 = vmatpush.msrb.mxu1 %v282_v28  ;;  %v4270_v4 = vpop.f32.mrf.mxu1  ;;  %v194_v20 = vld [vmem:[#allocation6 + $0x8] sm:$0xff]  ;;  %v443_v52 = vld [vmem:[#allocation6 + $0x7d0] sm:$0xff] }
 0x10c   :  { %1332 = vmatpush.msrb.mxu2 %v342_v54  ;;  %1357 = vmatpush.msrb.mxu3 %v410_v55  ;;  %v262_v8 = vld [vmem:[#allocation6 + $0x228] sm:$0xff]  ;;  %v243_v53 = vld [vmem:[#allocation6 + $0x190] sm:$0xff] }
 0x10d   :  { %1281 = vmatpush.msrb.mxu0 %v210_v57  ;;  %1306 = vmatpush.msrb.mxu1 %v278_v58  ;;  %v322_v22 = vld [vmem:[#allocation6 + $0x408] sm:$0xff]  ;;  %v311_v27 = vld [vmem:[#allocation6 + $0x3b0] sm:$0xff] }
 0x10e   :  { %1333 = vmatpush.msrb.mxu2 %v338_v60  ;;  %1358 = vmatpush.msrb.mxu3 %v406_v63  ;;  %v4272_v16 = vpop.f32.mrf.mxu2  ;;  %v390_v24 = vld [vmem:[#allocation6 + $0x628] sm:$0xff]  ;;  %v371_v28 = vld [vmem:[#allocation6 + $0x590] sm:$0xff] }
 0x10f   :  { %1282 = vmatpush.msrb.mxu0 %v206_v0  ;;  %1307 = vmatpush.msrb.mxu1 %v274_v1  ;;  %v258_v31 = vld [vmem:[#allocation6 + $0x208] sm:$0xff]  ;;  %v439_v54 = vld [vmem:[#allocation6 + $0x7b0] sm:$0xff] }
 0x110   :  { %1334 = vmatpush.msrb.mxu2 %v334_v2  ;;  %1359 = vmatpush.msrb.mxu3 %v402_v3  ;;  %v386_v33 = vld [vmem:[#allocation6 + $0x608] sm:$0xff]  ;;  %v239_v58 = vld [vmem:[#allocation6 + $0x170] sm:$0xff] }
 0x111   :  { %1283 = vmatpush.msrb.mxu0 %v202_v5  ;;  %1308 = vmatpush.msrb.mxu1 %v270_v6  ;;  %v4274_v13 = vpop.f32.mrf.mxu3  ;;  %v307_v60 = vld [vmem:[#allocation6 + $0x390] sm:$0xff] }
 0x112   :  { %1335 = vmatpush.msrb.mxu2 %v330_v9  ;;  %1360 = vmatpush.msrb.mxu3 %v398_v10  ;;  %v4276_v26 = vpop.f32.mrf.mxu0  ;;  %v367_v63 = vld [vmem:[#allocation6 + $0x570] sm:$0xff] }
 0x113   :  { %1284 = vmatpush.msrb.mxu0 %v198_v12  ;;  %1309 = vmatpush.msrb.mxu1 %v266_v15  ;;  %v435_v0 = vld [vmem:[#allocation6 + $0x790] sm:$0xff] }
 0x114   :  { %1336 = vmatpush.msrb.mxu2 %v326_v17  ;;  %1361 = vmatpush.msrb.mxu3 %v394_v19  ;;  %v235_v2 = vld [vmem:[#allocation6 + $0x150] sm:$0xff] }
 0x115   :  { %1285 = vmatpush.msrb.mxu0 %v194_v20  ;;  %1310 = vmatpush.msrb.mxu1 %v262_v8  ;;  %v4280_v34 = vpop.f32.mrf.mxu1  ;;  %v303_v3 = vld [vmem:[#allocation6 + $0x370] sm:$0xff] }
 0x116   :  { %1337 = vmatpush.msrb.mxu2 %v322_v22  ;;  %1362 = vmatpush.msrb.mxu3 %v390_v24  ;;  %v363_v5 = vld [vmem:[#allocation6 + $0x550] sm:$0xff] }
 0x117   :  { %1286 = vmatmul.f32.vlgmr.msrb.gmra.mxu0 %v4183_v37  ;;  %1338 = vmatmul.f32.vlgmr.msrb.gmra.mxu2 %v4188_v38  ;;  %v431_v6 = vld [vmem:[#allocation6 + $0x770] sm:$0xff] }
 0x118   :  { %1374 = vmatpush.msra.mxu0 %v255_v29  ;;  %1426 = vmatpush.msra.mxu2 %v383_v30  ;;  %v4284_v49 = vpop.f32.mrf.mxu2  ;;  %v231_v9 = vld [vmem:[#allocation6 + $0x130] sm:$0xff] }
 0x119   :  { %1311 = vmatpush.msrb.mxu1 %v258_v31  ;;  %1363 = vmatpush.msrb.mxu3 %v386_v33  ;;  %v299_v10 = vld [vmem:[#allocation6 + $0x350] sm:$0xff] }
 0x11a   :  { %1312 = vmatmul.f32.vlgmr.msrb.gmra.mxu1 %v4195_v61  ;;  %1364 = vmatmul.f32.vlgmr.msrb.gmra.mxu3 %v4200_v62  ;;  %v359_v15 = vld [vmem:[#allocation6 + $0x530] sm:$0xff] }
 0x11b   :  { %1375 = vmatpush.msra.mxu0 %v251_v39  ;;  %1400 = vmatpush.msra.mxu1 %v319_v40  ;;  %v4286_v55 = vpop.f32.mrf.mxu3  ;;  %v427_v17 = vld [vmem:[#allocation6 + $0x750] sm:$0xff] }
 0x11c   :  { %1427 = vmatpush.msra.mxu2 %v379_v43  ;;  %1452 = vmatpush.msra.mxu3 %v447_v42  ;;  %v4288_v57 = vpop.f32.mrf.mxu0  ;;  %v227_v19 = vld [vmem:[#allocation6 + $0x110] sm:$0xff] }
 0x11d   :  { %1376 = vmatpush.msra.mxu0 %v247_v44  ;;  %1401 = vmatpush.msra.mxu1 %v315_v45  ;;  %v295_v20 = vld [vmem:[#allocation6 + $0x330] sm:$0xff] }
 0x11e   :  { %1428 = vmatpush.msra.mxu2 %v375_v50  ;;  %1453 = vmatpush.msra.mxu3 %v443_v52  ;;  %v355_v8 = vld [vmem:[#allocation6 + $0x510] sm:$0xff] }
 0x11f   :  { %1377 = vmatpush.msra.mxu0 %v243_v53  ;;  %1402 = vmatpush.msra.mxu1 %v311_v27  ;;  %v4292_v1 = vpop.f32.mrf.mxu1  ;;  %v423_v22 = vld [vmem:[#allocation6 + $0x730] sm:$0xff] }
 0x120   :  { %1429 = vmatpush.msra.mxu2 %v371_v28  ;;  %1454 = vmatpush.msra.mxu3 %v439_v54  ;;  %v223_v30 = vld [vmem:[#allocation6 + $0xf0] sm:$0xff] }
 0x121   :  { %1289 = vmatmul.f32.gmra.mxu0 %v4211_v21  ;;  %1341 = vmatmul.f32.gmra.mxu2 %v4217_v7  ;;  %v291_v31 = vld [vmem:[#allocation6 + $0x310] sm:$0xff] }
 0x122   :  { %1378 = vmatpush.msra.mxu0 %v239_v58  ;;  %1403 = vmatpush.msra.mxu1 %v307_v60  ;;  %v4296_v12 = vpop.f32.mrf.mxu2  ;;  %v351_v33 = vld [vmem:[#allocation6 + $0x4f0] sm:$0xff] }
 0x123   :  { %1430 = vmatpush.msra.mxu2 %v367_v63  ;;  %1455 = vmatpush.msra.mxu3 %v435_v0  ;;  %5463 = vst [vmem:[#allocation19_spill] sm:$0xff] %v4296_v12  ;;  %v419_v39 = vld [vmem:[#allocation6 + $0x710] sm:$0xff] }
 0x124   :  { %1315 = vmatmul.f32.gmra.mxu1 %v4225_v14  ;;  %1367 = vmatmul.f32.gmra.mxu3 %v4231_v25  ;;  %v219_v43 = vld [vmem:[#allocation6 + $0xd0] sm:$0xff] }
 0x125   :  { %1379 = vmatpush.msra.mxu0 %v235_v2  ;;  %1404 = vmatpush.msra.mxu1 %v303_v3  ;;  %v4298_v24 = vpop.f32.mrf.mxu3  ;;  %v287_v42 = vld [vmem:[#allocation6 + $0x2f0] sm:$0xff] }
 0x126   :  { %1431 = vmatpush.msra.mxu2 %v363_v5  ;;  %1456 = vmatpush.msra.mxu3 %v431_v6  ;;  %5464 = vst [vmem:[#allocation20_spill] sm:$0xff] %v4298_v24  ;;  %v4300_v29 = vpop.f32.mrf.mxu0  ;;  %v347_v44 = vld [vmem:[#allocation6 + $0x4d0] sm:$0xff]  ;;  %v276_v24 = vld [vmem:[#allocation6 + $0x298] sm:$0xff] }
 0x127   :  { %1380 = vmatpush.msra.mxu0 %v231_v9  ;;  %1405 = vmatpush.msra.mxu1 %v299_v10  ;;  %v415_v45 = vld [vmem:[#allocation6 + $0x6f0] sm:$0xff] }
 0x128   :  { %1432 = vmatpush.msra.mxu2 %v359_v15  ;;  %1457 = vmatpush.msra.mxu3 %v427_v17  ;;  %v215_v50 = vld [vmem:[#allocation6 + $0xb0] sm:$0xff] }
 0x129   :  { %1381 = vmatpush.msra.mxu0 %v227_v19  ;;  %1406 = vmatpush.msra.mxu1 %v295_v20  ;;  %v4304_v40 = vpop.f32.mrf.mxu1  ;;  %v283_v52 = vld [vmem:[#allocation6 + $0x2d0] sm:$0xff] }
 0x12a   :  { %1433 = vmatpush.msra.mxu2 %v355_v8  ;;  %1458 = vmatpush.msra.mxu3 %v423_v22  ;;  %v343_v27 = vld [vmem:[#allocation6 + $0x4b0] sm:$0xff] }
 0x12b   :  { %1292 = vmatmul.f32.gmra.mxu0 %v4241_v36  ;;  %1344 = vmatmul.f32.gmra.mxu2 %v4246_v41  ;;  %v411_v28 = vld [vmem:[#allocation6 + $0x6d0] sm:$0xff] }
 0x12c   :  { %1382 = vmatpush.msra.mxu0 %v223_v30  ;;  %1407 = vmatpush.msra.mxu1 %v291_v31  ;;  %v4308_v53 = vpop.f32.mrf.mxu2  ;;  %v211_v54 = vld [vmem:[#allocation6 + $0x90] sm:$0xff] }
 0x12d   :  { %1434 = vmatpush.msra.mxu2 %v351_v33  ;;  %1459 = vmatpush.msra.mxu3 %v419_v39  ;;  %v279_v58 = vld [vmem:[#allocation6 + $0x2b0] sm:$0xff] }
 0x12e   :  { %1318 = vmatmul.f32.gmra.mxu1 %v4255_v47  ;;  %1370 = vmatmul.f32.gmra.mxu3 %v4260_v48  ;;  %v339_v60 = vld [vmem:[#allocation6 + $0x490] sm:$0xff] }
 0x12f   :  { %1383 = vmatpush.msra.mxu0 %v219_v43  ;;  %1408 = vmatpush.msra.mxu1 %v287_v42  ;;  %v407_v63 = vld [vmem:[#allocation6 + $0x6b0] sm:$0xff]  ;;  %v4310_v0 = vpop.f32.mrf.mxu3 }
 0x130   :  { %1435 = vmatpush.msra.mxu2 %v347_v44  ;;  %1460 = vmatpush.msra.mxu3 %v415_v45  ;;  %v207_v2 = vld [vmem:[#allocation6 + $0x70] sm:$0xff]  ;;  %v4312_v5 = vpop.f32.mrf.mxu0  ;;  %v256_v45 = vld [vmem:[#allocation6 + $0x1f8] sm:$0xff] }
 0x131   :  { %1384 = vmatpush.msra.mxu0 %v215_v50  ;;  %1409 = vmatpush.msra.mxu1 %v283_v52  ;;  %v275_v3 = vld [vmem:[#allocation6 + $0x290] sm:$0xff]  ;;  %v384_v50 = vld [vmem:[#allocation6 + $0x5f8] sm:$0xff] }
 0x132   :  { %1436 = vmatpush.msra.mxu2 %v343_v27  ;;  %1461 = vmatpush.msra.mxu3 %v411_v28  ;;  %v335_v6 = vld [vmem:[#allocation6 + $0x470] sm:$0xff] }
 0x133   :  { %1385 = vmatpush.msra.mxu0 %v211_v54  ;;  %1410 = vmatpush.msra.mxu1 %v279_v58  ;;  %v403_v9 = vld [vmem:[#allocation6 + $0x690] sm:$0xff]  ;;  %v4314_v20 = vpop.f32.mrf.mxu1  ;;  %v252_v58 = vld [vmem:[#allocation6 + $0x1d8] sm:$0xff] }
 0x134   :  { %1437 = vmatpush.msra.mxu2 %v339_v60  ;;  %1462 = vmatpush.msra.mxu3 %v407_v63  ;;  %v203_v10 = vld [vmem:[#allocation6 + $0x50] sm:$0xff]  ;;  %v320_v60 = vld [vmem:[#allocation6 + $0x3f8] sm:$0xff] }
 0x135   :  { %v271_v15 = vld [vmem:[#allocation6 + $0x270] sm:$0xff]  ;;  %1386 = vmatpush.msra.mxu0 %v207_v2  ;;  %1411 = vmatpush.msra.mxu1 %v275_v3  ;;  %v380_v63 = vld [vmem:[#allocation6 + $0x5d8] sm:$0xff] }
 0x136   :  { %v331_v17 = vld [vmem:[#allocation6 + $0x450] sm:$0xff]  ;;  %1438 = vmatpush.msra.mxu2 %v335_v6  ;;  %1463 = vmatpush.msra.mxu3 %v403_v9  ;;  %v4316_v43 = vpop.f32.mrf.mxu2  ;;  %v448_v2 = vld [vmem:[#allocation6 + $0x7f8] sm:$0xff] }
 0x137   :  { %v399_v19 = vld [vmem:[#allocation6 + $0x670] sm:$0xff]  ;;  %1387 = vmatpush.msra.mxu0 %v203_v10  ;;  %1412 = vmatpush.msra.mxu1 %v271_v15  ;;  %v248_v6 = vld [vmem:[#allocation6 + $0x1b8] sm:$0xff] }
 0x138   :  { %v199_v8 = vld [vmem:[#allocation6 + $0x30] sm:$0xff]  ;;  %1439 = vmatpush.msra.mxu2 %v331_v17  ;;  %1464 = vmatpush.msra.mxu3 %v399_v19  ;;  %v316_v9 = vld [vmem:[#allocation6 + $0x3d8] sm:$0xff] }
 0x139   :  { %v267_v22 = vld [vmem:[#allocation6 + $0x250] sm:$0xff]  ;;  %1388 = vmatpush.msra.mxu0 %v199_v8  ;;  %v4318_v52 = vpop.f32.mrf.mxu3  ;;  %v376_v10 = vld [vmem:[#allocation6 + $0x5b8] sm:$0xff] }
 0x13a   :  { %v327_v30 = vld [vmem:[#allocation6 + $0x430] sm:$0xff]  ;;  %1413 = vmatpush.msra.mxu1 %v267_v22  ;;  %v4320_v54 = vpop.f32.mrf.mxu0  ;;  %v444_v15 = vld [vmem:[#allocation6 + $0x7d8] sm:$0xff] }
 0x13b   :  { %v395_v31 = vld [vmem:[#allocation6 + $0x650] sm:$0xff]  ;;  %1440 = vmatpush.msra.mxu2 %v327_v30  ;;  %v244_v17 = vld [vmem:[#allocation6 + $0x198] sm:$0xff] }
 0x13c   :  { %v195_v33 = vld [vmem:[#allocation6 + $0x10] sm:$0xff]  ;;  %1465 = vmatpush.msra.mxu3 %v395_v31  ;;  %v312_v19 = vld [vmem:[#allocation6 + $0x3b8] sm:$0xff] }
 0x13d   :  { %v263_v39 = vld [vmem:[#allocation6 + $0x230] sm:$0xff]  ;;  %1389 = vmatpush.msra.mxu0 %v195_v33  ;;  %v4324_v3 = vpop.f32.mrf.mxu1  ;;  %v372_v22 = vld [vmem:[#allocation6 + $0x598] sm:$0xff] }
 0x13e   :  { %v323_v42 = vld [vmem:[#allocation6 + $0x410] sm:$0xff]  ;;  %1414 = vmatpush.msra.mxu1 %v263_v39  ;;  %1390 = vmatmul.f32.vlgmr.msra.gmra.mxu0 %v4183_v37  ;;  %v440_v30 = vld [vmem:[#allocation6 + $0x7b8] sm:$0xff] }
 0x13f   :  { %v391_v44 = vld [vmem:[#allocation6 + $0x630] sm:$0xff]  ;;  %1441 = vmatpush.msra.mxu2 %v323_v42  ;;  %1478 = vmatpush.msrb.mxu0 %v256_v45  ;;  %v240_v31 = vld [vmem:[#allocation6 + $0x178] sm:$0xff] }
 0x140   :  { %1466 = vmatpush.msra.mxu3 %v391_v44  ;;  %v259_v27 = vld [vmem:[#allocation6 + $0x210] sm:$0xff]  ;;  %1442 = vmatmul.f32.vlgmr.msra.gmra.mxu2 %v4188_v38  ;;  %v4328_v8 = vpop.f32.mrf.mxu2  ;;  %v308_v33 = vld [vmem:[#allocation6 + $0x398] sm:$0xff] }
 0x141   :  { %v387_v28 = vld [vmem:[#allocation6 + $0x610] sm:$0xff]  ;;  %1530 = vmatpush.msrb.mxu2 %v384_v50  ;;  %1415 = vmatpush.msra.mxu1 %v259_v27  ;;  %v368_v42 = vld [vmem:[#allocation6 + $0x578] sm:$0xff] }
 0x142   :  { %1467 = vmatpush.msra.mxu3 %v387_v28  ;;  %1416 = vmatmul.f32.vlgmr.msra.gmra.mxu1 %v4195_v61  ;;  %v436_v44 = vld [vmem:[#allocation6 + $0x798] sm:$0xff] }
 0x143   :  { %1468 = vmatmul.f32.vlgmr.msra.gmra.mxu3 %v4200_v62  ;;  %1479 = vmatpush.msrb.mxu0 %v252_v58  ;;  %v4330_v39 = vpop.f32.mrf.mxu3  ;;  %v236_v50 = vld [vmem:[#allocation6 + $0x158] sm:$0xff] }
 0x144   :  { %1504 = vmatpush.msrb.mxu1 %v320_v60  ;;  %1531 = vmatpush.msrb.mxu2 %v380_v63  ;;  %v4332_v45 = vpop.f32.mrf.mxu0  ;;  %v304_v27 = vld [vmem:[#allocation6 + $0x378] sm:$0xff] }
 0x145   :  { %1556 = vmatpush.msrb.mxu3 %v448_v2  ;;  %1480 = vmatpush.msrb.mxu0 %v248_v6  ;;  %v364_v28 = vld [vmem:[#allocation6 + $0x558] sm:$0xff] }
 0x146   :  { %1505 = vmatpush.msrb.mxu1 %v316_v9  ;;  %1532 = vmatpush.msrb.mxu2 %v376_v10  ;;  %v432_v58 = vld [vmem:[#allocation6 + $0x778] sm:$0xff] }
 0x147   :  { %1557 = vmatpush.msrb.mxu3 %v444_v15  ;;  %1481 = vmatpush.msrb.mxu0 %v244_v17  ;;  %v4336_v60 = vpop.f32.mrf.mxu1  ;;  %v232_v63 = vld [vmem:[#allocation6 + $0x138] sm:$0xff] }
 0x148   :  { %1506 = vmatpush.msrb.mxu1 %v312_v19  ;;  %1533 = vmatpush.msrb.mxu2 %v372_v22  ;;  %v300_v2 = vld [vmem:[#allocation6 + $0x358] sm:$0xff] }
 0x149   :  { %1558 = vmatpush.msrb.mxu3 %v440_v30  ;;  %1393 = vmatmul.f32.gmra.mxu0 %v4211_v21  ;;  %v360_v6 = vld [vmem:[#allocation6 + $0x538] sm:$0xff] }
 0x14a   :  { %1445 = vmatmul.f32.gmra.mxu2 %v4217_v7  ;;  %1482 = vmatpush.msrb.mxu0 %v240_v31  ;;  %v428_v9 = vld [vmem:[#allocation6 + $0x758] sm:$0xff]  ;;  %v4340_v17 = vpop.f32.mrf.mxu2 }
 0x14b   :  { %1507 = vmatpush.msrb.mxu1 %v308_v33  ;;  %1534 = vmatpush.msrb.mxu2 %v368_v42  ;;  %v228_v10 = vld [vmem:[#allocation6 + $0x118] sm:$0xff] }
 0x14c   :  { %1559 = vmatpush.msrb.mxu3 %v436_v44  ;;  %1419 = vmatmul.f32.gmra.mxu1 %v4225_v14  ;;  %v296_v15 = vld [vmem:[#allocation6 + $0x338] sm:$0xff] }
 0x14d   :  { %1471 = vmatmul.f32.gmra.mxu3 %v4231_v25  ;;  %1483 = vmatpush.msrb.mxu0 %v236_v50  ;;  %v356_v19 = vld [vmem:[#allocation6 + $0x518] sm:$0xff] }
 0x14e   :  { %1508 = vmatpush.msrb.mxu1 %v304_v27  ;;  %1535 = vmatpush.msrb.mxu2 %v364_v28  ;;  %v424_v22 = vld [vmem:[#allocation6 + $0x738] sm:$0xff]  ;;  %v4342_v33 = vpop.f32.mrf.mxu3 }
 0x14f   :  { %1560 = vmatpush.msrb.mxu3 %v432_v58  ;;  %1484 = vmatpush.msrb.mxu0 %v232_v63  ;;  %v224_v30 = vld [vmem:[#allocation6 + $0xf8] sm:$0xff] }
 0x150   :  { %1509 = vmatpush.msrb.mxu1 %v300_v2  ;;  %1536 = vmatpush.msrb.mxu2 %v360_v6  ;;  %v292_v31 = vld [vmem:[#allocation6 + $0x318] sm:$0xff]  ;;  %v4344_v50 = vpop.f32.mrf.mxu0 }
 0x151   :  { %1561 = vmatpush.msrb.mxu3 %v428_v9  ;;  %1485 = vmatpush.msrb.mxu0 %v228_v10  ;;  %v352_v42 = vld [vmem:[#allocation6 + $0x4f8] sm:$0xff] }
 0x152   :  { %1510 = vmatpush.msrb.mxu1 %v296_v15  ;;  %1537 = vmatpush.msrb.mxu2 %v356_v19  ;;  %v420_v44 = vld [vmem:[#allocation6 + $0x718] sm:$0xff] }
 0x153   :  { %1562 = vmatpush.msrb.mxu3 %v424_v22  ;;  %1396 = vmatmul.f32.gmra.mxu0 %v4241_v36  ;;  %v220_v27 = vld [vmem:[#allocation6 + $0xd8] sm:$0xff]  ;;  %v4348_v2 = vpop.f32.mrf.mxu1 }
 0x154   :  { %1448 = vmatmul.f32.gmra.mxu2 %v4246_v41  ;;  %1486 = vmatpush.msrb.mxu0 %v224_v30  ;;  %v288_v28 = vld [vmem:[#allocation6 + $0x2f8] sm:$0xff] }
 0x155   :  { %1511 = vmatpush.msrb.mxu1 %v292_v31  ;;  %1538 = vmatpush.msrb.mxu2 %v352_v42  ;;  %v348_v58 = vld [vmem:[#allocation6 + $0x4d8] sm:$0xff] }
 0x156   :  { %1563 = vmatpush.msrb.mxu3 %v420_v44  ;;  %v416_v63 = vld [vmem:[#allocation6 + $0x6f8] sm:$0xff]  ;;  %1422 = vmatmul.f32.gmra.mxu1 %v4255_v47  ;;  %v4352_v30 = vpop.f32.mrf.mxu2 }
 0x157   :  { %1474 = vmatmul.f32.gmra.mxu3 %v4260_v48  ;;  %v216_v6 = vld [vmem:[#allocation6 + $0xb8] sm:$0xff]  ;;  %1487 = vmatpush.msrb.mxu0 %v220_v27 }
 0x158   :  { %v284_v9 = vld [vmem:[#allocation6 + $0x2d8] sm:$0xff]  ;;  %1512 = vmatpush.msrb.mxu1 %v288_v28  ;;  %1539 = vmatpush.msrb.mxu2 %v348_v58 }
 0x159   :  { %v344_v10 = vld [vmem:[#allocation6 + $0x4b8] sm:$0xff]  ;;  %1564 = vmatpush.msrb.mxu3 %v416_v63  ;;  %1488 = vmatpush.msrb.mxu0 %v216_v6  ;;  %v4354_v56 = vpop.f32.mrf.mxu3 }
 0x15a   :  { %v412_v15 = vld [vmem:[#allocation6 + $0x6d8] sm:$0xff]  ;;  %1513 = vmatpush.msrb.mxu1 %v284_v9  ;;  %1540 = vmatpush.msrb.mxu2 %v344_v10  ;;  %v4356_v12 = vpop.f32.mrf.mxu0 }
 0x15b   :  { %v212_v19 = vld [vmem:[#allocation6 + $0x98] sm:$0xff]  ;;  %1565 = vmatpush.msrb.mxu3 %v412_v15 }
 0x15c   :  { %v280_v22 = vld [vmem:[#allocation6 + $0x2b8] sm:$0xff]  ;;  %1489 = vmatpush.msrb.mxu0 %v212_v19 }
 0x15d   :  { %v340_v31 = vld [vmem:[#allocation6 + $0x498] sm:$0xff]  ;;  %1514 = vmatpush.msrb.mxu1 %v280_v22  ;;  %v4358_v51 = vpop.f32.mrf.mxu1 }
 0x15e   :  { %v408_v42 = vld [vmem:[#allocation6 + $0x6b8] sm:$0xff]  ;;  %1541 = vmatpush.msrb.mxu2 %v340_v31 }
 0x15f   :  { %v208_v44 = vld [vmem:[#allocation6 + $0x78] sm:$0xff]  ;;  %1566 = vmatpush.msrb.mxu3 %v408_v42  ;;  %1515 = vmatpush.msrb.mxu1 %v276_v24 }
 0x160   :  { %v336_v27 = vld [vmem:[#allocation6 + $0x478] sm:$0xff]  ;;  %1490 = vmatpush.msrb.mxu0 %v208_v44 }
 0x161   :  { %v404_v28 = vld [vmem:[#allocation6 + $0x698] sm:$0xff]  ;;  %1542 = vmatpush.msrb.mxu2 %v336_v27  ;;  %v4360_v27 = vpop.f32.mrf.mxu2 }
 0x162   :  { %v204_v58 = vld [vmem:[#allocation6 + $0x58] sm:$0xff]  ;;  %1567 = vmatpush.msrb.mxu3 %v404_v28 }
 0x163   :  { %v272_v63 = vld [vmem:[#allocation6 + $0x278] sm:$0xff]  ;;  %1491 = vmatpush.msrb.mxu0 %v204_v58 }
 0x164   :  { %v332_v6 = vld [vmem:[#allocation6 + $0x458] sm:$0xff]  ;;  %1516 = vmatpush.msrb.mxu1 %v272_v63  ;;  %v4364_v63 = vpop.f32.mrf.mxu3 }
 0x165   :  { %v400_v9 = vld [vmem:[#allocation6 + $0x678] sm:$0xff]  ;;  %1543 = vmatpush.msrb.mxu2 %v332_v6  ;;  %v4366_v6 = vpop.f32.mrf.mxu0 }
 0x166   :  { %v200_v10 = vld [vmem:[#allocation6 + $0x38] sm:$0xff]  ;;  %1568 = vmatpush.msrb.mxu3 %v400_v9  ;;  %v794_v9 = vadd.f32 %v4206_v18, %v4204_v11 }
 0x167   :  { %v268_v15 = vld [vmem:[#allocation6 + $0x258] sm:$0xff]  ;;  %1492 = vmatpush.msrb.mxu0 %v200_v10  ;;  %v4372_v10 = vpop.f32.mrf.mxu1 }
 0x168   :  { %v328_v19 = vld [vmem:[#allocation6 + $0x438] sm:$0xff]  ;;  %1517 = vmatpush.msrb.mxu1 %v268_v15  ;;  %v820_v15 = vadd.f32 %v4220_v23, %v794_v9 }
 0x169   :  { %v396_v22 = vld [vmem:[#allocation6 + $0x658] sm:$0xff]  ;;  %1544 = vmatpush.msrb.mxu2 %v328_v19 }
 0x16a   :  { %v196_v31 = vld [vmem:[#allocation6 + $0x18] sm:$0xff]  ;;  %1569 = vmatpush.msrb.mxu3 %v396_v22 }
 0x16b   :  { %v264_v42 = vld [vmem:[#allocation6 + $0x238] sm:$0xff]  ;;  %1493 = vmatpush.msrb.mxu0 %v196_v31 }
 0x16c   :  { %v324_v44 = vld [vmem:[#allocation6 + $0x418] sm:$0xff]  ;;  %1518 = vmatpush.msrb.mxu1 %v264_v42  ;;  %1494 = vmatmul.f32.vlgmr.msrb.gmra.mxu0 %v4183_v37  ;;  %v4375_v37 = vpop.f32.mrf.mxu2 }
 0x16d   :  { %v392_v24 = vld [vmem:[#allocation6 + $0x638] sm:$0xff]  ;;  %1545 = vmatpush.msrb.mxu2 %v324_v44  ;;  %v4382_v11 = vpop.f32.mrf.mxu3 }
 0x16e   :  { %v260_v28 = vld [vmem:[#allocation6 + $0x218] sm:$0xff]  ;;  %1570 = vmatpush.msrb.mxu3 %v392_v24  ;;  %1546 = vmatmul.f32.vlgmr.msrb.gmra.mxu2 %v4188_v38  ;;  %v846_v38 = vadd.f32 %v4234_v32, %v820_v15 }
 0x16f   :  { %v388_v58 = vld [vmem:[#allocation6 + $0x618] sm:$0xff]  ;;  %1519 = vmatpush.msrb.mxu1 %v260_v28 }
 0x170   :  { %1571 = vmatpush.msrb.mxu3 %v388_v58  ;;  %1520 = vmatmul.f32.vlgmr.msrb.gmra.mxu1 %v4195_v61  ;;  %v1183_v61 = vpop.f32.mrf.mxu0 }
 0x171   :  { %1572 = vmatmul.f32.vlgmr.msrb.gmra.mxu3 %v4200_v62  ;;  %v1184_v62 = vadd.f32 %v1183_v61, %v846_v38  ;;  %v1209_v18 = vpop.f32.mrf.mxu1 }
 0x173   :  { %v1210_v23 = vadd.f32 %v1209_v18, %v1184_v62 }
 0x174   :  { %1497 = vmatmul.f32.gmra.mxu0 %v4211_v21  ;;  %v4389_v21 = vld [vmem:[%s5448_s3] sm:$0xf] }
 0x176   :  { %1549 = vmatmul.f32.gmra.mxu2 %v4217_v7  ;;  %v1235_v7 = vpop.f32.mrf.mxu2 }
 0x177   :  { %v1261_v32 = vpop.f32.mrf.mxu3 }
 0x178   :  { %1523 = vmatmul.f32.gmra.mxu1 %v4225_v14  ;;  %v1236_v14 = vadd.f32 %v1235_v7, %v1210_v23  ;;  %v4400_v31 = vpop.f32.mrf.mxu0  ;;  %v800_v7 = vadd.f32 %v4270_v4, %v4268_v59 }
 0x179   :  { %1575 = vmatmul.f32.gmra.mxu3 %v4231_v25  ;;  %v4394_v25 = vperm.slane %v4389_v21, 0 }
 0x17a   :  { %v1262_v19 = vadd.f32 %v1261_v32, %v1236_v14 }
 0x17b   :  { %v4402_v42 = vpop.f32.mrf.mxu1 }
 0x17c   :  { %1500 = vmatmul.f32.gmra.mxu0 %v4241_v36  ;;  %v1592_v36 = vadd.f32 %v4394_v25, %v1262_v19 }
 0x17e   :  { %1552 = vmatmul.f32.gmra.mxu2 %v4246_v41  ;;  %vm1604_vm1 = vcmp.ge.f32.partialorder %v1592_v36, 0.0  ;;  %v1616_v41 = vmul.f32 0.2, %v1592_v36 }
 0x180   :  { %1526 = vmatmul.f32.gmra.mxu1 %v4255_v47  ;;  %v4397_v22 = vsel %vm1604_vm1, %v1592_v36, %v1616_v41  ;;  %v4404_v47 = vpop.f32.mrf.mxu2 }
 0x181   :  { %1578 = vmatmul.f32.gmra.mxu3 %v4260_v48  ;;  %1656 = vst [vmem:[#allocation1] sm:$0xff] %v4397_v22  ;;  %v898_v48 = vadd.f32 %v4280_v34, %v4276_v26  ;;  %v4408_v44 = vpop.f32.mrf.mxu3  ;;  %v4415_v26 = vperm.slane %v4389_v21, 1 }
 0x182   :  { %v1189_v24 = vpop.f32.mrf.mxu0 }
 0x183   :  { %v924_v28 = vadd.f32 %v4284_v49, %v898_v48  ;;  %v826_v49 = vadd.f32 %v4272_v16, %v800_v7 }
 0x185   :  { %v1215_v58 = vpop.f32.mrf.mxu1  ;;  %v950_v15 = vadd.f32 %v4286_v55, %v924_v28  ;;  %v904_v55 = vadd.f32 %v4304_v40, %v4300_v29  ;;  %v852_v59 = vadd.f32 %v4274_v13, %v826_v49 }
 0x187   :  { %v930_v28 = vadd.f32 %v4308_v53, %v904_v55 }
 0x188   :  { %v1241_v9 = vpop.f32.mrf.mxu2 }
 0x18b   :  { %v1267_v61 = vpop.f32.mrf.mxu3 }
 0x194   :  { %v1287_v38 = vpop.f32.mrf.mxu0 }
 0x195   :  { %v1288_v62 = vadd.f32 %v1287_v38, %v950_v15  ;;  %v1190_v15 = vadd.f32 %v1189_v24, %v852_v59  ;;  %v1002_v24 = vadd.f32 %v4314_v20, %v4312_v5  ;;  %v1005_v5 = vadd.f32 %v4324_v3, %v4320_v54 }
 0x197   :  { %v1313_v18 = vpop.f32.mrf.mxu1  ;;  %v1216_v40 = vadd.f32 %v1215_v58, %v1190_v15 }
 0x198   :  { %v1314_v23 = vadd.f32 %v1313_v18, %v1288_v62  ;;  %v956_v62 = vadd.f32 %v4310_v0, %v930_v28 }
 0x199   :  { %v1242_v7 = vadd.f32 %v1241_v9, %v1216_v40 }
 0x19a   :  { %v1339_v14 = vpop.f32.mrf.mxu2 }
 0x19b   :  { %v1340_v32 = vadd.f32 %v1339_v14, %v1314_v23 }
 0x19d   :  { %v1365_v34 = vpop.f32.mrf.mxu3 }
 0x19e   :  { %v4418_v19 = vpop.f32.mrf.mxu0  ;;  %v1366_v36 = vadd.f32 %v1365_v34, %v1340_v32  ;;  %v1268_v32 = vadd.f32 %v1267_v61, %v1242_v7 }
 0x1a0   :  { %v1593_v41 = vadd.f32 %v4415_v26, %v1366_v36  ;;  %v1600_v36 = vadd.f32 %v4394_v25, %v1268_v32 }
 0x1a1   :  { %v4423_v48 = vpop.f32.mrf.mxu1 }
 0x1a2   :  { %vm1605_vm2 = vcmp.ge.f32.partialorder %v1593_v41, 0.0  ;;  %v1617_v4 = vmul.f32 0.2, %v1593_v41  ;;  %v1624_v58 = vmul.f32 0.2, %v1600_v36  ;;  %vm1612_vm4 = vcmp.ge.f32.partialorder %v1600_v36, 0.0 }
 0x1a4   :  { %v4427_v38 = vsel %vm1605_vm2, %v1593_v41, %v1617_v4  ;;  %v4429_v16 = vpop.f32.mrf.mxu2  ;;  %v1028_v41 = vadd.f32 %v4316_v43, %v1002_v24  ;;  %v1636_v28 = vsel %vm1612_vm4, %v1600_v36, %v1624_v58  ;;  %v1031_v43 = vadd.f32 %v4328_v8, %v1005_v5 }
 0x1a5   :  { %1657 = vst [vmem:[#allocation1 + $0x9] sm:$0xff] %v4427_v38  ;;  %v1106_v58 = vadd.f32 %v4348_v2, %v4344_v50 }
 0x1a6   :  { %v1054_v61 = vadd.f32 %v4318_v52, %v1028_v41  ;;  %v1057_v52 = vadd.f32 %v4330_v39, %v1031_v43  ;;  %v1008_v43 = vadd.f32 %v4336_v60, %v4332_v45  ;;  %v1112_v45 = vadd.f32 %v4372_v10, %v4366_v6 }
 0x1a7   :  { %v4433_v29 = vpop.f32.mrf.mxu3 }
 0x1a8   :  { %v1293_v18 = vpop.f32.mrf.mxu0  ;;  %v1034_v50 = vadd.f32 %v4340_v17, %v1008_v43  ;;  %v1138_v17 = vadd.f32 %v4375_v37, %v1112_v45 }
 0x1a9   :  { %v1294_v23 = vadd.f32 %v1293_v18, %v956_v62 }
 0x1aa   :  { %v1164_v6 = vadd.f32 %v4382_v11, %v1138_v17  ;;  %v797_v17 = vadd.f32 %v4248_v46, %v4236_v35  ;;  %v5468_v35 = vld [vmem:[#allocation19_spill] sm:$0xff] }
 0x1ab   :  { %v1319_v13 = vpop.f32.mrf.mxu1 }
 0x1ac   :  { %v1320_v14 = vadd.f32 %v1319_v13, %v1294_v23  ;;  %v4448_v13 = vperm.slane %v4389_v21, 2 }
 0x1ae   :  { %v1345_v34 = vpop.f32.mrf.mxu2 }
 0x1af   :  { %v1346_v53 = vadd.f32 %v1345_v34, %v1320_v14 }
 0x1b1   :  { %v1371_v49 = vpop.f32.mrf.mxu3 }
 0x1b2   :  { %v1372_v55 = vadd.f32 %v1371_v49, %v1346_v53 }
 0x1b4   :  { %v1601_v0 = vadd.f32 %v4415_v26, %v1372_v55 }
 0x1b6   :  { %vm1613_vm3 = vcmp.ge.f32.partialorder %v1601_v0, 0.0  ;;  %v1625_v59 = vmul.f32 0.2, %v1601_v0 }
 0x1b8   :  { %v1637_v9 = vsel %vm1613_vm3, %v1601_v0, %v1625_v59 }
 0x1b9   :  { %v1804_v4 = vrot.slane %v1637_v9, 7 }
 0x1bb   :  { %v1391_v15 = vpop.f32.mrf.mxu0  ;;  %v4444_v20 = vsel %vm1647_vm5, %v1636_v28, %v1804_v4 }
 0x1bc   :  { %v1392_v62 = vadd.f32 %v1391_v15, %v1054_v61  ;;  %v1132_v61 = vadd.f32 %v4352_v30, %v1106_v58  ;;  %v130_v58 = vlaneseq }
 0x1be   :  { %v1158_v28 = vadd.f32 %v4354_v56, %v1132_v61  ;;  %vm4495_vm10 = vcmp.lt.s32.totalorder %v130_v58, 512  ;;  %vm4843_vm2 = vcmp.lt.s32.totalorder %v130_v58, 256  ;;  %v3354_v58 = vld [vmem:[%s5453_s8 + $0x178] sm:$0xff] }
 0x1bf   :  { %v1417_v40 = vpop.f32.mrf.mxu1 }
 0x1c0   :  { %v1418_v18 = vadd.f32 %v1417_v40, %v1392_v62 }
 0x1c3   :  { %v1443_v23 = vpop.f32.mrf.mxu2 }
 0x1c4   :  { %v1444_v7 = vadd.f32 %v1443_v23, %v1418_v18 }
 0x1c6   :  { %v1469_v14 = vpop.f32.mrf.mxu3  ;;  %v1394_v32 = vpop.f32.mrf.mxu0 }
 0x1c7   :  { %v1470_v34 = vadd.f32 %v1469_v14, %v1444_v7  ;;  %v1395_v53 = vadd.f32 %v1394_v32, %v1057_v52  ;;  %v4465_v52 = vperm.slane %v4389_v21, 3  ;;  %v1060_v32 = vadd.f32 %v4342_v33, %v1034_v50 }
 0x1c8   :  { %v1644_v33 = vrot.slane %v4427_v38, 7 }
 0x1c9   :  { %v1594_v54 = vadd.f32 %v4448_v13, %v1470_v34  ;;  %v1420_v3 = vpop.f32.mrf.mxu1 }
 0x1ca   :  { %v1421_v49 = vadd.f32 %v1420_v3, %v1395_v53 }
 0x1cb   :  { %vm1606_vm6 = vcmp.ge.f32.partialorder %v1594_v54, 0.0  ;;  %v1618_v24 = vmul.f32 0.2, %v1594_v54 }
 0x1cd   :  { %v4452_v36 = vsel %vm1606_vm6, %v1594_v54, %v1618_v24  ;;  %v1446_v8 = vpop.f32.mrf.mxu2 }
 0x1ce   :  { %1658 = vst [vmem:[#allocation1 + $0x12] sm:$0xff] %v4452_v36  ;;  %v1447_v55 = vadd.f32 %v1446_v8, %v1421_v49 }
 0x1d0   :  { %v1472_v0 = vpop.f32.mrf.mxu3  ;;  %v1397_v59 = vpop.f32.mrf.mxu0 }
 0x1d1   :  { %v1473_v41 = vadd.f32 %v1472_v0, %v1447_v55  ;;  %v1398_v60 = vadd.f32 %v1397_v59, %v1060_v32  ;;  %v1645_v55 = vrot.slane %v4452_v36, 6 }
 0x1d3   :  { %v4456_v39 = vadd.f32 %v4448_v13, %v1473_v41  ;;  %v1423_v9 = vpop.f32.mrf.mxu1 }
 0x1d4   :  { %v1424_v54 = vadd.f32 %v1423_v9, %v1398_v60  ;;  %v1648_v9 = vsel %vm1647_vm5, %v4397_v22, %v1644_v33 }
 0x1d5   :  { %vm1610_vm15 = vcmp.ge.f32.partialorder %v4456_v39, 0.0 }
 0x1d7   :  { %v1449_v4 = vpop.f32.mrf.mxu2 }
 0x1d8   :  { %v1450_v24 = vadd.f32 %v1449_v4, %v1424_v54  ;;  %v1109_v54 = vadd.f32 %v4358_v51, %v4356_v12 }
 0x1da   :  { %v1475_v15 = vpop.f32.mrf.mxu3 }
 0x1db   :  { %v1476_v41 = vadd.f32 %v1475_v15, %v1450_v24  ;;  %v5467_v24 = vld [vmem:[#allocation17_spill] sm:$0xff] }
 0x1dc   :  { %v823_v33 = vadd.f32 %v5467_v24, %v797_v17  ;;  %v2218_v17 = vld [vmem:[#allocation11 + $0x3a0] sm:$0xff]  ;;  %v2184_v24 = vld [vmem:[#allocation11 + $0x290] sm:$0xff] }
 0x1e9   :  { %v1495_v5 = vpop.f32.mrf.mxu0 }
 0x1ea   :  { %v1496_v62 = vadd.f32 %v1495_v5, %v1158_v28  ;;  %v1602_v28 = vadd.f32 %v4448_v13, %v1476_v41 }
 0x1ec   :  { %v1626_v43 = vmul.f32 0.2, %v1602_v28  ;;  %vm1614_vm11 = vcmp.ge.f32.partialorder %v1602_v28, 0.0 }
 0x1ed   :  { %v1521_v40 = vpop.f32.mrf.mxu1 }
 0x1ee   :  { %v1522_v18 = vadd.f32 %v1521_v40, %v1496_v62  ;;  %v1638_v50 = vsel %vm1614_vm11, %v1602_v28, %v1626_v43  ;;  %v2160_v28 = vld [vmem:[#allocation11 + $0x1d0] sm:$0xff] }
 0x1f1   :  { %v1547_v23 = vpop.f32.mrf.mxu2  ;;  %v4468_v14 = vpop.f32.mrf.mxu0 }
 0x1f2   :  { %v1548_v7 = vadd.f32 %v1547_v23, %v1522_v18 }
 0x1f4   :  { %v1573_v2 = vpop.f32.mrf.mxu3 }
 0x1f5   :  { %v1574_v30 = vadd.f32 %v1573_v2, %v1548_v7  ;;  %v4476_v21 = vpop.f32.mrf.mxu1 }
 0x1f7   :  { %v1595_v56 = vadd.f32 %v4465_v52, %v1574_v30  ;;  %v1805_v30 = vrot.slane %v1638_v50, 6 }
 0x1f9   :  { %vm1607_vm7 = vcmp.ge.f32.partialorder %v1595_v56, 0.0  ;;  %v1619_v34 = vmul.f32 0.2, %v1595_v56  ;;  %v4480_v3 = vpop.f32.mrf.mxu2  ;;  %v1501_v49 = vpop.f32.mrf.mxu0 }
 0x1fa   :  { %v1502_v37 = vadd.f32 %v1501_v49, %v1164_v6  ;;  %v1135_v49 = vadd.f32 %v4360_v27, %v1109_v54  ;;  %v5469_v6 = vld [vmem:[#allocation18_spill] sm:$0xff]  ;;  %v2152_v54 = vld [vmem:[#allocation11 + $0x190] sm:$0xff] }
 0x1fb   :  { %v4474_v53 = vsel %vm1607_vm7, %v1595_v56, %v1619_v34 }
 0x1fc   :  { %1659 = vst [vmem:[#allocation1 + $0x1b] sm:$0xff] %v4474_v53  ;;  %v4483_v8 = vpop.f32.mrf.mxu3  ;;  %v1646_v0 = vrot.slane %v4474_v53, 5  ;;  %v1161_v51 = vadd.f32 %v4364_v63, %v1135_v49  ;;  %v2182_v49 = vld [vmem:[#allocation11 + $0x280] sm:$0xff] }
 0x1fd   :  { %v1527_v59 = vpop.f32.mrf.mxu1 }
 0x1fe   :  { %v1650_v61 = vsel %vm1649_vm8, %v1645_v55, %v1646_v0  ;;  %v1528_v15 = vadd.f32 %v1527_v59, %v1502_v37  ;;  %v1499_v41 = vadd.f32 %v4468_v14, %v1161_v51  ;;  %v2114_v51 = vld [vmem:[#allocation11 + $0x60] sm:$0xff] }
 0x1ff   :  { %v1652_v4 = vsel %vm1651_vm9, %v1648_v9, %v1650_v61 }
 0x200   :  { %1654 = vst.msk [vmem:[#allocation2] ss:$8 sm:$0xf] %vm4495_vm10, %v1652_v4  ;;  %v2128_v4 = vld [vmem:[#allocation11 + $0xd0] sm:$0xff] }
 0x201   :  { %v1553_v5 = vpop.f32.mrf.mxu2 }
 0x202   :  { %v1554_v62 = vadd.f32 %v1553_v5, %v1528_v15  ;;  %v2192_v15 = vld [vmem:[#allocation11 + $0x2d0] sm:$0xff] }
 0x203   :  { %v1661_v10 = vld [vmem:[#allocation1 + $0x1] ss:$9 sm:$0xff] }
 0x204   :  { %1666 = vst [vmem:[#allocation1] sm:$0xff] %v4397_v22  ;;  %v1579_v40 = vpop.f32.mrf.mxu3 }
 0x205   :  { %1667 = vst [vmem:[#allocation1 + $0x9] sm:$0xff] %v4427_v38  ;;  %v1580_v18 = vadd.f32 %v1579_v40, %v1554_v62  ;;  %v2224_v40 = vld [vmem:[#allocation11 + $0x3d0] sm:$0xff] }
 0x206   :  { %1668 = vst [vmem:[#allocation1 + $0x12] sm:$0xff] %v4452_v36 }
 0x207   :  { %1669 = vst [vmem:[#allocation1 + $0x1b] sm:$0xff] %v4474_v53  ;;  %v1603_v7 = vadd.f32 %v4465_v52, %v1580_v18  ;;  %v2126_v18 = vld [vmem:[#allocation11 + $0xc0] sm:$0xff] }
 0x208   :  { %1664 = vst.msk [vmem:[#allocation2 + $0x21] ss:$8 sm:$0xf] %vm4495_vm10, %v1661_v10 }
 0x209   :  { %vm1615_vm12 = vcmp.ge.f32.partialorder %v1603_v7, 0.0  ;;  %v1627_v13 = vmul.f32 0.2, %v1603_v7 }
 0x20b   :  { %v1639_v2 = vsel %vm1615_vm12, %v1603_v7, %v1627_v13  ;;  %v2190_v7 = vld [vmem:[#allocation11 + $0x2c0] sm:$0xff] }
 0x20c   :  { %v1806_v56 = vrot.slane %v1639_v2, 5  ;;  %v2222_v13 = vld [vmem:[#allocation11 + $0x3c0] sm:$0xff] }
 0x20e   :  { %v1671_v23 = vld [vmem:[#allocation1 + $0x2] ss:$9 sm:$0xff]  ;;  %v1808_v32 = vsel %vm1649_vm8, %v1805_v30, %v1806_v56 }
 0x20f   :  { %1676 = vst [vmem:[#allocation1] sm:$0xff] %v4397_v22  ;;  %v1809_v34 = vsel %vm1651_vm9, %v4444_v20, %v1808_v32  ;;  %v901_v20 = vadd.f32 %v4292_v1, %v4288_v57  ;;  %v849_v57 = vadd.f32 %v5469_v6, %v823_v33  ;;  %v5470_v1 = vld [vmem:[#allocation20_spill] sm:$0xff]  ;;  %v2124_v30 = vld [vmem:[#allocation11 + $0xb0] sm:$0xff]  ;;  %v2214_v6 = vld [vmem:[#allocation11 + $0x380] sm:$0xff]  ;;  %vm3768_vm9 = vcmask 1024  }
 0x210   :  { %1677 = vst [vmem:[#allocation1 + $0x9] sm:$0xff] %v4427_v38  ;;  %v2156_v56 = vld [vmem:[#allocation11 + $0x1b0] sm:$0xff] }
 0x211   :  { %1678 = vst [vmem:[#allocation1 + $0x12] sm:$0xff] %v4452_v36  ;;  %v927_v46 = vadd.f32 %v5468_v35, %v901_v20  ;;  %v1187_v55 = vadd.f32 %v4400_v31, %v849_v57  ;;  %v2188_v32 = vld [vmem:[#allocation11 + $0x2b0] sm:$0xff]  ;;  %v2118_v35 = vld [vmem:[#allocation11 + $0x80] sm:$0xff] }
 0x212   :  { %1679 = vst [vmem:[#allocation1 + $0x1b] sm:$0xff] %v4474_v53  ;;  %v2120_v20 = vld [vmem:[#allocation11 + $0x90] sm:$0xff] }
 0x213   :  { %1674 = vst.msk [vmem:[#allocation2 + $0x1] ss:$8 sm:$0xf] %vm4495_vm10, %v1671_v23  ;;  %v953_v10 = vadd.f32 %v5470_v1, %v927_v46  ;;  %v1213_v27 = vadd.f32 %v4402_v42, %v1187_v55  ;;  %v2158_v23 = vld [vmem:[#allocation11 + $0x1c0] sm:$0xff]  ;;  %v2216_v33 = vld [vmem:[#allocation11 + $0x390] sm:$0xff] }
 0x214   :  { %1812 = vst.msk [vmem:[#allocation2 + $0x61] ss:$8 sm:$0xf] %vm4495_vm10, %v1809_v34  ;;  %v2122_v34 = vld [vmem:[#allocation11 + $0xa0] sm:$0xff]  ;;  %v2116_v1 = vld [vmem:[#allocation11 + $0x70] sm:$0xff] }
 0x215   :  { %v1291_v12 = vadd.f32 %v4418_v19, %v953_v10  ;;  %v1239_v63 = vadd.f32 %v4404_v47, %v1213_v27  ;;  %v1525_v19 = vadd.f32 %v4476_v21, %v1499_v41  ;;  %v2150_v46 = vld [vmem:[#allocation11 + $0x180] sm:$0xff]  ;;  %v2148_v10 = vld [vmem:[#allocation11 + $0x170] sm:$0xff] }
 0x216   :  { %v2180_v55 = vld [vmem:[#allocation11 + $0x270] sm:$0xff]  ;;  %v2178_v41 = vld [vmem:[#allocation11 + $0x260] sm:$0xff] }
 0x217   :  { %v1317_v37 = vadd.f32 %v4423_v48, %v1291_v12  ;;  %v1551_v59 = vadd.f32 %v4480_v3, %v1525_v19  ;;  %v1265_v14 = vadd.f32 %v4408_v44, %v1239_v63  ;;  %v2194_v3 = vld [vmem:[#allocation11 + $0x2e0] sm:$0xff]  ;;  %v2144_v63 = vld [vmem:[#allocation11 + $0x150] sm:$0xff] }
 0x218   :  { %v2146_v12 = vld [vmem:[#allocation11 + $0x160] sm:$0xff]  ;;  %v2208_v19 = vld [vmem:[#allocation11 + $0x350] sm:$0xff] }
 0x219   :  { %v1681_v45 = vld [vmem:[#allocation1 + $0x3] ss:$9 sm:$0xff]  ;;  %v1343_v31 = vadd.f32 %v4429_v16, %v1317_v37  ;;  %v1577_v48 = vadd.f32 %v4483_v8, %v1551_v59  ;;  %v1596_v61 = vadd.f32 %v4394_v25, %v1265_v14 }
 0x21a   :  { %1686 = vst [vmem:[#allocation1] sm:$0xff] %v4397_v22  ;;  %v2132_v16 = vld [vmem:[#allocation11 + $0xf0] sm:$0xff]  ;;  %v2210_v27 = vld [vmem:[#allocation11 + $0x360] sm:$0xff] }
 0x21b   :  { %1687 = vst [vmem:[#allocation1 + $0x9] sm:$0xff] %v4427_v38  ;;  %v1369_v9 = vadd.f32 %v4433_v29, %v1343_v31  ;;  %v1599_v44 = vadd.f32 %v4465_v52, %v1577_v48  ;;  %v2164_v29 = vld [vmem:[#allocation11 + $0x1f0] sm:$0xff]  ;;  %v1620_v21 = vmul.f32 0.2, %v1596_v61  ;;  %2414 = vmatpush.msra.mxu0 %v2132_v16  ;;  %vm1608_vm13 = vcmp.ge.f32.partialorder %v1596_v61, 0.0  ;;  %v2226_v52 = vld [vmem:[#allocation11 + $0x3e0] sm:$0xff] }
 0x21c   :  { %1688 = vst [vmem:[#allocation1 + $0x12] sm:$0xff] %v4452_v36  ;;  %2437 = vmatpush.msra.mxu1 %v2164_v29  ;;  %v2112_v37 = vld [vmem:[#allocation11 + $0x50] sm:$0xff]  ;;  %v2110_v59 = vld [vmem:[#allocation11 + $0x40] sm:$0xff] }
 0x21d   :  { %1689 = vst [vmem:[#allocation1 + $0x1b] sm:$0xff] %v4474_v53  ;;  %v1597_v47 = vadd.f32 %v4415_v26, %v1369_v9  ;;  %v2162_v26 = vld [vmem:[#allocation11 + $0x1e0] sm:$0xff]  ;;  %v1623_v8 = vmul.f32 0.2, %v1599_v44  ;;  %v4572_v5 = vsel %vm1608_vm13, %v1596_v61, %v1620_v21  ;;  %vm1611_vm1 = vcmp.ge.f32.partialorder %v1599_v44, 0.0  ;;  %v2176_v31 = vld [vmem:[#allocation11 + $0x250] sm:$0xff] }
 0x21e   :  { %1684 = vst.msk [vmem:[#allocation2 + $0x22] ss:$8 sm:$0xf] %vm4495_vm10, %v1681_v45  ;;  %2438 = vmatpush.msra.mxu1 %v2162_v26  ;;  %v2154_v45 = vld [vmem:[#allocation11 + $0x1a0] sm:$0xff]  ;;  %v2108_v48 = vld [vmem:[#allocation11 + $0x30] sm:$0xff] }
 0x21f   :  { %v1621_v25 = vmul.f32 0.2, %v1597_v47  ;;  %vm1609_vm14 = vcmp.ge.f32.partialorder %v1597_v47, 0.0  ;;  %v4586_v2 = vsel %vm1611_vm1, %v1599_v44, %v1623_v8  ;;  %v2142_v14 = vld [vmem:[#allocation11 + $0x140] sm:$0xff]  ;;  %v2140_v61 = vld [vmem:[#allocation11 + $0x130] sm:$0xff] }
 0x220   :  { %2439 = vmatpush.msra.mxu1 %v2160_v28  ;;  %v2174_v9 = vld [vmem:[#allocation11 + $0x240] sm:$0xff]  ;;  %v2204_v44 = vld [vmem:[#allocation11 + $0x330] sm:$0xff] }
 0x221   :  { %v4575_v43 = vsel %vm1609_vm14, %v1597_v47, %v1621_v25  ;;  %v2172_v47 = vld [vmem:[#allocation11 + $0x230] sm:$0xff]  ;;  %v2106_v16 = vld [vmem:[#allocation11 + $0x20] sm:$0xff] }
 0x222   :  { %2440 = vmatpush.msra.mxu1 %v2158_v23  ;;  %v2138_v29 = vld [vmem:[#allocation11 + $0x120] sm:$0xff]  ;;  %v2104_v25 = vld [vmem:[#allocation11 + $0x10] sm:$0xff] }
 0x223   :  { %v2168_v26 = vld [vmem:[#allocation11 + $0x210] sm:$0xff]  ;;  %v2166_v8 = vld [vmem:[#allocation11 + $0x200] sm:$0xff] }
 0x224   :  { %v1691_v60 = vld [vmem:[#allocation1 + $0x4] ss:$9 sm:$0xff]  ;;  %2441 = vmatpush.msra.mxu1 %v2156_v56 }
 0x225   :  { %1696 = vst [vmem:[#allocation1] sm:$0xff] %v4397_v22  ;;  %v2260_v28 = vld [vmem:[#allocation11 + $0x4f0] sm:$0xff]  ;;  %v2290_v23 = vld [vmem:[#allocation11 + $0x5e0] sm:$0xff] }
 0x226   :  { %1697 = vst [vmem:[#allocation1 + $0x9] sm:$0xff] %v4427_v38  ;;  %2442 = vmatpush.msra.mxu1 %v2154_v45  ;;  %v2256_v56 = vld [vmem:[#allocation11 + $0x4d0] sm:$0xff]  ;;  %v2254_v45 = vld [vmem:[#allocation11 + $0x4c0] sm:$0xff] }
 0x227   :  { %1698 = vst [vmem:[#allocation1 + $0x12] sm:$0xff] %v4452_v36 }
 0x228   :  { %1699 = vst [vmem:[#allocation1 + $0x1b] sm:$0xff] %v4474_v53  ;;  %2443 = vmatpush.msra.mxu1 %v2152_v54  ;;  %v2350_v54 = vld [vmem:[#allocation11 + $0x7c0] sm:$0xff] }
 0x229   :  { %1694 = vst.msk [vmem:[#allocation2 + $0x2] ss:$8 sm:$0xf] %vm4495_vm10, %v1691_v60  ;;  %v2186_v60 = vld [vmem:[#allocation11 + $0x2a0] sm:$0xff] }
 0x22a   :  { %2444 = vmatpush.msra.mxu1 %v2150_v46  ;;  %v2348_v46 = vld [vmem:[#allocation11 + $0x7b0] sm:$0xff] }
 0x22c   :  { %2445 = vmatpush.msra.mxu1 %v2148_v10  ;;  %v2248_v10 = vld [vmem:[#allocation11 + $0x490] sm:$0xff] }
 0x22e   :  { %2446 = vmatpush.msra.mxu1 %v2146_v12  ;;  %v2246_v12 = vld [vmem:[#allocation11 + $0x480] sm:$0xff] }
 0x22f   :  { %v1701_v0 = vld [vmem:[#allocation1 + $0x5] ss:$9 sm:$0xff] }
 0x230   :  { %1706 = vst [vmem:[#allocation1] sm:$0xff] %v4397_v22  ;;  %2447 = vmatpush.msra.mxu1 %v2144_v63  ;;  %v2244_v63 = vld [vmem:[#allocation11 + $0x470] sm:$0xff] }
 0x231   :  { %1707 = vst [vmem:[#allocation1 + $0x9] sm:$0xff] %v4427_v38 }
 0x232   :  { %1708 = vst [vmem:[#allocation1 + $0x12] sm:$0xff] %v4452_v36  ;;  %2448 = vmatpush.msra.mxu1 %v2142_v14  ;;  %v2242_v14 = vld [vmem:[#allocation11 + $0x460] sm:$0xff] }
 0x233   :  { %1709 = vst [vmem:[#allocation1 + $0x1b] sm:$0xff] %v4474_v53 }
 0x234   :  { %1704 = vst.msk [vmem:[#allocation2 + $0x23] ss:$8 sm:$0xf] %vm4495_vm10, %v1701_v0  ;;  %v2212_v0 = vld [vmem:[#allocation11 + $0x370] sm:$0xff]  ;;  %2449 = vmatpush.msra.mxu1 %v2140_v61  ;;  %v2338_v61 = vld [vmem:[#allocation11 + $0x760] sm:$0xff] }
 0x236   :  { %2450 = vmatpush.msra.mxu1 %v2138_v29  ;;  %v2336_v29 = vld [vmem:[#allocation11 + $0x750] sm:$0xff] }
 0x23a   :  { %v1711_v42 = vld [vmem:[#allocation1 + $0x6] ss:$9 sm:$0xff] }
 0x23b   :  { %1716 = vst [vmem:[#allocation1] sm:$0xff] %v4397_v22  ;;  %v2196_v22 = vld [vmem:[#allocation11 + $0x2f0] sm:$0xff] }
 0x23c   :  { %1717 = vst [vmem:[#allocation1 + $0x9] sm:$0xff] %v4427_v38  ;;  %v2228_v38 = vld [vmem:[#allocation11 + $0x3f0] sm:$0xff]  ;;  %2460 = vmatpush.msra.mxu2 %v2196_v22  ;;  %v2170_v22 = vld [vmem:[#allocation11 + $0x220] sm:$0xff] }
 0x23d   :  { %1718 = vst [vmem:[#allocation1 + $0x12] sm:$0xff] %v4452_v36  ;;  %2483 = vmatpush.msra.mxu3 %v2228_v38  ;;  %v2130_v36 = vld [vmem:[#allocation11 + $0xe0] sm:$0xff] }
 0x23e   :  { %1719 = vst [vmem:[#allocation1 + $0x1b] sm:$0xff] %v4474_v53  ;;  %v1622_v53 = vmul.f32 0.2, %v4456_v39  ;;  %2415 = vmatpush.msra.mxu0 %v2130_v36  ;;  %2461 = vmatpush.msra.mxu2 %v2194_v3  ;;  %v2202_v38 = vld [vmem:[#allocation11 + $0x320] sm:$0xff]  ;;  %v2136_v36 = vld [vmem:[#allocation11 + $0x110] sm:$0xff] }
 0x23f   :  { %1714 = vst.msk [vmem:[#allocation2 + $0x3] ss:$8 sm:$0xf] %vm4495_vm10, %v1711_v42  ;;  %2484 = vmatpush.msra.mxu3 %v2226_v52  ;;  %v2206_v42 = vld [vmem:[#allocation11 + $0x340] sm:$0xff]  ;;  %2451 = vmatpush.msra.mxu1 %v2136_v36  ;;  %v2200_v3 = vld [vmem:[#allocation11 + $0x310] sm:$0xff] }
 0x240   :  { %2416 = vmatpush.msra.mxu0 %v2128_v4  ;;  %2462 = vmatpush.msra.mxu2 %v2192_v15  ;;  %v4581_v50 = vsel %vm1610_vm15, %v4456_v39, %v1622_v53  ;;  %v2220_v39 = vld [vmem:[#allocation11 + $0x3b0] sm:$0xff]  ;;  %v2102_v53 = vld [vmem:[#allocation11] sm:$0xff] }
 0x241   :  { %2485 = vmatpush.msra.mxu3 %v2224_v40  ;;  %v2134_v52 = vld [vmem:[#allocation11 + $0x100] sm:$0xff]  ;;  %v2292_v15 = vld [vmem:[#allocation11 + $0x5f0] sm:$0xff] }
 0x242   :  { %2417 = vmatpush.msra.mxu0 %v2126_v18  ;;  %2463 = vmatpush.msra.mxu2 %v2190_v7  ;;  %v2198_v4 = vld [vmem:[#allocation11 + $0x300] sm:$0xff]  ;;  %v2356_v40 = vld [vmem:[#allocation11 + $0x7f0] sm:$0xff] }
 0x243   :  { %2486 = vmatpush.msra.mxu3 %v2222_v13  ;;  %2452 = vmatpush.msra.mxu1 %v2134_v52  ;;  %v2258_v18 = vld [vmem:[#allocation11 + $0x4e0] sm:$0xff]  ;;  %v3933_v13 = vmov 0.0   ;;  %v2236_v36 = vld [vmem:[#allocation11 + $0x430] sm:$0xff] }
 0x244   :  { %2418 = vmatpush.msra.mxu0 %v2124_v30  ;;  %2464 = vmatpush.msra.mxu2 %v2188_v32  ;;  %v2322_v7 = vld [vmem:[#allocation11 + $0x6e0] sm:$0xff]  ;;  %138 = vst.msk [vmem:[#allocation2 + $0x4] ss:$8 sm:$0xf] %vm4495_vm10, %v3933_v13  ;;  %v2288_v32 = vld [vmem:[#allocation11 + $0x5d0] sm:$0xff] }
 0x245   :  { %v1721_v62 = vld [vmem:[#allocation1 + $0x7] ss:$9 sm:$0xff]  ;;  %2487 = vmatpush.msra.mxu3 %v2220_v39  ;;  %2529 = vmatpush.msrb.mxu1 %v2292_v15  ;;  %144 = vst.msk [vmem:[#allocation2 + $0x41] ss:$8 sm:$0xf] %vm4495_vm10, %v3933_v13 }
 0x246   :  { %1730 = vst [vmem:[#allocation1] sm:$0xff] %v4572_v5  ;;  %2419 = vmatpush.msra.mxu0 %v2122_v34  ;;  %2465 = vmatpush.msra.mxu2 %v2186_v60  ;;  %v2354_v30 = vld [vmem:[#allocation11 + $0x7e0] sm:$0xff]  ;;  %v2320_v39 = vld [vmem:[#allocation11 + $0x6d0] sm:$0xff] }
 0x247   :  { %1731 = vst [vmem:[#allocation1 + $0x9] sm:$0xff] %v4575_v43  ;;  %2488 = vmatpush.msra.mxu3 %v2218_v17  ;;  %2530 = vmatpush.msrb.mxu1 %v2290_v23  ;;  %v2352_v34 = vld [vmem:[#allocation11 + $0x7d0] sm:$0xff]  ;;  %v2286_v60 = vld [vmem:[#allocation11 + $0x5c0] sm:$0xff] }
 0x248   :  { %1732 = vst [vmem:[#allocation1 + $0x12] sm:$0xff] %v4581_v50  ;;  %2420 = vmatpush.msra.mxu0 %v2120_v20  ;;  %2466 = vmatpush.msra.mxu2 %v2184_v24  ;;  %v2318_v17 = vld [vmem:[#allocation11 + $0x6c0] sm:$0xff]  ;;  %v2252_v24 = vld [vmem:[#allocation11 + $0x4b0] sm:$0xff] }
 0x249   :  { %1733 = vst [vmem:[#allocation1 + $0x1b] sm:$0xff] %v4586_v2  ;;  %2489 = vmatpush.msra.mxu3 %v2216_v33  ;;  %2531 = vmatpush.msrb.mxu1 %v2288_v32  ;;  %v2284_v33 = vld [vmem:[#allocation11 + $0x5b0] sm:$0xff]  ;;  %v2234_v52 = vld [vmem:[#allocation11 + $0x420] sm:$0xff] }
 0x24a   :  { %1724 = vst.msk [vmem:[#allocation2 + $0x24] ss:$8 sm:$0xf] %vm4495_vm10, %v1721_v62  ;;  %2421 = vmatpush.msra.mxu0 %v2118_v35  ;;  %2467 = vmatpush.msra.mxu2 %v2182_v49  ;;  %v2324_v62 = vld [vmem:[#allocation11 + $0x6f0] sm:$0xff]  ;;  %v2250_v49 = vld [vmem:[#allocation11 + $0x4a0] sm:$0xff] }
 0x24b   :  { %2490 = vmatpush.msra.mxu3 %v2214_v6  ;;  %147 = vst [vmem:[#allocation2 + $0x42] ss:$8 sm:$0xf] %v3933_v13  ;;  %2532 = vmatpush.msrb.mxu1 %v2286_v60  ;;  %v2316_v35 = vld [vmem:[#allocation11 + $0x6b0] sm:$0xff]  ;;  %v2282_v6 = vld [vmem:[#allocation11 + $0x5a0] sm:$0xff] }
 0x24c   :  { %2422 = vmatpush.msra.mxu0 %v2116_v1  ;;  %2468 = vmatpush.msra.mxu2 %v2180_v55  ;;  %135 = vst.msk [vmem:[#allocation2 + $0x20] ss:$8 sm:$0xf] %vm4495_vm10, %v3933_v13  ;;  %v2346_v1 = vld [vmem:[#allocation11 + $0x7a0] sm:$0xff]  ;;  %v2280_v55 = vld [vmem:[#allocation11 + $0x590] sm:$0xff] }
 0x24d   :  { %2491 = vmatpush.msra.mxu3 %v2212_v0  ;;  %141 = vst.msk [vmem:[#allocation2 + $0x25] ss:$8 sm:$0xf] %vm4495_vm10, %v3933_v13  ;;  %2533 = vmatpush.msrb.mxu1 %v2284_v33  ;;  %v2312_v0 = vld [vmem:[#allocation11 + $0x690] sm:$0xff]  ;;  %v2326_v32 = vld [vmem:[#allocation11 + $0x700] sm:$0xff] }
 0x24e   :  { %2423 = vmatpush.msra.mxu0 %v2114_v51  ;;  %2469 = vmatpush.msra.mxu2 %v2178_v41  ;;  %148 = vst [vmem:[#allocation2 + $0x42] ss:$8 sm:$0xf0] %v3933_v13  ;;  %v2344_v51 = vld [vmem:[#allocation11 + $0x790] sm:$0xff]  ;;  %v2278_v41 = vld [vmem:[#allocation11 + $0x580] sm:$0xff] }
 0x24f   :  { %2492 = vmatpush.msra.mxu3 %v2210_v27  ;;  %2534 = vmatpush.msrb.mxu1 %v2282_v6  ;;  %164 = vst.msk [vmem:[#allocation3 + $0x6] ss:$8 sm:$0xf] %vm4495_vm10, %v3933_v13  ;;  %v2310_v27 = vld [vmem:[#allocation11 + $0x680] sm:$0xff]  ;;  %v2232_v15 = vld [vmem:[#allocation11 + $0x410] sm:$0xff] }
 0x250   :  { %v1735_v57 = vld [vmem:[#allocation1 + $0x1] ss:$9 sm:$0xff]  ;;  %2424 = vmatpush.msra.mxu0 %v2112_v37  ;;  %2470 = vmatpush.msra.mxu2 %v2176_v31  ;;  %166 = vst [vmem:[#allocation4 + $0x8] sm:$0x1] %v3933_v13 }
 0x251   :  { %1740 = vst [vmem:[#allocation1] sm:$0xff] %v4572_v5  ;;  %2493 = vmatpush.msra.mxu3 %v2208_v19  ;;  %2535 = vmatpush.msrb.mxu1 %v2280_v55  ;;  %v2342_v37 = vld [vmem:[#allocation11 + $0x780] sm:$0xff]  ;;  %v2276_v31 = vld [vmem:[#allocation11 + $0x570] sm:$0xff]  ;;  %v2133_v55 = vld [vmem:[#allocation11 + $0xf8] sm:$0xff] }
 0x252   :  { %1741 = vst [vmem:[#allocation1 + $0x9] sm:$0xff] %v4575_v43  ;;  %2425 = vmatpush.msra.mxu0 %v2110_v59  ;;  %2471 = vmatpush.msra.mxu2 %v2174_v9  ;;  %v2308_v19 = vld [vmem:[#allocation11 + $0x670] sm:$0xff]  ;;  %v2274_v9 = vld [vmem:[#allocation11 + $0x560] sm:$0xff] }
 0x253   :  { %1742 = vst [vmem:[#allocation1 + $0x12] sm:$0xff] %v4581_v50  ;;  %2494 = vmatpush.msra.mxu3 %v2206_v42  ;;  %2536 = vmatpush.msrb.mxu1 %v2278_v41  ;;  %v2340_v59 = vld [vmem:[#allocation11 + $0x770] sm:$0xff]  ;;  %v2229_v41 = vld [vmem:[#allocation11 + $0x3f8] sm:$0xff] }
 0x254   :  { %1743 = vst [vmem:[#allocation1 + $0x1b] sm:$0xff] %v4586_v2  ;;  %2426 = vmatpush.msra.mxu0 %v2108_v48  ;;  %2472 = vmatpush.msra.mxu2 %v2172_v47  ;;  %v2306_v48 = vld [vmem:[#allocation11 + $0x660] sm:$0xff]  ;;  %v2240_v47 = vld [vmem:[#allocation11 + $0x450] sm:$0xff] }
 0x255   :  { %1738 = vst.msk [vmem:[#allocation2 + $0x5] ss:$8 sm:$0xf] %vm4495_vm10, %v1735_v57  ;;  %2495 = vmatpush.msra.mxu3 %v2204_v44  ;;  %v2314_v57 = vld [vmem:[#allocation11 + $0x6a0] sm:$0xff]  ;;  %2537 = vmatpush.msrb.mxu1 %v2276_v31  ;;  %v2272_v44 = vld [vmem:[#allocation11 + $0x550] sm:$0xff]  ;;  %v2227_v31 = vld [vmem:[#allocation11 + $0x3e8] sm:$0xff] }
 0x256   :  { %2427 = vmatpush.msra.mxu0 %v2106_v16  ;;  %2473 = vmatpush.msra.mxu2 %v2170_v22  ;;  %167 = vst [vmem:[#allocation4 + $0x1] sm:$0x1] %v3933_v13  ;;  %v2304_v16 = vld [vmem:[#allocation11 + $0x650] sm:$0xff]  ;;  %v2238_v22 = vld [vmem:[#allocation11 + $0x440] sm:$0xff] }
 0x257   :  { %2496 = vmatpush.msra.mxu3 %v2202_v38  ;;  %168 = vst [vmem:[#allocation4 + $0xa] sm:$0x1] %v3933_v13  ;;  %2538 = vmatpush.msrb.mxu1 %v2274_v9  ;;  %v2302_v38 = vld [vmem:[#allocation11 + $0x640] sm:$0xff]  ;;  %v2225_v9 = vld [vmem:[#allocation11 + $0x3d8] sm:$0xff] }
 0x258   :  { %2428 = vmatpush.msra.mxu0 %v2104_v25  ;;  %2474 = vmatpush.msra.mxu2 %v2168_v26  ;;  %169 = vst [vmem:[#allocation4 + $0x3] sm:$0x1] %v3933_v13  ;;  %v2334_v25 = vld [vmem:[#allocation11 + $0x740] sm:$0xff]  ;;  %v2268_v26 = vld [vmem:[#allocation11 + $0x530] sm:$0xff] }
 0x259   :  { %2497 = vmatpush.msra.mxu3 %v2200_v3  ;;  %2539 = vmatpush.msrb.mxu1 %v2272_v44  ;;  %v2300_v3 = vld [vmem:[#allocation11 + $0x630] sm:$0xff]  ;;  %v2125_v44 = vld [vmem:[#allocation11 + $0xb8] sm:$0xff]  ;;  %152 = vst.msk [vmem:[#allocation3 + $0x10] ss:$8 sm:$0x3] %vm4843_vm2, %v3933_v13 }
 0x25a   :  { %2429 = vmatpush.msra.mxu0 %v2102_v53  ;;  %2475 = vmatpush.msra.mxu2 %v2166_v8  ;;  %v2332_v53 = vld [vmem:[#allocation11 + $0x730] sm:$0xff]  ;;  %v2266_v8 = vld [vmem:[#allocation11 + $0x520] sm:$0xff]  ;;  %155 = vst.msk [vmem:[#allocation3 + $0x2] ss:$8 sm:$0x3] %vm4843_vm2, %v3933_v13 }
 0x25b   :  { %v1745_v21 = vld [vmem:[#allocation1 + $0x2] ss:$9 sm:$0xff]  ;;  %2498 = vmatpush.msra.mxu3 %v2198_v4  ;;  %158 = vst.msk [vmem:[#allocation3 + $0x13] ss:$8 sm:$0x3] %vm4843_vm2, %v3933_v13 }
 0x25c   :  { %1750 = vst [vmem:[#allocation1] sm:$0xff] %v4572_v5  ;;  %2506 = vmatpush.msrb.mxu0 %v2260_v28  ;;  %2552 = vmatpush.msrb.mxu2 %v2324_v62  ;;  %v2298_v4 = vld [vmem:[#allocation11 + $0x620] sm:$0xff]  ;;  %v2264_v62 = vld [vmem:[#allocation11 + $0x510] sm:$0xff] }
 0x25d   :  { %1751 = vst [vmem:[#allocation1 + $0x9] sm:$0xff] %v4575_v43  ;;  %2575 = vmatpush.msrb.mxu3 %v2356_v40  ;;  %v2330_v28 = vld [vmem:[#allocation11 + $0x720] sm:$0xff]  ;;  %v2296_v40 = vld [vmem:[#allocation11 + $0x610] sm:$0xff] }
 0x25e   :  { %1752 = vst [vmem:[#allocation1 + $0x12] sm:$0xff] %v4581_v50  ;;  %2507 = vmatpush.msrb.mxu0 %v2258_v18  ;;  %2553 = vmatpush.msrb.mxu2 %v2322_v7  ;;  %v2328_v18 = vld [vmem:[#allocation11 + $0x710] sm:$0xff]  ;;  %v2230_v7 = vld [vmem:[#allocation11 + $0x400] sm:$0xff] }
 0x25f   :  { %1753 = vst [vmem:[#allocation1 + $0x1b] sm:$0xff] %v4586_v2  ;;  %2576 = vmatpush.msrb.mxu3 %v2354_v30  ;;  %v2262_v30 = vld [vmem:[#allocation11 + $0x500] sm:$0xff] }
 0x260   :  { %1748 = vst.msk [vmem:[#allocation2 + $0x26] ss:$8 sm:$0xf] %vm4495_vm10, %v1745_v21  ;;  %2508 = vmatpush.msrb.mxu0 %v2256_v56  ;;  %2554 = vmatpush.msrb.mxu2 %v2320_v39  ;;  %v2270_v21 = vld [vmem:[#allocation11 + $0x540] sm:$0xff] }
 0x261   :  { %2577 = vmatpush.msrb.mxu3 %v2352_v34  ;;  %2540 = vmatpush.msrb.mxu1 %v2270_v21  ;;  %v2294_v56 = vld [vmem:[#allocation11 + $0x600] sm:$0xff]  ;;  %v2123_v21 = vld [vmem:[#allocation11 + $0xa8] sm:$0xff]  ;;  %161 = vst.msk [vmem:[#allocation3 + $0x5] ss:$8 sm:$0x3] %vm4843_vm2, %v3933_v13 }
 0x262   :  { %2509 = vmatpush.msrb.mxu0 %v2254_v45  ;;  %2555 = vmatpush.msrb.mxu2 %v2318_v17  ;;  %171 = vst.msk [vmem:[#allocation4 + $0x4] ss:$8 sm:$0x3] %vm4843_vm2, %v3933_v13  ;;  %v3368_v13 = vld [vmem:[%s5453_s8 + $0x1e8] sm:$0xff] }
 0x263   :  { %2578 = vmatpush.msrb.mxu3 %v2350_v54  ;;  %2541 = vmatpush.msrb.mxu1 %v2268_v26  ;;  %v2121_v26 = vld [vmem:[#allocation11 + $0x98] sm:$0xff] }
 0x264   :  { %2510 = vmatpush.msrb.mxu0 %v2252_v24  ;;  %2556 = vmatpush.msrb.mxu2 %v2316_v35 }
 0x265   :  { %2579 = vmatpush.msrb.mxu3 %v2348_v46  ;;  %2542 = vmatpush.msrb.mxu1 %v2266_v8 }
 0x266   :  { %v1755_v20 = vld [vmem:[#allocation1 + $0x3] ss:$9 sm:$0xff]  ;;  %2511 = vmatpush.msrb.mxu0 %v2250_v49  ;;  %2557 = vmatpush.msrb.mxu2 %v2314_v57 }
 0x267   :  { %1760 = vst [vmem:[#allocation1] sm:$0xff] %v4572_v5  ;;  %2580 = vmatpush.msrb.mxu3 %v2346_v1  ;;  %2543 = vmatpush.msrb.mxu1 %v2264_v62  ;;  %v2185_v62 = vld [vmem:[#allocation11 + $0x298] sm:$0xff] }
 0x268   :  { %1761 = vst [vmem:[#allocation1 + $0x9] sm:$0xff] %v4575_v43  ;;  %2512 = vmatpush.msrb.mxu0 %v2248_v10  ;;  %2558 = vmatpush.msrb.mxu2 %v2312_v0  ;;  %v2165_v0 = vld [vmem:[#allocation11 + $0x1f8] sm:$0xff] }
 0x269   :  { %1762 = vst [vmem:[#allocation1 + $0x12] sm:$0xff] %v4581_v50  ;;  %2581 = vmatpush.msrb.mxu3 %v2344_v51  ;;  %2544 = vmatpush.msrb.mxu1 %v2262_v30 }
 0x26a   :  { %1763 = vst [vmem:[#allocation1 + $0x1b] sm:$0xff] %v4586_v2  ;;  %2513 = vmatpush.msrb.mxu0 %v2246_v12  ;;  %2559 = vmatpush.msrb.mxu2 %v2310_v27  ;;  %v2197_v12 = vld [vmem:[#allocation11 + $0x2f8] sm:$0xff]  ;;  %v2131_v27 = vld [vmem:[#allocation11 + $0xe8] sm:$0xff] }
 0x26b   :  { %1758 = vst.msk [vmem:[#allocation2 + $0x6] ss:$8 sm:$0xf] %vm4495_vm10, %v1755_v20  ;;  %2582 = vmatpush.msrb.mxu3 %v2342_v37  ;;  %v2163_v37 = vld [vmem:[#allocation11 + $0x1e8] sm:$0xff] }
 0x26c   :  { %2514 = vmatpush.msrb.mxu0 %v2244_v63  ;;  %2560 = vmatpush.msrb.mxu2 %v2308_v19  ;;  %v2195_v63 = vld [vmem:[#allocation11 + $0x2e8] sm:$0xff]  ;;  %v2129_v19 = vld [vmem:[#allocation11 + $0xd8] sm:$0xff] }
 0x26d   :  { %2583 = vmatpush.msrb.mxu3 %v2340_v59  ;;  %v2161_v59 = vld [vmem:[#allocation11 + $0x1d8] sm:$0xff] }
 0x26e   :  { %2515 = vmatpush.msrb.mxu0 %v2242_v14  ;;  %2561 = vmatpush.msrb.mxu2 %v2306_v48  ;;  %v2193_v14 = vld [vmem:[#allocation11 + $0x2d8] sm:$0xff]  ;;  %v2159_v48 = vld [vmem:[#allocation11 + $0x1c8] sm:$0xff] }
 0x26f   :  { %2584 = vmatpush.msrb.mxu3 %v2338_v61  ;;  %v2191_v61 = vld [vmem:[#allocation11 + $0x2c8] sm:$0xff] }
 0x270   :  { %2516 = vmatpush.msrb.mxu0 %v2240_v47  ;;  %2562 = vmatpush.msrb.mxu2 %v2304_v16  ;;  %v2223_v47 = vld [vmem:[#allocation11 + $0x3c8] sm:$0xff]  ;;  %v2157_v16 = vld [vmem:[#allocation11 + $0x1b8] sm:$0xff] }
 0x271   :  { %v1765_v42 = vld [vmem:[#allocation1 + $0x4] ss:$9 sm:$0xff]  ;;  %2585 = vmatpush.msrb.mxu3 %v2336_v29 }
 0x272   :  { %1770 = vst [vmem:[#allocation1] sm:$0xff] %v4572_v5  ;;  %2517 = vmatpush.msrb.mxu0 %v2238_v22  ;;  %2563 = vmatpush.msrb.mxu2 %v2302_v38  ;;  %v2189_v29 = vld [vmem:[#allocation11 + $0x2b8] sm:$0xff]  ;;  %v2155_v38 = vld [vmem:[#allocation11 + $0x1a8] sm:$0xff] }
 0x273   :  { %1771 = vst [vmem:[#allocation1 + $0x9] sm:$0xff] %v4575_v43  ;;  %2586 = vmatpush.msrb.mxu3 %v2334_v25  ;;  %v2221_v22 = vld [vmem:[#allocation11 + $0x3b8] sm:$0xff]  ;;  %v2187_v25 = vld [vmem:[#allocation11 + $0x2a8] sm:$0xff] }
 0x274   :  { %1772 = vst [vmem:[#allocation1 + $0x12] sm:$0xff] %v4581_v50  ;;  %2518 = vmatpush.msrb.mxu0 %v2236_v36  ;;  %2564 = vmatpush.msrb.mxu2 %v2300_v3  ;;  %v2219_v36 = vld [vmem:[#allocation11 + $0x3a8] sm:$0xff] }
 0x275   :  { %1773 = vst [vmem:[#allocation1 + $0x1b] sm:$0xff] %v4586_v2  ;;  %2587 = vmatpush.msrb.mxu3 %v2332_v53 }
 0x276   :  { %1768 = vst.msk [vmem:[#allocation2 + $0x27] ss:$8 sm:$0xf] %vm4495_vm10, %v1765_v42  ;;  %2519 = vmatpush.msrb.mxu0 %v2234_v52  ;;  %2565 = vmatpush.msrb.mxu2 %v2298_v4  ;;  %v2127_v42 = vld [vmem:[#allocation11 + $0xc8] sm:$0xff]  ;;  %v2153_v4 = vld [vmem:[#allocation11 + $0x198] sm:$0xff] }
 0x277   :  { %2588 = vmatpush.msrb.mxu3 %v2330_v28 }
 0x278   :  { %2520 = vmatpush.msrb.mxu0 %v2232_v15  ;;  %2566 = vmatpush.msrb.mxu2 %v2296_v40  ;;  %v2217_v40 = vld [vmem:[#allocation11 + $0x398] sm:$0xff] }
 0x279   :  { %2589 = vmatpush.msrb.mxu3 %v2328_v18 }
 0x27a   :  { %2521 = vmatpush.msrb.mxu0 %v2230_v7  ;;  %2567 = vmatpush.msrb.mxu2 %v2294_v56  ;;  %v2151_v7 = vld [vmem:[#allocation11 + $0x188] sm:$0xff] }
 0x27b   :  { %2590 = vmatpush.msrb.mxu3 %v2326_v32 }
 0x27c   :  { %v1775_v23 = vld [vmem:[#allocation1 + $0x5] ss:$9 sm:$0xff] }
 0x27d   :  { %1780 = vst [vmem:[#allocation1] sm:$0xff] %v4572_v5  ;;  %v1834_v3 = vld [vmem:[#allocation2 + $0x20] sm:$0xfe]  ;;  %v1835_v52 = vld [vmem:[#allocation2 + $0x28] sm:$0xfe] }
 0x27e   :  { %1781 = vst [vmem:[#allocation1 + $0x9] sm:$0xff] %v4575_v43  ;;  %v1836_v18 = vld [vmem:[#allocation2 + $0x30] sm:$0xfe]  ;;  %v1837_v32 = vld [vmem:[#allocation2 + $0x38] sm:$0xfe] }
 0x27f   :  { %1782 = vst [vmem:[#allocation1 + $0x12] sm:$0xff] %v4581_v50 }
 0x280   :  { %1783 = vst [vmem:[#allocation1 + $0x1b] sm:$0xff] %v4586_v2 }
 0x281   :  { %1778 = vst.msk [vmem:[#allocation2 + $0x7] ss:$8 sm:$0xf] %vm4495_vm10, %v1775_v23  ;;  %v2119_v23 = vld [vmem:[#allocation11 + $0x88] sm:$0xff] }
 0x287   :  { %v1785_v39 = vld [vmem:[#allocation1 + $0x6] ss:$9 sm:$0xff] }
 0x288   :  { %1793 = vst [vmem:[#allocation1 + $0x1b] sm:$0xff] %v4586_v2  ;;  %v1830_v45 = vld [vmem:[#allocation2] sm:$0xfe]  ;;  %v1831_v60 = vld [vmem:[#allocation2 + $0x8] sm:$0xfe] }
 0x289   :  { %1790 = vst [vmem:[#allocation1] sm:$0xff] %v4572_v5  ;;  %v1832_v17 = vld [vmem:[#allocation2 + $0x10] sm:$0xfe]  ;;  %v2374_v20 = vrot.slane %v1830_v45, 1  ;;  %v2377_v54 = vrot.slane %v1831_v60, 1 }
 0x28a   :  { %1791 = vst [vmem:[#allocation1 + $0x9] sm:$0xff] %v4575_v43  ;;  %v1833_v24 = vld [vmem:[#allocation2 + $0x18] sm:$0xfe] }
 0x28b   :  { %1792 = vst [vmem:[#allocation1 + $0x12] sm:$0xff] %v4581_v50  ;;  %v2380_v50 = vrot.slane %v1832_v17, 1  ;;  %v2383_v6 = vrot.slane %v1833_v24, 1  ;;  %v2386_v17 = vrot.slane %v1834_v3, 1  ;;  %v2395_v24 = vrot.slane %v1837_v32, 1  ;;  %v2201_v3 = vld [vmem:[#allocation11 + $0x318] sm:$0xff] }
 0x28c   :  { %1788 = vst.msk [vmem:[#allocation2 + $0x60] ss:$8 sm:$0xf] %vm4495_vm10, %v1785_v39  ;;  %v2183_v39 = vld [vmem:[#allocation11 + $0x288] sm:$0xff] }
 0x28d   :  { %v2355_v32 = vld [vmem:[#allocation11 + $0x7e8] sm:$0xff] }
 0x292   :  { %v1795_v34 = vld [vmem:[#allocation1 + $0x7] ss:$9 sm:$0xff] }
 0x293   :  { %1798 = vst.msk [vmem:[#allocation2 + $0x40] ss:$8 sm:$0xf] %vm4495_vm10, %v1795_v34  ;;  %v1842_v53 = vld [vmem:[#allocation2 + $0x60] sm:$0x7] }
 0x294   :  { %v1843_v8 = vld [vmem:[#allocation2 + $0x68] sm:$0x7]  ;;  %v1844_v28 = vld [vmem:[#allocation2 + $0x70] sm:$0x7]  ;;  %v1845_v15 = vld [vmem:[#allocation2 + $0x78] sm:$0x7] }
 0x295   :  { %v4682_v30 = vrot.slane %v1842_v53, 1  ;;  %v4684_v56 = vrot.slane %v1843_v8, 1  ;;  %v2215_v34 = vld [vmem:[#allocation11 + $0x388] sm:$0xff]  ;;  %v4686_v45 = vrot.slane %v1844_v28, 1  ;;  %v4688_v60 = vrot.slane %v1845_v15, 1  ;;  %v2261_v28 = vld [vmem:[#allocation11 + $0x4f8] sm:$0xff] }
 0x296   :  { %v2103_v53 = vld [vmem:[#allocation11 + $0x8] sm:$0xff]  ;;  %v2293_v15 = vld [vmem:[#allocation11 + $0x5f8] sm:$0xff] }
 0x297   :  { %v2167_v8 = vld [vmem:[#allocation11 + $0x208] sm:$0xff] }
 0x29a   :  { %v1838_v2 = vld [vmem:[#allocation2 + $0x40] sm:$0x7]  ;;  %v1839_v33 = vld [vmem:[#allocation2 + $0x48] sm:$0x7]  ;;  %v1840_v5 = vld [vmem:[#allocation2 + $0x50] sm:$0x7] }
 0x29b   :  { %v4650_v35 = vrot.slane %v1838_v2, 1  ;;  %v4652_v43 = vrot.slane %v1839_v33, 1  ;;  %v4654_v46 = vrot.slane %v1840_v5, 1  ;;  %v1841_v49 = vld [vmem:[#allocation2 + $0x58] sm:$0x7]  ;;  %v4692_v2 = vsel %vm717_vm0, %v2386_v17, %v4682_v30  ;;  %v2117_v5 = vld [vmem:[#allocation11 + $0x78] sm:$0xff] }
 0x29c   :  { %v4656_v11 = vrot.slane %v1841_v49, 1  ;;  %v2321_v17 = vld [vmem:[#allocation11 + $0x6d8] sm:$0xff] }
 0x29d   :  { %v4660_v57 = vsel %vm717_vm0, %v2374_v20, %v4650_v35  ;;  %v4664_v1 = vsel %vm717_vm0, %v2377_v54, %v4652_v43  ;;  %v4668_v10 = vsel %vm717_vm0, %v2380_v50, %v4654_v46  ;;  %v2389_v20 = vrot.slane %v1835_v52, 1  ;;  %v2149_v50 = vld [vmem:[#allocation11 + $0x178] sm:$0xff]  ;;  %v2135_v52 = vld [vmem:[#allocation11 + $0x108] sm:$0xff] }
 0x29e   :  { %2430 = vmatmul.f32.vlgmr.msra.gmra.mxu0 %v4660_v57  ;;  %2453 = vmatmul.f32.vlgmr.msra.gmra.mxu1 %v4664_v1  ;;  %v4674_v51 = vsel %vm717_vm0, %v2383_v6, %v4656_v11  ;;  %v2392_v54 = vrot.slane %v1836_v18, 1  ;;  %v4706_v6 = vsel %vm717_vm0, %v2395_v24, %v4688_v60  ;;  %v2259_v18 = vld [vmem:[#allocation11 + $0x4e8] sm:$0xff] }
 0x29f   :  { %2476 = vmatmul.f32.vlgmr.msra.gmra.mxu2 %v4668_v10  ;;  %2499 = vmatmul.f32.vlgmr.msra.gmra.mxu3 %v4674_v51  ;;  %v4696_v33 = vsel %vm717_vm0, %v2389_v20, %v4684_v56  ;;  %v2353_v20 = vld [vmem:[#allocation11 + $0x7d8] sm:$0xff]  ;;  %v2287_v24 = vld [vmem:[#allocation11 + $0x5c8] sm:$0xff] }
 0x2a0   :  { %2598 = vmatpush.msra.mxu0 %v2133_v55  ;;  %2621 = vmatpush.msra.mxu1 %v2165_v0  ;;  %v4702_v49 = vsel %vm717_vm0, %v2392_v54, %v4686_v45  ;;  %v2181_v55 = vld [vmem:[#allocation11 + $0x278] sm:$0xff]  ;;  %v2255_v54 = vld [vmem:[#allocation11 + $0x4c8] sm:$0xff] }
 0x2a1   :  { %2644 = vmatpush.msra.mxu2 %v2197_v12  ;;  %2667 = vmatpush.msra.mxu3 %v2229_v41  ;;  %v2213_v0 = vld [vmem:[#allocation11 + $0x378] sm:$0xff]  ;;  %v2115_v12 = vld [vmem:[#allocation11 + $0x68] sm:$0xff] }
 0x2a2   :  { %2599 = vmatpush.msra.mxu0 %v2131_v27  ;;  %2622 = vmatpush.msra.mxu1 %v2163_v37  ;;  %v2147_v41 = vld [vmem:[#allocation11 + $0x168] sm:$0xff] }
 0x2a3   :  { %2645 = vmatpush.msra.mxu2 %v2195_v63  ;;  %2668 = vmatpush.msra.mxu3 %v2227_v31  ;;  %v2179_v27 = vld [vmem:[#allocation11 + $0x268] sm:$0xff]  ;;  %v2113_v63 = vld [vmem:[#allocation11 + $0x58] sm:$0xff] }
 0x2a4   :  { %2600 = vmatpush.msra.mxu0 %v2129_v19  ;;  %2623 = vmatpush.msra.mxu1 %v2161_v59  ;;  %v2211_v37 = vld [vmem:[#allocation11 + $0x368] sm:$0xff]  ;;  %v2145_v31 = vld [vmem:[#allocation11 + $0x158] sm:$0xff] }
 0x2a5   :  { %2646 = vmatpush.msra.mxu2 %v2193_v14  ;;  %2669 = vmatpush.msra.mxu3 %v2225_v9  ;;  %v2177_v19 = vld [vmem:[#allocation11 + $0x258] sm:$0xff]  ;;  %v2111_v14 = vld [vmem:[#allocation11 + $0x48] sm:$0xff] }
 0x2a6   :  { %2601 = vmatpush.msra.mxu0 %v2127_v42  ;;  %2624 = vmatpush.msra.mxu1 %v2159_v48  ;;  %v2209_v59 = vld [vmem:[#allocation11 + $0x358] sm:$0xff]  ;;  %v2143_v9 = vld [vmem:[#allocation11 + $0x148] sm:$0xff] }
 0x2a7   :  { %2647 = vmatpush.msra.mxu2 %v2191_v61  ;;  %2670 = vmatpush.msra.mxu3 %v2223_v47  ;;  %v2175_v42 = vld [vmem:[#allocation11 + $0x248] sm:$0xff]  ;;  %v2109_v61 = vld [vmem:[#allocation11 + $0x38] sm:$0xff] }
 0x2a8   :  { %2433 = vmatmul.f32.gmra.mxu0 %v4650_v35  ;;  %2456 = vmatmul.f32.gmra.mxu1 %v4652_v43  ;;  %v2207_v48 = vld [vmem:[#allocation11 + $0x348] sm:$0xff]  ;;  %v2141_v47 = vld [vmem:[#allocation11 + $0x138] sm:$0xff] }
 0x2a9   :  { %2479 = vmatmul.f32.gmra.mxu2 %v4654_v46  ;;  %2502 = vmatmul.f32.gmra.mxu3 %v4656_v11 }
 0x2aa   :  { %2602 = vmatpush.msra.mxu0 %v2125_v44  ;;  %2625 = vmatpush.msra.mxu1 %v2157_v16  ;;  %v2173_v44 = vld [vmem:[#allocation11 + $0x238] sm:$0xff] }
 0x2ab   :  { %2648 = vmatpush.msra.mxu2 %v2189_v29  ;;  %2671 = vmatpush.msra.mxu3 %v2221_v22  ;;  %v2205_v16 = vld [vmem:[#allocation11 + $0x338] sm:$0xff]  ;;  %v2107_v29 = vld [vmem:[#allocation11 + $0x28] sm:$0xff] }
 0x2ac   :  { %2603 = vmatpush.msra.mxu0 %v2123_v21  ;;  %2626 = vmatpush.msra.mxu1 %v2155_v38  ;;  %v2139_v22 = vld [vmem:[#allocation11 + $0x128] sm:$0xff] }
 0x2ad   :  { %2649 = vmatpush.msra.mxu2 %v2187_v25  ;;  %2672 = vmatpush.msra.mxu3 %v2219_v36  ;;  %v2171_v21 = vld [vmem:[#allocation11 + $0x228] sm:$0xff]  ;;  %v2105_v25 = vld [vmem:[#allocation11 + $0x18] sm:$0xff] }
 0x2ae   :  { %2604 = vmatpush.msra.mxu0 %v2121_v26  ;;  %2627 = vmatpush.msra.mxu1 %v2153_v4  ;;  %v2203_v38 = vld [vmem:[#allocation11 + $0x328] sm:$0xff]  ;;  %v2137_v36 = vld [vmem:[#allocation11 + $0x118] sm:$0xff] }
 0x2af   :  { %2650 = vmatpush.msra.mxu2 %v2185_v62  ;;  %2673 = vmatpush.msra.mxu3 %v2217_v40  ;;  %v2169_v26 = vld [vmem:[#allocation11 + $0x218] sm:$0xff]  ;;  %v2199_v4 = vld [vmem:[#allocation11 + $0x308] sm:$0xff] }
 0x2b0   :  { %2605 = vmatpush.msra.mxu0 %v2119_v23  ;;  %2628 = vmatpush.msra.mxu1 %v2151_v7  ;;  %v2325_v62 = vld [vmem:[#allocation11 + $0x6f8] sm:$0xff]  ;;  %v2291_v23 = vld [vmem:[#allocation11 + $0x5e8] sm:$0xff] }
 0x2b1   :  { %2651 = vmatpush.msra.mxu2 %v2183_v39  ;;  %2674 = vmatpush.msra.mxu3 %v2215_v34  ;;  %v2357_v40 = vld [vmem:[#allocation11 + $0x7f8] sm:$0xff]  ;;  %v2323_v7 = vld [vmem:[#allocation11 + $0x6e8] sm:$0xff] }
 0x2b2   :  { %2522 = vmatmul.f32.vlgmr.msrb.gmra.mxu0 %v4692_v2  ;;  %2545 = vmatmul.f32.vlgmr.msrb.gmra.mxu1 %v4696_v33  ;;  %v2257_v39 = vld [vmem:[#allocation11 + $0x4d8] sm:$0xff] }
 0x2b3   :  { %2568 = vmatmul.f32.vlgmr.msrb.gmra.mxu2 %v4702_v49  ;;  %2591 = vmatmul.f32.vlgmr.msrb.gmra.mxu3 %v4706_v6  ;;  %v2289_v34 = vld [vmem:[#allocation11 + $0x5d8] sm:$0xff] }
 0x2b4   :  { %2606 = vmatpush.msra.mxu0 %v2117_v5  ;;  %2629 = vmatpush.msra.mxu1 %v2149_v50  ;;  %v2253_v5 = vld [vmem:[#allocation11 + $0x4b8] sm:$0xff] }
 0x2b5   :  { %2652 = vmatpush.msra.mxu2 %v2181_v55  ;;  %2675 = vmatpush.msra.mxu3 %v2213_v0  ;;  %v2349_v50 = vld [vmem:[#allocation11 + $0x7b8] sm:$0xff]  ;;  %v2251_v55 = vld [vmem:[#allocation11 + $0x4a8] sm:$0xff] }
 0x2b6   :  { %2607 = vmatpush.msra.mxu0 %v2115_v12  ;;  %2630 = vmatpush.msra.mxu1 %v2147_v41  ;;  %v2283_v0 = vld [vmem:[#allocation11 + $0x5a8] sm:$0xff] }
 0x2b7   :  { %2653 = vmatpush.msra.mxu2 %v2179_v27  ;;  %2676 = vmatpush.msra.mxu3 %v2211_v37  ;;  %v2315_v12 = vld [vmem:[#allocation11 + $0x6a8] sm:$0xff]  ;;  %v2249_v27 = vld [vmem:[#allocation11 + $0x498] sm:$0xff] }
 0x2b8   :  { %2608 = vmatpush.msra.mxu0 %v2113_v63  ;;  %2631 = vmatpush.msra.mxu1 %v2145_v31  ;;  %v2347_v41 = vld [vmem:[#allocation11 + $0x7a8] sm:$0xff]  ;;  %v2281_v37 = vld [vmem:[#allocation11 + $0x598] sm:$0xff] }
 0x2b9   :  { %2654 = vmatpush.msra.mxu2 %v2177_v19  ;;  %2677 = vmatpush.msra.mxu3 %v2209_v59  ;;  %v2313_v63 = vld [vmem:[#allocation11 + $0x698] sm:$0xff]  ;;  %v2247_v19 = vld [vmem:[#allocation11 + $0x488] sm:$0xff] }
 0x2ba   :  { %2609 = vmatpush.msra.mxu0 %v2111_v14  ;;  %2632 = vmatpush.msra.mxu1 %v2143_v9  ;;  %v2345_v31 = vld [vmem:[#allocation11 + $0x798] sm:$0xff]  ;;  %v2279_v59 = vld [vmem:[#allocation11 + $0x588] sm:$0xff] }
 0x2bb   :  { %2655 = vmatpush.msra.mxu2 %v2175_v42  ;;  %2678 = vmatpush.msra.mxu3 %v2207_v48  ;;  %v2245_v14 = vld [vmem:[#allocation11 + $0x478] sm:$0xff]  ;;  %v2243_v42 = vld [vmem:[#allocation11 + $0x468] sm:$0xff] }
 0x2bc   :  { %2525 = vmatmul.f32.gmra.mxu0 %v4682_v30  ;;  %2548 = vmatmul.f32.gmra.mxu1 %v4684_v56  ;;  %v2341_v9 = vld [vmem:[#allocation11 + $0x778] sm:$0xff]  ;;  %v2275_v48 = vld [vmem:[#allocation11 + $0x568] sm:$0xff] }
 0x2bd   :  { %2571 = vmatmul.f32.gmra.mxu2 %v4686_v45  ;;  %2594 = vmatmul.f32.gmra.mxu3 %v4688_v60 }
 0x2be   :  { %2610 = vmatpush.msra.mxu0 %v2109_v61  ;;  %2633 = vmatpush.msra.mxu1 %v2141_v47  ;;  %v2307_v61 = vld [vmem:[#allocation11 + $0x668] sm:$0xff] }
 0x2bf   :  { %2656 = vmatpush.msra.mxu2 %v2173_v44  ;;  %2679 = vmatpush.msra.mxu3 %v2205_v16  ;;  %v2339_v47 = vld [vmem:[#allocation11 + $0x768] sm:$0xff]  ;;  %v2241_v44 = vld [vmem:[#allocation11 + $0x458] sm:$0xff] }
 0x2c0   :  { %2611 = vmatpush.msra.mxu0 %v2107_v29  ;;  %2634 = vmatpush.msra.mxu1 %v2139_v22  ;;  %v2273_v16 = vld [vmem:[#allocation11 + $0x558] sm:$0xff] }
 0x2c1   :  { %2657 = vmatpush.msra.mxu2 %v2171_v21  ;;  %2680 = vmatpush.msra.mxu3 %v2203_v38  ;;  %v2305_v29 = vld [vmem:[#allocation11 + $0x658] sm:$0xff]  ;;  %v2239_v21 = vld [vmem:[#allocation11 + $0x448] sm:$0xff] }
 0x2c2   :  { %2612 = vmatpush.msra.mxu0 %v2105_v25  ;;  %2635 = vmatpush.msra.mxu1 %v2137_v36  ;;  %v2337_v22 = vld [vmem:[#allocation11 + $0x758] sm:$0xff]  ;;  %v2271_v38 = vld [vmem:[#allocation11 + $0x548] sm:$0xff] }
 0x2c3   :  { %2658 = vmatpush.msra.mxu2 %v2169_v26  ;;  %2681 = vmatpush.msra.mxu3 %v2201_v3  ;;  %v2303_v25 = vld [vmem:[#allocation11 + $0x648] sm:$0xff]  ;;  %v2237_v26 = vld [vmem:[#allocation11 + $0x438] sm:$0xff] }
 0x2c4   :  { %2613 = vmatpush.msra.mxu0 %v2103_v53  ;;  %2636 = vmatpush.msra.mxu1 %v2135_v52  ;;  %v2335_v36 = vld [vmem:[#allocation11 + $0x748] sm:$0xff]  ;;  %v2269_v3 = vld [vmem:[#allocation11 + $0x538] sm:$0xff] }
 0x2c5   :  { %2659 = vmatpush.msra.mxu2 %v2167_v8  ;;  %2682 = vmatpush.msra.mxu3 %v2199_v4  ;;  %v2301_v53 = vld [vmem:[#allocation11 + $0x638] sm:$0xff]  ;;  %v2235_v8 = vld [vmem:[#allocation11 + $0x428] sm:$0xff] }
 0x2c6   :  { %2690 = vmatpush.msrb.mxu0 %v2261_v28  ;;  %2713 = vmatpush.msrb.mxu1 %v2293_v15  ;;  %v2333_v52 = vld [vmem:[#allocation11 + $0x738] sm:$0xff]  ;;  %v2267_v4 = vld [vmem:[#allocation11 + $0x528] sm:$0xff] }
 0x2c7   :  { %2736 = vmatpush.msrb.mxu2 %v2325_v62  ;;  %2759 = vmatpush.msrb.mxu3 %v2357_v40  ;;  %v2299_v28 = vld [vmem:[#allocation11 + $0x628] sm:$0xff]  ;;  %v2233_v62 = vld [vmem:[#allocation11 + $0x418] sm:$0xff] }
 0x2c8   :  { %2614 = vmatmul.f32.vlgmr.msra.gmra.mxu0 %v4660_v57  ;;  %2637 = vmatmul.f32.vlgmr.msra.gmra.mxu1 %v4664_v1  ;;  %v2319_v57 = vld [vmem:[#allocation11 + $0x6c8] sm:$0xff]  ;;  %v2265_v40 = vld [vmem:[#allocation11 + $0x518] sm:$0xff] }
 0x2c9   :  { %2660 = vmatmul.f32.vlgmr.msra.gmra.mxu2 %v4668_v10  ;;  %2683 = vmatmul.f32.vlgmr.msra.gmra.mxu3 %v4674_v51  ;;  %v2351_v1 = vld [vmem:[#allocation11 + $0x7c8] sm:$0xff]  ;;  %v2285_v10 = vld [vmem:[#allocation11 + $0x5b8] sm:$0xff] }
 0x2ca   :  { %2691 = vmatpush.msrb.mxu0 %v2259_v18  ;;  %2714 = vmatpush.msrb.mxu1 %v2291_v23  ;;  %v2317_v51 = vld [vmem:[#allocation11 + $0x6b8] sm:$0xff]  ;;  %v2331_v15 = vld [vmem:[#allocation11 + $0x728] sm:$0xff] }
 0x2cb   :  { %2737 = vmatpush.msrb.mxu2 %v2323_v7  ;;  %2760 = vmatpush.msrb.mxu3 %v2355_v32  ;;  %v2297_v18 = vld [vmem:[#allocation11 + $0x618] sm:$0xff]  ;;  %v2231_v7 = vld [vmem:[#allocation11 + $0x408] sm:$0xff] }
 0x2cc   :  { %2692 = vmatpush.msrb.mxu0 %v2257_v39  ;;  %2715 = vmatpush.msrb.mxu1 %v2289_v34  ;;  %v2329_v23 = vld [vmem:[#allocation11 + $0x718] sm:$0xff]  ;;  %v2263_v32 = vld [vmem:[#allocation11 + $0x508] sm:$0xff] }
 0x2cd   :  { %2738 = vmatpush.msrb.mxu2 %v2321_v17  ;;  %2761 = vmatpush.msrb.mxu3 %v2353_v20  ;;  %v2295_v39 = vld [vmem:[#allocation11 + $0x608] sm:$0xff]  ;;  %v1876_v17 = vld [vmem:[#allocation10 + $0xf0] sm:$0xff] }
 0x2ce   :  { %2693 = vmatpush.msrb.mxu0 %v2255_v54  ;;  %2716 = vmatpush.msrb.mxu1 %v2287_v24  ;;  %v2327_v34 = vld [vmem:[#allocation11 + $0x708] sm:$0xff]  ;;  %v1908_v20 = vld [vmem:[#allocation10 + $0x1f0] sm:$0xff] }
 0x2cf   :  { %2739 = vmatpush.msrb.mxu2 %v2319_v57  ;;  %2762 = vmatpush.msrb.mxu3 %v2351_v1  ;;  %v1940_v54 = vld [vmem:[#allocation10 + $0x2f0] sm:$0xff]  ;;  %v1874_v57 = vld [vmem:[#allocation10 + $0xe0] sm:$0xff] }
 0x2d0   :  { %2694 = vmatpush.msrb.mxu0 %v2253_v5  ;;  %2717 = vmatpush.msrb.mxu1 %v2285_v10  ;;  %v1972_v24 = vld [vmem:[#allocation10 + $0x3f0] sm:$0xff]  ;;  %v1906_v1 = vld [vmem:[#allocation10 + $0x1e0] sm:$0xff] }
 0x2d1   :  { %2740 = vmatpush.msrb.mxu2 %v2317_v51  ;;  %2763 = vmatpush.msrb.mxu3 %v2349_v50  ;;  %v1938_v5 = vld [vmem:[#allocation10 + $0x2e0] sm:$0xff]  ;;  %v1872_v51 = vld [vmem:[#allocation10 + $0xd0] sm:$0xff] }
 0x2d2   :  { %2617 = vmatmul.f32.gmra.mxu0 %v4650_v35  ;;  %2640 = vmatmul.f32.gmra.mxu1 %v4652_v43  ;;  %v2311_v35 = vld [vmem:[#allocation11 + $0x688] sm:$0xff]  ;;  %v1970_v10 = vld [vmem:[#allocation10 + $0x3e0] sm:$0xff]  ;;  %v1904_v50 = vld [vmem:[#allocation10 + $0x1d0] sm:$0xff] }
 0x2d3   :  { %2663 = vmatmul.f32.gmra.mxu2 %v4654_v46  ;;  %2686 = vmatmul.f32.gmra.mxu3 %v4656_v11  ;;  %v2343_v43 = vld [vmem:[#allocation11 + $0x788] sm:$0xff]  ;;  %v2277_v46 = vld [vmem:[#allocation11 + $0x578] sm:$0xff] }
 0x2d4   :  { %2695 = vmatpush.msrb.mxu0 %v2251_v55  ;;  %2718 = vmatpush.msrb.mxu1 %v2283_v0  ;;  %v2309_v11 = vld [vmem:[#allocation11 + $0x678] sm:$0xff]  ;;  %v1870_v55 = vld [vmem:[#allocation10 + $0xc0] sm:$0xff] }
 0x2d5   :  { %2741 = vmatpush.msrb.mxu2 %v2315_v12  ;;  %2764 = vmatpush.msrb.mxu3 %v2347_v41  ;;  %v1966_v0 = vld [vmem:[#allocation10 + $0x3c0] sm:$0xff]  ;;  %v1868_v12 = vld [vmem:[#allocation10 + $0xb0] sm:$0xff] }
 0x2d6   :  { %2696 = vmatpush.msrb.mxu0 %v2249_v27  ;;  %2719 = vmatpush.msrb.mxu1 %v2281_v37  ;;  %v1900_v41 = vld [vmem:[#allocation10 + $0x1b0] sm:$0xff] }
 0x2d7   :  { %2742 = vmatpush.msrb.mxu2 %v2313_v63  ;;  %2765 = vmatpush.msrb.mxu3 %v2345_v31  ;;  %v1932_v27 = vld [vmem:[#allocation10 + $0x2b0] sm:$0xff]  ;;  %v1866_v63 = vld [vmem:[#allocation10 + $0xa0] sm:$0xff] }
 0x2d8   :  { %2697 = vmatpush.msrb.mxu0 %v2247_v19  ;;  %2720 = vmatpush.msrb.mxu1 %v2279_v59  ;;  %v1964_v37 = vld [vmem:[#allocation10 + $0x3b0] sm:$0xff]  ;;  %v1898_v31 = vld [vmem:[#allocation10 + $0x1a0] sm:$0xff] }
 0x2d9   :  { %2743 = vmatpush.msrb.mxu2 %v2311_v35  ;;  %2766 = vmatpush.msrb.mxu3 %v2343_v43  ;;  %v1930_v19 = vld [vmem:[#allocation10 + $0x2a0] sm:$0xff]  ;;  %v1864_v35 = vld [vmem:[#allocation10 + $0x90] sm:$0xff] }
 0x2da   :  { %2698 = vmatpush.msrb.mxu0 %v2245_v14  ;;  %2721 = vmatpush.msrb.mxu1 %v2277_v46  ;;  %v1962_v59 = vld [vmem:[#allocation10 + $0x3a0] sm:$0xff]  ;;  %v1896_v43 = vld [vmem:[#allocation10 + $0x190] sm:$0xff] }
 0x2db   :  { %2744 = vmatpush.msrb.mxu2 %v2309_v11  ;;  %2767 = vmatpush.msrb.mxu3 %v2341_v9  ;;  %v1862_v14 = vld [vmem:[#allocation10 + $0x80] sm:$0xff]  ;;  %v1860_v11 = vld [vmem:[#allocation10 + $0x70] sm:$0xff] }
 0x2dc   :  { %2699 = vmatpush.msrb.mxu0 %v2243_v42  ;;  %2722 = vmatpush.msrb.mxu1 %v2275_v48  ;;  %v1958_v46 = vld [vmem:[#allocation10 + $0x380] sm:$0xff]  ;;  %v1892_v9 = vld [vmem:[#allocation10 + $0x170] sm:$0xff] }
 0x2dd   :  { %2745 = vmatpush.msrb.mxu2 %v2307_v61  ;;  %2768 = vmatpush.msrb.mxu3 %v2339_v47  ;;  %v1924_v42 = vld [vmem:[#allocation10 + $0x270] sm:$0xff]  ;;  %v1858_v61 = vld [vmem:[#allocation10 + $0x60] sm:$0xff] }
 0x2de   :  { %2700 = vmatpush.msrb.mxu0 %v2241_v44  ;;  %2723 = vmatpush.msrb.mxu1 %v2273_v16  ;;  %v1956_v48 = vld [vmem:[#allocation10 + $0x370] sm:$0xff]  ;;  %v1890_v47 = vld [vmem:[#allocation10 + $0x160] sm:$0xff] }
 0x2df   :  { %2746 = vmatpush.msrb.mxu2 %v2305_v29  ;;  %2769 = vmatpush.msrb.mxu3 %v2337_v22  ;;  %v1922_v44 = vld [vmem:[#allocation10 + $0x260] sm:$0xff]  ;;  %v1856_v29 = vld [vmem:[#allocation10 + $0x50] sm:$0xff] }
 0x2e0   :  { %2701 = vmatpush.msrb.mxu0 %v2239_v21  ;;  %2724 = vmatpush.msrb.mxu1 %v2271_v38  ;;  %v1954_v16 = vld [vmem:[#allocation10 + $0x360] sm:$0xff]  ;;  %v1888_v22 = vld [vmem:[#allocation10 + $0x150] sm:$0xff] }
 0x2e1   :  { %2747 = vmatpush.msrb.mxu2 %v2303_v25  ;;  %2770 = vmatpush.msrb.mxu3 %v2335_v36  ;;  %v1920_v21 = vld [vmem:[#allocation10 + $0x250] sm:$0xff]  ;;  %v1854_v25 = vld [vmem:[#allocation10 + $0x40] sm:$0xff] }
 0x2e2   :  { %2702 = vmatpush.msrb.mxu0 %v2237_v26  ;;  %2725 = vmatpush.msrb.mxu1 %v2269_v3  ;;  %v1952_v38 = vld [vmem:[#allocation10 + $0x350] sm:$0xff]  ;;  %v1886_v36 = vld [vmem:[#allocation10 + $0x140] sm:$0xff] }
 0x2e3   :  { %2748 = vmatpush.msrb.mxu2 %v2301_v53  ;;  %2771 = vmatpush.msrb.mxu3 %v2333_v52  ;;  %v1918_v26 = vld [vmem:[#allocation10 + $0x240] sm:$0xff]  ;;  %v1852_v53 = vld [vmem:[#allocation10 + $0x30] sm:$0xff] }
 0x2e4   :  { %2703 = vmatpush.msrb.mxu0 %v2235_v8  ;;  %2726 = vmatpush.msrb.mxu1 %v2267_v4  ;;  %v1950_v3 = vld [vmem:[#allocation10 + $0x340] sm:$0xff]  ;;  %v1884_v52 = vld [vmem:[#allocation10 + $0x130] sm:$0xff] }
 0x2e5   :  { %2749 = vmatpush.msrb.mxu2 %v2299_v28  ;;  %2772 = vmatpush.msrb.mxu3 %v2331_v15  ;;  %v1916_v8 = vld [vmem:[#allocation10 + $0x230] sm:$0xff]  ;;  %v1850_v28 = vld [vmem:[#allocation10 + $0x20] sm:$0xff] }
 0x2e6   :  { %2704 = vmatpush.msrb.mxu0 %v2233_v62  ;;  %2727 = vmatpush.msrb.mxu1 %v2265_v40  ;;  %v1948_v4 = vld [vmem:[#allocation10 + $0x330] sm:$0xff]  ;;  %v1882_v15 = vld [vmem:[#allocation10 + $0x120] sm:$0xff] }
 0x2e7   :  { %2750 = vmatpush.msrb.mxu2 %v2297_v18  ;;  %2773 = vmatpush.msrb.mxu3 %v2329_v23  ;;  %v1914_v62 = vld [vmem:[#allocation10 + $0x220] sm:$0xff]  ;;  %v1848_v18 = vld [vmem:[#allocation10 + $0x10] sm:$0xff] }
 0x2e8   :  { %2705 = vmatpush.msrb.mxu0 %v2231_v7  ;;  %2728 = vmatpush.msrb.mxu1 %v2263_v32  ;;  %v1946_v40 = vld [vmem:[#allocation10 + $0x320] sm:$0xff]  ;;  %v1880_v23 = vld [vmem:[#allocation10 + $0x110] sm:$0xff] }
 0x2e9   :  { %2751 = vmatpush.msrb.mxu2 %v2295_v39  ;;  %2774 = vmatpush.msrb.mxu3 %v2327_v34  ;;  %v1912_v7 = vld [vmem:[#allocation10 + $0x210] sm:$0xff]  ;;  %v1846_v39 = vld [vmem:[#allocation10] sm:$0xff] }
 0x2ea   :  { %2706 = vmatmul.f32.vlgmr.msrb.gmra.mxu0 %v4692_v2  ;;  %2729 = vmatmul.f32.vlgmr.msrb.gmra.mxu1 %v4696_v33  ;;  %v1936_v2 = vld [vmem:[#allocation10 + $0x2d0] sm:$0xff]  ;;  %v1878_v34 = vld [vmem:[#allocation10 + $0x100] sm:$0xff] }
 0x2eb   :  { %2752 = vmatmul.f32.vlgmr.msrb.gmra.mxu2 %v4702_v49  ;;  %2775 = vmatmul.f32.vlgmr.msrb.gmra.mxu3 %v4706_v6  ;;  %v1968_v33 = vld [vmem:[#allocation10 + $0x3d0] sm:$0xff]  ;;  %v1902_v49 = vld [vmem:[#allocation10 + $0x1c0] sm:$0xff] }
 0x2ec   :  { %2782 = vmatpush.msra.mxu0 %v1876_v17  ;;  %2805 = vmatpush.msra.mxu1 %v1908_v20  ;;  %v1934_v6 = vld [vmem:[#allocation10 + $0x2c0] sm:$0xff]  ;;  %v1944_v32 = vld [vmem:[#allocation10 + $0x310] sm:$0xff] }
 0x2ed   :  { %2828 = vmatpush.msra.mxu2 %v1940_v54  ;;  %2851 = vmatpush.msra.mxu3 %v1972_v24  ;;  %v1910_v17 = vld [vmem:[#allocation10 + $0x200] sm:$0xff]  ;;  %v4730_v54 = vld [vmem:[#allocation2] sm:$0xff]  ;;  %v4732_v24 = vld [vmem:[#allocation2 + $0x8] sm:$0xff] }
 0x2ee   :  { %2783 = vmatpush.msra.mxu0 %v1874_v57  ;;  %2806 = vmatpush.msra.mxu1 %v1906_v1  ;;  %v1942_v20 = vld [vmem:[#allocation10 + $0x300] sm:$0xff]  ;;  %v2004_v1 = vld [vmem:[#allocation10 + $0x4f0] sm:$0xff] }
 0x2ef   :  { %2829 = vmatpush.msra.mxu2 %v1938_v5  ;;  %2852 = vmatpush.msra.mxu3 %v1970_v10  ;;  %v4734_v57 = vld [vmem:[#allocation2 + $0x10] sm:$0xff]  ;;  %v2036_v5 = vld [vmem:[#allocation10 + $0x5f0] sm:$0xff]  ;;  %v4738_v10 = vld [vmem:[#allocation2 + $0x18] sm:$0xff] }
 0x2f0   :  { %2784 = vmatpush.msra.mxu0 %v1872_v51  ;;  %2807 = vmatpush.msra.mxu1 %v1904_v50  ;;  %v2068_v51 = vld [vmem:[#allocation10 + $0x6f0] sm:$0xff] }
 0x2f1   :  { %2830 = vmatpush.msra.mxu2 %v1936_v2  ;;  %2853 = vmatpush.msra.mxu3 %v1968_v33  ;;  %v2100_v50 = vld [vmem:[#allocation10 + $0x7f0] sm:$0xff]  ;;  %v2002_v2 = vld [vmem:[#allocation10 + $0x4e0] sm:$0xff] }
 0x2f2   :  { %2785 = vmatpush.msra.mxu0 %v1870_v55  ;;  %2808 = vmatpush.msra.mxu1 %v1902_v49  ;;  %v2034_v33 = vld [vmem:[#allocation10 + $0x5e0] sm:$0xff] }
 0x2f3   :  { %2831 = vmatpush.msra.mxu2 %v1934_v6  ;;  %2854 = vmatpush.msra.mxu3 %v1966_v0  ;;  %v2066_v55 = vld [vmem:[#allocation10 + $0x6e0] sm:$0xff]  ;;  %v2000_v6 = vld [vmem:[#allocation10 + $0x4d0] sm:$0xff] }
 0x2f4   :  { %2709 = vmatmul.f32.gmra.mxu0 %v4682_v30  ;;  %2732 = vmatmul.f32.gmra.mxu1 %v4684_v56  ;;  %v1928_v30 = vld [vmem:[#allocation10 + $0x290] sm:$0xff]  ;;  %v2098_v49 = vld [vmem:[#allocation10 + $0x7e0] sm:$0xff] }
 0x2f5   :  { %2755 = vmatmul.f32.gmra.mxu2 %v4686_v45  ;;  %2778 = vmatmul.f32.gmra.mxu3 %v4688_v60  ;;  %v1960_v56 = vld [vmem:[#allocation10 + $0x390] sm:$0xff]  ;;  %v1894_v45 = vld [vmem:[#allocation10 + $0x180] sm:$0xff] }
 0x2f6   :  { %2786 = vmatpush.msra.mxu0 %v1868_v12  ;;  %2809 = vmatpush.msra.mxu1 %v1900_v41  ;;  %v1926_v60 = vld [vmem:[#allocation10 + $0x280] sm:$0xff]  ;;  %v2032_v0 = vld [vmem:[#allocation10 + $0x5d0] sm:$0xff] }
 0x2f7   :  { %2832 = vmatpush.msra.mxu2 %v1932_v27  ;;  %2855 = vmatpush.msra.mxu3 %v1964_v37  ;;  %v2064_v12 = vld [vmem:[#allocation10 + $0x6d0] sm:$0xff]  ;;  %v1998_v27 = vld [vmem:[#allocation10 + $0x4c0] sm:$0xff] }
 0x2f8   :  { %2787 = vmatpush.msra.mxu0 %v1866_v63  ;;  %2810 = vmatpush.msra.mxu1 %v1898_v31  ;;  %v2096_v41 = vld [vmem:[#allocation10 + $0x7d0] sm:$0xff]  ;;  %v2030_v37 = vld [vmem:[#allocation10 + $0x5c0] sm:$0xff] }
 0x2f9   :  { %2833 = vmatpush.msra.mxu2 %v1930_v19  ;;  %2856 = vmatpush.msra.mxu3 %v1962_v59  ;;  %v2062_v63 = vld [vmem:[#allocation10 + $0x6c0] sm:$0xff]  ;;  %v4742_v19 = vld [vmem:[#allocation2 + $0x40] sm:$0x3]  ;;  %v4744_v59 = vld [vmem:[#allocation2 + $0x48] sm:$0x3] }
 0x2fa   :  { %2788 = vmatpush.msra.mxu0 %v1864_v35  ;;  %2811 = vmatpush.msra.mxu1 %v1896_v43  ;;  %v2094_v31 = vld [vmem:[#allocation10 + $0x7c0] sm:$0xff]  ;;  %v1996_v43 = vld [vmem:[#allocation10 + $0x4b0] sm:$0xff] }
 0x2fb   :  { %2834 = vmatpush.msra.mxu2 %v1928_v30  ;;  %2857 = vmatpush.msra.mxu3 %v1960_v56  ;;  %v4746_v35 = vld [vmem:[#allocation2 + $0x50] sm:$0x3]  ;;  %v2028_v30 = vld [vmem:[#allocation10 + $0x5b0] sm:$0xff]  ;;  %v4750_v56 = vld [vmem:[#allocation2 + $0x58] sm:$0x3] }
 0x2fc   :  { %2789 = vmatpush.msra.mxu0 %v1862_v14  ;;  %2812 = vmatpush.msra.mxu1 %v1894_v45  ;;  %v2060_v14 = vld [vmem:[#allocation10 + $0x6b0] sm:$0xff] }
 0x2fd   :  { %2835 = vmatpush.msra.mxu2 %v1926_v60  ;;  %2858 = vmatpush.msra.mxu3 %v1958_v46  ;;  %v2092_v45 = vld [vmem:[#allocation10 + $0x7b0] sm:$0xff]  ;;  %v1994_v60 = vld [vmem:[#allocation10 + $0x4a0] sm:$0xff] }
 0x2fe   :  { %2790 = vmatpush.msra.mxu0 %v1860_v11  ;;  %2813 = vmatpush.msra.mxu1 %v1892_v9  ;;  %v2026_v46 = vld [vmem:[#allocation10 + $0x5a0] sm:$0xff] }
 0x2ff   :  { %2836 = vmatpush.msra.mxu2 %v1924_v42  ;;  %2859 = vmatpush.msra.mxu3 %v1956_v48  ;;  %v2058_v11 = vld [vmem:[#allocation10 + $0x6a0] sm:$0xff]  ;;  %v1992_v42 = vld [vmem:[#allocation10 + $0x490] sm:$0xff] }
 0x300   :  { %2791 = vmatpush.msra.mxu0 %v1858_v61  ;;  %2814 = vmatpush.msra.mxu1 %v1890_v47  ;;  %v2090_v9 = vld [vmem:[#allocation10 + $0x7a0] sm:$0xff]  ;;  %v2024_v48 = vld [vmem:[#allocation10 + $0x590] sm:$0xff] }
 0x301   :  { %2837 = vmatpush.msra.mxu2 %v1922_v44  ;;  %2860 = vmatpush.msra.mxu3 %v1954_v16  ;;  %v2056_v44 = vld [vmem:[#allocation10 + $0x690] sm:$0xff] }
 0x302   :  { %2792 = vmatpush.msra.mxu0 %v1856_v29  ;;  %2815 = vmatpush.msra.mxu1 %v1888_v22  ;;  %v2088_v16 = vld [vmem:[#allocation10 + $0x790] sm:$0xff]  ;;  %v1990_v29 = vld [vmem:[#allocation10 + $0x480] sm:$0xff] }
 0x303   :  { %2838 = vmatpush.msra.mxu2 %v1920_v21  ;;  %2861 = vmatpush.msra.mxu3 %v1952_v38  ;;  %v2022_v22 = vld [vmem:[#allocation10 + $0x580] sm:$0xff] }
 0x304   :  { %2793 = vmatpush.msra.mxu0 %v1854_v25  ;;  %2816 = vmatpush.msra.mxu1 %v1886_v36  ;;  %v2054_v21 = vld [vmem:[#allocation10 + $0x680] sm:$0xff]  ;;  %v1988_v25 = vld [vmem:[#allocation10 + $0x470] sm:$0xff] }
 0x305   :  { %2839 = vmatpush.msra.mxu2 %v1918_v26  ;;  %2862 = vmatpush.msra.mxu3 %v1950_v3  ;;  %v2086_v38 = vld [vmem:[#allocation10 + $0x780] sm:$0xff]  ;;  %v2020_v36 = vld [vmem:[#allocation10 + $0x570] sm:$0xff] }
 0x306   :  { %2794 = vmatpush.msra.mxu0 %v1852_v53  ;;  %2817 = vmatpush.msra.mxu1 %v1884_v52  ;;  %v2052_v26 = vld [vmem:[#allocation10 + $0x670] sm:$0xff]  ;;  %v1986_v53 = vld [vmem:[#allocation10 + $0x460] sm:$0xff] }
 0x307   :  { %2840 = vmatpush.msra.mxu2 %v1916_v8  ;;  %2863 = vmatpush.msra.mxu3 %v1948_v4  ;;  %v2084_v3 = vld [vmem:[#allocation10 + $0x770] sm:$0xff]  ;;  %v2018_v52 = vld [vmem:[#allocation10 + $0x560] sm:$0xff] }
 0x308   :  { %2795 = vmatpush.msra.mxu0 %v1850_v28  ;;  %2818 = vmatpush.msra.mxu1 %v1882_v15  ;;  %v2050_v8 = vld [vmem:[#allocation10 + $0x660] sm:$0xff]  ;;  %v1984_v15 = vld [vmem:[#allocation10 + $0x450] sm:$0xff] }
 0x309   :  { %2841 = vmatpush.msra.mxu2 %v1914_v62  ;;  %2864 = vmatpush.msra.mxu3 %v1946_v40  ;;  %v2082_v4 = vld [vmem:[#allocation10 + $0x760] sm:$0xff]  ;;  %v2016_v62 = vld [vmem:[#allocation10 + $0x550] sm:$0xff] }
 0x30a   :  { %2796 = vmatpush.msra.mxu0 %v1848_v18  ;;  %2819 = vmatpush.msra.mxu1 %v1880_v23  ;;  %v2048_v40 = vld [vmem:[#allocation10 + $0x650] sm:$0xff] }
 0x30b   :  { %2842 = vmatpush.msra.mxu2 %v1912_v7  ;;  %2865 = vmatpush.msra.mxu3 %v1944_v32  ;;  %v2080_v18 = vld [vmem:[#allocation10 + $0x750] sm:$0xff]  ;;  %v1982_v7 = vld [vmem:[#allocation10 + $0x440] sm:$0xff] }
 0x30c   :  { %2797 = vmatpush.msra.mxu0 %v1846_v39  ;;  %2820 = vmatpush.msra.mxu1 %v1878_v34  ;;  %v2014_v32 = vld [vmem:[#allocation10 + $0x540] sm:$0xff] }
 0x30d   :  { %2843 = vmatpush.msra.mxu2 %v1910_v17  ;;  %2866 = vmatpush.msra.mxu3 %v1942_v20  ;;  %v2046_v17 = vld [vmem:[#allocation10 + $0x640] sm:$0xff] }
 0x30e   :  { %2798 = vmatmul.f32.vlgmr.msra.gmra.mxu0 %v4730_v54  ;;  %2821 = vmatmul.f32.vlgmr.msra.gmra.mxu1 %v4732_v24  ;;  %v2078_v20 = vld [vmem:[#allocation10 + $0x740] sm:$0xff] }
 0x30f   :  { %2844 = vmatmul.f32.vlgmr.msra.gmra.mxu2 %v4734_v57  ;;  %2867 = vmatmul.f32.vlgmr.msra.gmra.mxu3 %v4738_v10 }
 0x310   :  { %2874 = vmatpush.msrb.mxu0 %v2004_v1  ;;  %2897 = vmatpush.msrb.mxu1 %v2036_v5  ;;  %v1980_v5 = vld [vmem:[#allocation10 + $0x430] sm:$0xff] }
 0x311   :  { %2920 = vmatpush.msrb.mxu2 %v2068_v51  ;;  %2943 = vmatpush.msrb.mxu3 %v2100_v50  ;;  %v2012_v51 = vld [vmem:[#allocation10 + $0x530] sm:$0xff] }
 0x312   :  { %2875 = vmatpush.msrb.mxu0 %v2002_v2  ;;  %2898 = vmatpush.msrb.mxu1 %v2034_v33  ;;  %v2044_v50 = vld [vmem:[#allocation10 + $0x630] sm:$0xff]  ;;  %v1978_v33 = vld [vmem:[#allocation10 + $0x420] sm:$0xff] }
 0x313   :  { %2921 = vmatpush.msrb.mxu2 %v2066_v55  ;;  %2944 = vmatpush.msrb.mxu3 %v2098_v49  ;;  %v2076_v2 = vld [vmem:[#allocation10 + $0x730] sm:$0xff]  ;;  %v2010_v55 = vld [vmem:[#allocation10 + $0x520] sm:$0xff] }
 0x314   :  { %2876 = vmatpush.msrb.mxu0 %v2000_v6  ;;  %2899 = vmatpush.msrb.mxu1 %v2032_v0  ;;  %v2042_v49 = vld [vmem:[#allocation10 + $0x620] sm:$0xff]  ;;  %v1976_v0 = vld [vmem:[#allocation10 + $0x410] sm:$0xff] }
 0x315   :  { %2922 = vmatpush.msrb.mxu2 %v2064_v12  ;;  %2945 = vmatpush.msrb.mxu3 %v2096_v41  ;;  %v2074_v6 = vld [vmem:[#allocation10 + $0x720] sm:$0xff]  ;;  %v2008_v12 = vld [vmem:[#allocation10 + $0x510] sm:$0xff] }
 0x316   :  { %2877 = vmatpush.msrb.mxu0 %v1998_v27  ;;  %2900 = vmatpush.msrb.mxu1 %v2030_v37  ;;  %v2040_v41 = vld [vmem:[#allocation10 + $0x610] sm:$0xff] }
 0x317   :  { %2923 = vmatpush.msrb.mxu2 %v2062_v63  ;;  %2946 = vmatpush.msrb.mxu3 %v2094_v31  ;;  %v2072_v27 = vld [vmem:[#allocation10 + $0x710] sm:$0xff]  ;;  %v1974_v63 = vld [vmem:[#allocation10 + $0x400] sm:$0xff] }
 0x318   :  { %2801 = vmatmul.f32.gmra.mxu0 %v4742_v19  ;;  %2824 = vmatmul.f32.gmra.mxu1 %v4744_v59  ;;  %v2006_v31 = vld [vmem:[#allocation10 + $0x500] sm:$0xff] }
 0x319   :  { %2847 = vmatmul.f32.gmra.mxu2 %v4746_v35  ;;  %2870 = vmatmul.f32.gmra.mxu3 %v4750_v56 }
 0x31a   :  { %2878 = vmatpush.msrb.mxu0 %v1996_v43  ;;  %2901 = vmatpush.msrb.mxu1 %v2028_v30  ;;  %v2038_v30 = vld [vmem:[#allocation10 + $0x600] sm:$0xff] }
 0x31b   :  { %2924 = vmatpush.msrb.mxu2 %v2060_v14  ;;  %2947 = vmatpush.msrb.mxu3 %v2092_v45  ;;  %v4754_v61 = vpop.f32.mrf.mxu0  ;;  %v4756_v47 = vpop.f32.mrf.mxu1  ;;  %v2070_v14 = vld [vmem:[#allocation10 + $0x700] sm:$0xff] }
 0x31c   :  { %2879 = vmatpush.msrb.mxu0 %v1994_v60  ;;  %2902 = vmatpush.msrb.mxu1 %v2026_v46 }
 0x31d   :  { %2925 = vmatpush.msrb.mxu2 %v2058_v11  ;;  %2948 = vmatpush.msrb.mxu3 %v2090_v9  ;;  %v4764_v11 = vld [vmem:[#allocation2 + $0x20] sm:$0xff]  ;;  %v4766_v9 = vld [vmem:[#allocation2 + $0x28] sm:$0xff] }
 0x31e   :  { %2880 = vmatpush.msrb.mxu0 %v1992_v42  ;;  %2903 = vmatpush.msrb.mxu1 %v2024_v48  ;;  %v4768_v42 = vld [vmem:[#allocation2 + $0x30] sm:$0xff] }
 0x31f   :  { %2926 = vmatpush.msrb.mxu2 %v2056_v44  ;;  %2949 = vmatpush.msrb.mxu3 %v2088_v16  ;;  %v1877_v48 = vld [vmem:[#allocation10 + $0xf8] sm:$0xff] }
 0x320   :  { %2881 = vmatpush.msrb.mxu0 %v1990_v29  ;;  %2904 = vmatpush.msrb.mxu1 %v2022_v22  ;;  %v1909_v44 = vld [vmem:[#allocation10 + $0x1f8] sm:$0xff]  ;;  %v4774_v29 = vld [vmem:[#allocation2 + $0x38] sm:$0xff] }
 0x321   :  { %2927 = vmatpush.msrb.mxu2 %v2054_v21  ;;  %2950 = vmatpush.msrb.mxu3 %v2086_v38  ;;  %v1941_v22 = vld [vmem:[#allocation10 + $0x2f8] sm:$0xff]  ;;  %v1875_v38 = vld [vmem:[#allocation10 + $0xe8] sm:$0xff] }
 0x322   :  { %2882 = vmatpush.msrb.mxu0 %v1988_v25  ;;  %2905 = vmatpush.msrb.mxu1 %v2020_v36  ;;  %v4758_v28 = vpop.f32.mrf.mxu2  ;;  %v4760_v23 = vpop.f32.mrf.mxu3  ;;  %v1973_v21 = vld [vmem:[#allocation10 + $0x3f8] sm:$0xff]  ;;  %v1907_v25 = vld [vmem:[#allocation10 + $0x1e8] sm:$0xff] }
 0x323   :  { %2928 = vmatpush.msrb.mxu2 %v2052_v26  ;;  %2951 = vmatpush.msrb.mxu3 %v2084_v3  ;;  %v1939_v36 = vld [vmem:[#allocation10 + $0x2e8] sm:$0xff]  ;;  %v1873_v3 = vld [vmem:[#allocation10 + $0xd8] sm:$0xff] }
 0x324   :  { %2883 = vmatpush.msrb.mxu0 %v1986_v53  ;;  %2906 = vmatpush.msrb.mxu1 %v2018_v52  ;;  %v1971_v26 = vld [vmem:[#allocation10 + $0x3e8] sm:$0xff]  ;;  %v1905_v53 = vld [vmem:[#allocation10 + $0x1d8] sm:$0xff] }
 0x325   :  { %2929 = vmatpush.msrb.mxu2 %v2050_v8  ;;  %2952 = vmatpush.msrb.mxu3 %v2082_v4  ;;  %v2434_v39 = vpop.f32.mrf.mxu0  ;;  %v2457_v34 = vpop.f32.mrf.mxu1  ;;  %v1937_v52 = vld [vmem:[#allocation10 + $0x2d8] sm:$0xff] }
 0x326   :  { %2884 = vmatpush.msrb.mxu0 %v1984_v15  ;;  %2907 = vmatpush.msrb.mxu1 %v2016_v62  ;;  %v2458_v1 = vadd.f32 %v2457_v34, %v2434_v39  ;;  %v1969_v8 = vld [vmem:[#allocation10 + $0x3d8] sm:$0xff]  ;;  %v1871_v15 = vld [vmem:[#allocation10 + $0xc8] sm:$0xff] }
 0x327   :  { %2930 = vmatpush.msrb.mxu2 %v2048_v40  ;;  %2953 = vmatpush.msrb.mxu3 %v2080_v18  ;;  %v1903_v62 = vld [vmem:[#allocation10 + $0x1c8] sm:$0xff]  ;;  %v4784_v34 = vld [vmem:[#allocation2 + $0x68] sm:$0x3] }
 0x328   :  { %2885 = vmatpush.msrb.mxu0 %v1982_v7  ;;  %2908 = vmatpush.msrb.mxu1 %v2014_v32  ;;  %v1935_v40 = vld [vmem:[#allocation10 + $0x2c8] sm:$0xff] }
 0x329   :  { %2931 = vmatpush.msrb.mxu2 %v2046_v17  ;;  %2954 = vmatpush.msrb.mxu3 %v2078_v20  ;;  %v1967_v18 = vld [vmem:[#allocation10 + $0x3c8] sm:$0xff]  ;;  %v4786_v20 = vld [vmem:[#allocation2 + $0x70] sm:$0x3] }
 0x32a   :  { %2886 = vmatpush.msrb.mxu0 %v1980_v5  ;;  %2909 = vmatpush.msrb.mxu1 %v2012_v51  ;;  %v4782_v39 = vld [vmem:[#allocation2 + $0x60] sm:$0x3]  ;;  %v1901_v5 = vld [vmem:[#allocation10 + $0x1b8] sm:$0xff] }
 0x32b   :  { %2932 = vmatpush.msrb.mxu2 %v2044_v50  ;;  %2955 = vmatpush.msrb.mxu3 %v2076_v2  ;;  %v4790_v50 = vld [vmem:[#allocation2 + $0x78] sm:$0x3]  ;;  %v1933_v2 = vld [vmem:[#allocation10 + $0x2b8] sm:$0xff] }
 0x32c   :  { %2887 = vmatpush.msrb.mxu0 %v1978_v33  ;;  %2910 = vmatpush.msrb.mxu1 %v2010_v55  ;;  %v2480_v37 = vpop.f32.mrf.mxu2  ;;  %v2503_v45 = vpop.f32.mrf.mxu3  ;;  %v1965_v33 = vld [vmem:[#allocation10 + $0x3b8] sm:$0xff] }
 0x32d   :  { %2933 = vmatpush.msrb.mxu2 %v2042_v49  ;;  %2956 = vmatpush.msrb.mxu3 %v2074_v6  ;;  %v2481_v43 = vadd.f32 %v2480_v37, %v2458_v1  ;;  %v1869_v1 = vld [vmem:[#allocation10 + $0xb8] sm:$0xff]  ;;  %v1867_v49 = vld [vmem:[#allocation10 + $0xa8] sm:$0xff] }
 0x32e   :  { %2888 = vmatpush.msrb.mxu0 %v1976_v0  ;;  %2911 = vmatpush.msrb.mxu1 %v2008_v12  ;;  %v1899_v6 = vld [vmem:[#allocation10 + $0x1a8] sm:$0xff]  ;;  %v1929_v37 = vld [vmem:[#allocation10 + $0x298] sm:$0xff] }
 0x32f   :  { %2934 = vmatpush.msrb.mxu2 %v2040_v41  ;;  %2957 = vmatpush.msrb.mxu3 %v2072_v27  ;;  %v2504_v60 = vadd.f32 %v2503_v45, %v2481_v43  ;;  %v4762_v46 = vpop.f32.mrf.mxu0  ;;  %v4770_v16 = vpop.f32.mrf.mxu1  ;;  %v1931_v0 = vld [vmem:[#allocation10 + $0x2a8] sm:$0xff]  ;;  %v1865_v41 = vld [vmem:[#allocation10 + $0x98] sm:$0xff] }
 0x330   :  { %2889 = vmatpush.msrb.mxu0 %v1974_v63  ;;  %2912 = vmatpush.msrb.mxu1 %v2006_v31  ;;  %v1963_v12 = vld [vmem:[#allocation10 + $0x3a8] sm:$0xff]  ;;  %v1897_v27 = vld [vmem:[#allocation10 + $0x198] sm:$0xff] }
 0x331   :  { %2935 = vmatpush.msrb.mxu2 %v2038_v30  ;;  %2958 = vmatpush.msrb.mxu3 %v2070_v14  ;;  %v1961_v63 = vld [vmem:[#allocation10 + $0x398] sm:$0xff]  ;;  %v1863_v43 = vld [vmem:[#allocation10 + $0x88] sm:$0xff] }
 0x332   :  { %2890 = vmatmul.f32.vlgmr.msrb.gmra.mxu0 %v4764_v11  ;;  %2913 = vmatmul.f32.vlgmr.msrb.gmra.mxu1 %v4766_v9  ;;  %v1895_v30 = vld [vmem:[#allocation10 + $0x188] sm:$0xff] }
 0x333   :  { %2936 = vmatmul.f32.vlgmr.msrb.gmra.mxu2 %v4768_v42  ;;  %2959 = vmatmul.f32.vlgmr.msrb.gmra.mxu3 %v4774_v29  ;;  %v1927_v45 = vld [vmem:[#allocation10 + $0x288] sm:$0xff] }
 0x334   :  { %2966 = vmatpush.msra.mxu0 %v1877_v48  ;;  %2989 = vmatpush.msra.mxu1 %v1909_v44  ;;  %v1861_v44 = vld [vmem:[#allocation10 + $0x78] sm:$0xff] }
 0x335   :  { %3012 = vmatpush.msra.mxu2 %v1941_v22  ;;  %3035 = vmatpush.msra.mxu3 %v1973_v21  ;;  %v1893_v22 = vld [vmem:[#allocation10 + $0x178] sm:$0xff] }
 0x336   :  { %2967 = vmatpush.msra.mxu0 %v1875_v38  ;;  %2990 = vmatpush.msra.mxu1 %v1907_v25  ;;  %v4778_v4 = vpop.f32.mrf.mxu2  ;;  %v4780_v7 = vpop.f32.mrf.mxu3  ;;  %v1925_v38 = vld [vmem:[#allocation10 + $0x278] sm:$0xff] }
 0x337   :  { %3013 = vmatpush.msra.mxu2 %v1939_v36  ;;  %3036 = vmatpush.msra.mxu3 %v1971_v26  ;;  %v1957_v25 = vld [vmem:[#allocation10 + $0x378] sm:$0xff]  ;;  %v1859_v36 = vld [vmem:[#allocation10 + $0x68] sm:$0xff] }
 0x338   :  { %2968 = vmatpush.msra.mxu0 %v1873_v3  ;;  %2991 = vmatpush.msra.mxu1 %v1905_v53  ;;  %v1891_v26 = vld [vmem:[#allocation10 + $0x168] sm:$0xff] }
 0x339   :  { %3014 = vmatpush.msra.mxu2 %v1937_v52  ;;  %3037 = vmatpush.msra.mxu3 %v1969_v8  ;;  %v2526_v32 = vpop.f32.mrf.mxu0  ;;  %v2549_v51 = vpop.f32.mrf.mxu1  ;;  %v1923_v52 = vld [vmem:[#allocation10 + $0x268] sm:$0xff] }
 0x33a   :  { %2969 = vmatpush.msra.mxu0 %v1871_v15  ;;  %2992 = vmatpush.msra.mxu1 %v1903_v62  ;;  %v2527_v17 = vadd.f32 %v2526_v32, %v2504_v60  ;;  %v1959_v60 = vld [vmem:[#allocation10 + $0x388] sm:$0xff]  ;;  %v1857_v62 = vld [vmem:[#allocation10 + $0x58] sm:$0xff] }
 0x33b   :  { %3015 = vmatpush.msra.mxu2 %v1935_v40  ;;  %3038 = vmatpush.msra.mxu3 %v1967_v18  ;;  %v1955_v8 = vld [vmem:[#allocation10 + $0x368] sm:$0xff]  ;;  %v1889_v40 = vld [vmem:[#allocation10 + $0x158] sm:$0xff] }
 0x33c   :  { %2893 = vmatmul.f32.gmra.mxu0 %v4782_v39  ;;  %2916 = vmatmul.f32.gmra.mxu1 %v4784_v34  ;;  %v2550_v55 = vadd.f32 %v2549_v51, %v2527_v17  ;;  %v1921_v18 = vld [vmem:[#allocation10 + $0x258] sm:$0xff]  ;;  %v1855_v17 = vld [vmem:[#allocation10 + $0x48] sm:$0xff] }
 0x33d   :  { %2939 = vmatmul.f32.gmra.mxu2 %v4786_v20  ;;  %2962 = vmatmul.f32.gmra.mxu3 %v4790_v50  ;;  %v1953_v32 = vld [vmem:[#allocation10 + $0x358] sm:$0xff]  ;;  %v1951_v51 = vld [vmem:[#allocation10 + $0x348] sm:$0xff] }
 0x33e   :  { %2970 = vmatpush.msra.mxu0 %v1869_v1  ;;  %2993 = vmatpush.msra.mxu1 %v1901_v5  ;;  %v1887_v1 = vld [vmem:[#allocation10 + $0x148] sm:$0xff] }
 0x33f   :  { %3016 = vmatpush.msra.mxu2 %v1933_v2  ;;  %3039 = vmatpush.msra.mxu3 %v1965_v33  ;;  %v1919_v5 = vld [vmem:[#allocation10 + $0x248] sm:$0xff]  ;;  %v1853_v2 = vld [vmem:[#allocation10 + $0x38] sm:$0xff] }
 0x340   :  { %2971 = vmatpush.msra.mxu0 %v1867_v49  ;;  %2994 = vmatpush.msra.mxu1 %v1899_v6  ;;  %v2572_v31 = vpop.f32.mrf.mxu2  ;;  %v2595_v48 = vpop.f32.mrf.mxu3  ;;  %v1885_v33 = vld [vmem:[#allocation10 + $0x138] sm:$0xff] }
 0x341   :  { %3017 = vmatpush.msra.mxu2 %v1931_v0  ;;  %3040 = vmatpush.msra.mxu3 %v1963_v12  ;;  %v2573_v14 = vadd.f32 %v2572_v31, %v2550_v55  ;;  %v1917_v55 = vld [vmem:[#allocation10 + $0x238] sm:$0xff]  ;;  %v1851_v0 = vld [vmem:[#allocation10 + $0x28] sm:$0xff] }
 0x342   :  { %2972 = vmatpush.msra.mxu0 %v1865_v41  ;;  %2995 = vmatpush.msra.mxu1 %v1897_v27  ;;  %v1949_v49 = vld [vmem:[#allocation10 + $0x338] sm:$0xff]  ;;  %v1883_v12 = vld [vmem:[#allocation10 + $0x128] sm:$0xff] }
 0x343   :  { %3018 = vmatpush.msra.mxu2 %v1929_v37  ;;  %3041 = vmatpush.msra.mxu3 %v1961_v63  ;;  %v4794_v21 = vadd.f32 %v2595_v48, %v2573_v14  ;;  %v1915_v27 = vld [vmem:[#allocation10 + $0x228] sm:$0xff]  ;;  %v1849_v31 = vld [vmem:[#allocation10 + $0x18] sm:$0xff] }
 0x344   :  { %2973 = vmatpush.msra.mxu0 %v1863_v43  ;;  %2996 = vmatpush.msra.mxu1 %v1895_v30  ;;  %v1947_v37 = vld [vmem:[#allocation10 + $0x328] sm:$0xff]  ;;  %v1881_v43 = vld [vmem:[#allocation10 + $0x118] sm:$0xff] }
 0x345   :  { %3019 = vmatpush.msra.mxu2 %v1927_v45  ;;  %3042 = vmatpush.msra.mxu3 %v1959_v60  ;;  %v2615_v3 = vpop.f32.mrf.mxu0  ;;  %v2638_v53 = vpop.f32.mrf.mxu1  ;;  %v1913_v60 = vld [vmem:[#allocation10 + $0x218] sm:$0xff] }
 0x346   :  { %2974 = vmatpush.msra.mxu0 %v1861_v44  ;;  %2997 = vmatpush.msra.mxu1 %v1893_v22  ;;  %v2639_v15 = vadd.f32 %v2638_v53, %v2615_v3  ;;  %v1945_v48 = vld [vmem:[#allocation10 + $0x318] sm:$0xff]  ;;  %v1847_v22 = vld [vmem:[#allocation10 + $0x8] sm:$0xff] }
 0x347   :  { %3020 = vmatpush.msra.mxu2 %v1925_v38  ;;  %3043 = vmatpush.msra.mxu3 %v1957_v25  ;;  %v1879_v38 = vld [vmem:[#allocation10 + $0x108] sm:$0xff]  ;;  %v2037_v3 = vld [vmem:[#allocation10 + $0x5f8] sm:$0xff] }
 0x348   :  { %2975 = vmatpush.msra.mxu0 %v1859_v36  ;;  %2998 = vmatpush.msra.mxu1 %v1891_v26  ;;  %v1911_v25 = vld [vmem:[#allocation10 + $0x208] sm:$0xff]  ;;  %v2005_v26 = vld [vmem:[#allocation10 + $0x4f8] sm:$0xff] }
 0x349   :  { %3021 = vmatpush.msra.mxu2 %v1923_v52  ;;  %3044 = vmatpush.msra.mxu3 %v1955_v8  ;;  %v1943_v36 = vld [vmem:[#allocation10 + $0x308] sm:$0xff]  ;;  %v2069_v53 = vld [vmem:[#allocation10 + $0x6f8] sm:$0xff] }
 0x34a   :  { %2976 = vmatpush.msra.mxu0 %v1857_v62  ;;  %2999 = vmatpush.msra.mxu1 %v1889_v40  ;;  %v2101_v52 = vld [vmem:[#allocation10 + $0x7f8] sm:$0xff]  ;;  %v2035_v62 = vld [vmem:[#allocation10 + $0x5e8] sm:$0xff] }
 0x34b   :  { %3022 = vmatpush.msra.mxu2 %v1921_v18  ;;  %3045 = vmatpush.msra.mxu3 %v1953_v32  ;;  %v2067_v18 = vld [vmem:[#allocation10 + $0x6e8] sm:$0xff] }
 0x34c   :  { %2977 = vmatpush.msra.mxu0 %v1855_v17  ;;  %3000 = vmatpush.msra.mxu1 %v1887_v1  ;;  %v2661_v6 = vpop.f32.mrf.mxu2  ;;  %v2684_v63 = vpop.f32.mrf.mxu3  ;;  %v2099_v32 = vld [vmem:[#allocation10 + $0x7e8] sm:$0xff]  ;;  %v2033_v1 = vld [vmem:[#allocation10 + $0x5d8] sm:$0xff] }
 0x34d   :  { %3023 = vmatpush.msra.mxu2 %v1919_v5  ;;  %3046 = vmatpush.msra.mxu3 %v1951_v51  ;;  %v2662_v41 = vadd.f32 %v2661_v6, %v2639_v15  ;;  %v2003_v15 = vld [vmem:[#allocation10 + $0x4e8] sm:$0xff]  ;;  %v2065_v5 = vld [vmem:[#allocation10 + $0x6d8] sm:$0xff] }
 0x34e   :  { %2978 = vmatpush.msra.mxu0 %v1853_v2  ;;  %3001 = vmatpush.msra.mxu1 %v1885_v33  ;;  %v2031_v51 = vld [vmem:[#allocation10 + $0x5c8] sm:$0xff]  ;;  %v2061_v6 = vld [vmem:[#allocation10 + $0x6b8] sm:$0xff] }
 0x34f   :  { %3024 = vmatpush.msra.mxu2 %v1917_v55  ;;  %3047 = vmatpush.msra.mxu3 %v1949_v49  ;;  %v4796_v30 = vadd.f32 %v2684_v63, %v2662_v41  ;;  %v2618_v14 = vpop.f32.mrf.mxu0  ;;  %v2641_v45 = vpop.f32.mrf.mxu1  ;;  %v2063_v2 = vld [vmem:[#allocation10 + $0x6c8] sm:$0xff]  ;;  %v1997_v55 = vld [vmem:[#allocation10 + $0x4b8] sm:$0xff] }
 0x350   :  { %2979 = vmatpush.msra.mxu0 %v1851_v0  ;;  %3002 = vmatpush.msra.mxu1 %v1883_v12  ;;  %v2642_v44 = vadd.f32 %v2641_v45, %v2618_v14  ;;  %v2095_v33 = vld [vmem:[#allocation10 + $0x7c8] sm:$0xff]  ;;  %v2029_v49 = vld [vmem:[#allocation10 + $0x5b8] sm:$0xff] }
 0x351   :  { %3025 = vmatpush.msra.mxu2 %v1915_v27  ;;  %3048 = vmatpush.msra.mxu3 %v1947_v37  ;;  %v2093_v0 = vld [vmem:[#allocation10 + $0x7b8] sm:$0xff]  ;;  %v1995_v12 = vld [vmem:[#allocation10 + $0x4a8] sm:$0xff] }
 0x352   :  { %2980 = vmatpush.msra.mxu0 %v1849_v31  ;;  %3003 = vmatpush.msra.mxu1 %v1881_v43  ;;  %v2027_v41 = vld [vmem:[#allocation10 + $0x5a8] sm:$0xff]  ;;  %v1993_v63 = vld [vmem:[#allocation10 + $0x498] sm:$0xff] }
 0x353   :  { %3026 = vmatpush.msra.mxu2 %v1913_v60  ;;  %3049 = vmatpush.msra.mxu3 %v1945_v48  ;;  %v2059_v27 = vld [vmem:[#allocation10 + $0x6a8] sm:$0xff]  ;;  %v2025_v31 = vld [vmem:[#allocation10 + $0x598] sm:$0xff] }
 0x354   :  { %2981 = vmatpush.msra.mxu0 %v1847_v22  ;;  %3004 = vmatpush.msra.mxu1 %v1879_v38  ;;  %v2091_v37 = vld [vmem:[#allocation10 + $0x7a8] sm:$0xff]  ;;  %v1989_v45 = vld [vmem:[#allocation10 + $0x478] sm:$0xff] }
 0x355   :  { %3027 = vmatpush.msra.mxu2 %v1911_v25  ;;  %3050 = vmatpush.msra.mxu3 %v1943_v36  ;;  %v1991_v43 = vld [vmem:[#allocation10 + $0x488] sm:$0xff]  ;;  %v2021_v60 = vld [vmem:[#allocation10 + $0x578] sm:$0xff] }
 0x356   :  { %2982 = vmatmul.f32.vlgmr.msra.gmra.mxu0 %v4730_v54  ;;  %3005 = vmatmul.f32.vlgmr.msra.gmra.mxu1 %v4732_v24  ;;  %v2664_v8 = vpop.f32.mrf.mxu2  ;;  %v2687_v17 = vpop.f32.mrf.mxu3  ;;  %v2001_v54 = vld [vmem:[#allocation10 + $0x4d8] sm:$0xff]  ;;  %v2087_v14 = vld [vmem:[#allocation10 + $0x788] sm:$0xff] }
 0x357   :  { %3028 = vmatmul.f32.vlgmr.msra.gmra.mxu2 %v4734_v57  ;;  %3051 = vmatmul.f32.vlgmr.msra.gmra.mxu3 %v4738_v10  ;;  %v2665_v40 = vadd.f32 %v2664_v8, %v2642_v44  ;;  %v2097_v57 = vld [vmem:[#allocation10 + $0x7d8] sm:$0xff]  ;;  %v1999_v10 = vld [vmem:[#allocation10 + $0x4c8] sm:$0xff] }
 0x358   :  { %3058 = vmatpush.msrb.mxu0 %v2005_v26  ;;  %3081 = vmatpush.msrb.mxu1 %v2037_v3  ;;  %v2053_v44 = vld [vmem:[#allocation10 + $0x678] sm:$0xff]  ;;  %v1987_v25 = vld [vmem:[#allocation10 + $0x468] sm:$0xff] }
 0x359   :  { %3104 = vmatpush.msrb.mxu2 %v2069_v53  ;;  %3127 = vmatpush.msrb.mxu3 %v2101_v52  ;;  %v4802_v24 = vadd.f32 %v2687_v17, %v2665_v40  ;;  %v2085_v22 = vld [vmem:[#allocation10 + $0x778] sm:$0xff]  ;;  %v2019_v36 = vld [vmem:[#allocation10 + $0x568] sm:$0xff] }
 0x35a   :  { %3059 = vmatpush.msrb.mxu0 %v2003_v15  ;;  %3082 = vmatpush.msrb.mxu1 %v2035_v62  ;;  %v2051_v3 = vld [vmem:[#allocation10 + $0x668] sm:$0xff]  ;;  %v1985_v8 = vld [vmem:[#allocation10 + $0x458] sm:$0xff] }
 0x35b   :  { %3105 = vmatpush.msrb.mxu2 %v2067_v18  ;;  %3128 = vmatpush.msrb.mxu3 %v2099_v32  ;;  %v2083_v53 = vld [vmem:[#allocation10 + $0x768] sm:$0xff]  ;;  %v2017_v15 = vld [vmem:[#allocation10 + $0x558] sm:$0xff] }
 0x35c   :  { %3060 = vmatpush.msrb.mxu0 %v2001_v54  ;;  %3083 = vmatpush.msrb.mxu1 %v2033_v1  ;;  %v2049_v62 = vld [vmem:[#allocation10 + $0x658] sm:$0xff]  ;;  %v2015_v18 = vld [vmem:[#allocation10 + $0x548] sm:$0xff] }
 0x35d   :  { %3106 = vmatpush.msrb.mxu2 %v2065_v5  ;;  %3129 = vmatpush.msrb.mxu3 %v2097_v57  ;;  %v2081_v40 = vld [vmem:[#allocation10 + $0x758] sm:$0xff]  ;;  %v2047_v32 = vld [vmem:[#allocation10 + $0x648] sm:$0xff] }
 0x35e   :  { %3061 = vmatpush.msrb.mxu0 %v1999_v10  ;;  %3084 = vmatpush.msrb.mxu1 %v2031_v51  ;;  %v2079_v17 = vld [vmem:[#allocation10 + $0x748] sm:$0xff]  ;;  %v1981_v1 = vld [vmem:[#allocation10 + $0x438] sm:$0xff] }
 0x35f   :  { %3107 = vmatpush.msrb.mxu2 %v2063_v2  ;;  %3130 = vmatpush.msrb.mxu3 %v2095_v33  ;;  %v2013_v5 = vld [vmem:[#allocation10 + $0x538] sm:$0xff]  ;;  %v1979_v33 = vld [vmem:[#allocation10 + $0x428] sm:$0xff] }
 0x360   :  { %2985 = vmatmul.f32.gmra.mxu0 %v4742_v19  ;;  %3008 = vmatmul.f32.gmra.mxu1 %v4744_v59  ;;  %v2057_v19 = vld [vmem:[#allocation10 + $0x698] sm:$0xff] }
 0x361   :  { %3031 = vmatmul.f32.gmra.mxu2 %v4746_v35  ;;  %3054 = vmatmul.f32.gmra.mxu3 %v4750_v56  ;;  %v2089_v59 = vld [vmem:[#allocation10 + $0x798] sm:$0xff]  ;;  %v2023_v35 = vld [vmem:[#allocation10 + $0x588] sm:$0xff] }
 0x362   :  { %3062 = vmatpush.msrb.mxu0 %v1997_v55  ;;  %3085 = vmatpush.msrb.mxu1 %v2029_v49  ;;  %v2055_v56 = vld [vmem:[#allocation10 + $0x688] sm:$0xff]  ;;  %v2045_v10 = vld [vmem:[#allocation10 + $0x638] sm:$0xff] }
 0x363   :  { %3108 = vmatpush.msrb.mxu2 %v2061_v6  ;;  %3131 = vmatpush.msrb.mxu3 %v2093_v0  ;;  %v2077_v51 = vld [vmem:[#allocation10 + $0x738] sm:$0xff]  ;;  %v2011_v55 = vld [vmem:[#allocation10 + $0x528] sm:$0xff] }
 0x364   :  { %3063 = vmatpush.msrb.mxu0 %v1995_v12  ;;  %3086 = vmatpush.msrb.mxu1 %v2027_v41  ;;  %v2043_v0 = vld [vmem:[#allocation10 + $0x628] sm:$0xff] }
 0x365   :  { %3109 = vmatpush.msrb.mxu2 %v2059_v27  ;;  %3132 = vmatpush.msrb.mxu3 %v2091_v37  ;;  %v2075_v12 = vld [vmem:[#allocation10 + $0x728] sm:$0xff]  ;;  %v1977_v27 = vld [vmem:[#allocation10 + $0x418] sm:$0xff] }
 0x366   :  { %3064 = vmatpush.msrb.mxu0 %v1993_v63  ;;  %3087 = vmatpush.msrb.mxu1 %v2025_v31  ;;  %v2009_v37 = vld [vmem:[#allocation10 + $0x518] sm:$0xff] }
 0x367   :  { %3110 = vmatpush.msrb.mxu2 %v2057_v19  ;;  %3133 = vmatpush.msrb.mxu3 %v2089_v59  ;;  %v2707_v48 = vpop.f32.mrf.mxu0  ;;  %v2730_v26 = vpop.f32.mrf.mxu1  ;;  %v2041_v31 = vld [vmem:[#allocation10 + $0x618] sm:$0xff] }
 0x368   :  { %3065 = vmatpush.msrb.mxu0 %v1991_v43  ;;  %3088 = vmatpush.msrb.mxu1 %v2023_v35  ;;  %v2708_v38 = vadd.f32 %v2707_v48, %v4796_v30  ;;  %v1983_v30 = vld [vmem:[#allocation10 + $0x448] sm:$0xff]  ;;  %v2073_v19 = vld [vmem:[#allocation10 + $0x718] sm:$0xff] }
 0x369   :  { %3111 = vmatpush.msrb.mxu2 %v2055_v56  ;;  %3134 = vmatpush.msrb.mxu3 %v2087_v14  ;;  %v1975_v43 = vld [vmem:[#allocation10 + $0x408] sm:$0xff] }
 0x36a   :  { %3066 = vmatpush.msrb.mxu0 %v1989_v45  ;;  %3089 = vmatpush.msrb.mxu1 %v2021_v60  ;;  %v2731_v52 = vadd.f32 %v2730_v26, %v2708_v38  ;;  %v2007_v35 = vld [vmem:[#allocation10 + $0x508] sm:$0xff] }
 0x36b   :  { %3112 = vmatpush.msrb.mxu2 %v2053_v44  ;;  %3135 = vmatpush.msrb.mxu3 %v2085_v22  ;;  %v2039_v56 = vld [vmem:[#allocation10 + $0x608] sm:$0xff] }
 0x36c   :  { %3067 = vmatpush.msrb.mxu0 %v1987_v25  ;;  %3090 = vmatpush.msrb.mxu1 %v2019_v36  ;;  %v2071_v14 = vld [vmem:[#allocation10 + $0x708] sm:$0xff] }
 0x36d   :  { %3113 = vmatpush.msrb.mxu2 %v2051_v3  ;;  %3136 = vmatpush.msrb.mxu3 %v2083_v53 }
 0x36e   :  { %3068 = vmatpush.msrb.mxu0 %v1985_v8  ;;  %3091 = vmatpush.msrb.mxu1 %v2017_v15  ;;  %v2753_v54 = vpop.f32.mrf.mxu2  ;;  %v2776_v2 = vpop.f32.mrf.mxu3 }
 0x36f   :  { %3114 = vmatpush.msrb.mxu2 %v2049_v62  ;;  %3137 = vmatpush.msrb.mxu3 %v2081_v40  ;;  %v2754_v57 = vadd.f32 %v2753_v54, %v2731_v52 }
 0x370   :  { %3069 = vmatpush.msrb.mxu0 %v1983_v30  ;;  %3092 = vmatpush.msrb.mxu1 %v2015_v18 }
 0x371   :  { %3115 = vmatpush.msrb.mxu2 %v2047_v32  ;;  %3138 = vmatpush.msrb.mxu3 %v2079_v17  ;;  %v4809_v49 = vadd.f32 %v2776_v2, %v2754_v57  ;;  %v2710_v6 = vpop.f32.mrf.mxu0  ;;  %v2733_v63 = vpop.f32.mrf.mxu1 }
 0x372   :  { %3070 = vmatpush.msrb.mxu0 %v1981_v1  ;;  %3093 = vmatpush.msrb.mxu1 %v2013_v5  ;;  %v2711_v41 = vadd.f32 %v2710_v6, %v4802_v24 }
 0x373   :  { %3116 = vmatpush.msrb.mxu2 %v2045_v10  ;;  %3139 = vmatpush.msrb.mxu3 %v2077_v51 }
 0x374   :  { %3071 = vmatpush.msrb.mxu0 %v1979_v33  ;;  %3094 = vmatpush.msrb.mxu1 %v2011_v55  ;;  %v2734_v59 = vadd.f32 %v2733_v63, %v2711_v41  ;;  %v3370_v41 = vld [vmem:[%s5453_s8 + $0x1f8] sm:$0xff]  ;;  %v3369_v63 = vld [vmem:[%s5453_s8 + $0x1f0] sm:$0xff] }
 0x375   :  { %3117 = vmatpush.msrb.mxu2 %v2043_v0  ;;  %3140 = vmatpush.msrb.mxu3 %v2075_v12  ;;  %v3597_v12 = vld [vmem:[%s5455_s10 + $0xf8] sm:$0xff] }
 0x376   :  { %3072 = vmatpush.msrb.mxu0 %v1977_v27  ;;  %3095 = vmatpush.msrb.mxu1 %v2009_v37  ;;  %v3353_v37 = vld [vmem:[%s5453_s8 + $0x170] sm:$0xff] }
 0x377   :  { %3118 = vmatpush.msrb.mxu2 %v2041_v31  ;;  %3141 = vmatpush.msrb.mxu3 %v2073_v19  ;;  %v3352_v31 = vld [vmem:[%s5453_s8 + $0x168] sm:$0xff] }
 0x378   :  { %3073 = vmatpush.msrb.mxu0 %v1975_v43  ;;  %3096 = vmatpush.msrb.mxu1 %v2007_v35  ;;  %v2756_v24 = vpop.f32.mrf.mxu2  ;;  %v2779_v60 = vpop.f32.mrf.mxu3  ;;  %v3367_v43 = vld [vmem:[%s5453_s8 + $0x1e0] sm:$0xff]  ;;  %v3322_v35 = vld [vmem:[%s5453_s8 + $0x78] sm:$0xff] }
 0x379   :  { %3119 = vmatpush.msrb.mxu2 %v2039_v56  ;;  %3142 = vmatpush.msrb.mxu3 %v2071_v14  ;;  %v2757_v45 = vadd.f32 %v2756_v24, %v2734_v59  ;;  %v3351_v59 = vld [vmem:[%s5453_s8 + $0x160] sm:$0xff]  ;;  %v3338_v56 = vld [vmem:[%s5453_s8 + $0xf8] sm:$0xff] }
 0x37a   :  { %3074 = vmatmul.f32.vlgmr.msrb.gmra.mxu0 %v4764_v11  ;;  %3097 = vmatmul.f32.vlgmr.msrb.gmra.mxu1 %v4766_v9  ;;  %v2455_v11 = vadd.f32 %v4756_v47, %v4754_v61  ;;  %v3350_v14 = vld [vmem:[%s5453_s8 + $0x158] sm:$0xff] }
 0x37b   :  { %3120 = vmatmul.f32.vlgmr.msrb.gmra.mxu2 %v4768_v42  ;;  %3143 = vmatmul.f32.vlgmr.msrb.gmra.mxu3 %v4774_v29  ;;  %v4816_v48 = vadd.f32 %v2779_v60, %v2757_v45  ;;  %v3366_v60 = vld [vmem:[%s5453_s8 + $0x1d8] sm:$0xff] }
 0x37c   :  { %v2478_v42 = vadd.f32 %v4758_v28, %v2455_v11  ;;  %3423 = vmatpush.msra.mxu2 %v3354_v58  ;;  %3443 = vmatpush.msra.mxu3 %v3370_v41  ;;  %v3337_v11 = vld [vmem:[%s5453_s8 + $0xf0] sm:$0xff]  ;;  %v3358_v58 = vld [vmem:[%s5453_s8 + $0x198] sm:$0xff] }
 0x37d   :  { %3383 = vmatpush.msra.mxu0 %v3322_v35  ;;  %3403 = vmatpush.msra.mxu1 %v3338_v56  ;;  %v3340_v56 = vld [vmem:[%s5453_s8 + $0x108] sm:$0xff] }
 0x37e   :  { %3424 = vmatpush.msra.mxu2 %v3353_v37  ;;  %3444 = vmatpush.msra.mxu3 %v3369_v63  ;;  %v3329_v37 = vld [vmem:[%s5453_s8 + $0xb0] sm:$0xff] }
 0x37f   :  { %3404 = vmatpush.msra.mxu1 %v3337_v11  ;;  %v3341_v63 = vld [vmem:[%s5453_s8 + $0x110] sm:$0xff]  ;;  %v3327_v11 = vld [vmem:[%s5453_s8 + $0xa0] sm:$0xff] }
 0x380   :  { %3425 = vmatpush.msra.mxu2 %v3352_v31  ;;  %3445 = vmatpush.msra.mxu3 %v3368_v13  ;;  %v3357_v31 = vld [vmem:[%s5453_s8 + $0x190] sm:$0xff] }
 0x382   :  { %3077 = vmatmul.f32.gmra.mxu0 %v4782_v39  ;;  %3100 = vmatmul.f32.gmra.mxu1 %v4784_v34  ;;  %v2501_v39 = vadd.f32 %v4760_v23, %v2478_v42 }
 0x383   :  { %3123 = vmatmul.f32.gmra.mxu2 %v4786_v20  ;;  %3146 = vmatmul.f32.gmra.mxu3 %v4790_v50 }
 0x384   :  { %v2524_v20 = vadd.f32 %v4762_v46, %v2501_v39  ;;  %v4834_v46 = vld [vmem:[%s5451_s6] sm:$0x3]  ;;  %3426 = vmatpush.msra.mxu2 %v3351_v59  ;;  %3446 = vmatpush.msra.mxu3 %v3367_v43  ;;  %v3364_v39 = vld [vmem:[%s5453_s8 + $0x1c8] sm:$0xff] }
 0x385   :  { %v3328_v59 = vld [vmem:[%s5453_s8 + $0xa8] sm:$0xff] }
 0x386   :  { %v2547_v50 = vadd.f32 %v4770_v16, %v2524_v20  ;;  %3427 = vmatpush.msra.mxu2 %v3350_v14  ;;  %3447 = vmatpush.msra.mxu3 %v3366_v60  ;;  %v3335_v20 = vld [vmem:[%s5453_s8 + $0xe0] sm:$0xff]  ;;  %v3356_v14 = vld [vmem:[%s5453_s8 + $0x188] sm:$0xff]  ;;  %v3153_v60 = vperm.slane %v4834_v46, 1 }
 0x388   :  { %v2570_v61 = vadd.f32 %v4778_v4, %v2547_v50  ;;  %v3152_v4 = vperm.slane %v4834_v46, 0  ;;  %v3301_v46 = vld [vmem:[%s5452_s7 + $0x1d0] sm:$0xff] }
 0x38a   :  { %v2593_v28 = vadd.f32 %v4780_v7, %v2570_v61  ;;  %v3318_v61 = vld [vmem:[%s5453_s8 + $0x58] sm:$0xff] }
 0x38b   :  { %v2799_v44 = vpop.f32.mrf.mxu0  ;;  %v2822_v22 = vpop.f32.mrf.mxu1 }
 0x38c   :  { %v2800_v52 = vadd.f32 %v2799_v44, %v2593_v28  ;;  %v3346_v28 = vld [vmem:[%s5453_s8 + $0x138] sm:$0xff] }
 0x38e   :  { %v2823_v8 = vadd.f32 %v2822_v22, %v2800_v52  ;;  %v3321_v22 = vld [vmem:[%s5453_s8 + $0x70] sm:$0xff]  ;;  %v3362_v52 = vld [vmem:[%s5453_s8 + $0x1b8] sm:$0xff] }
 0x38f   :  { %3384 = vmatpush.msra.mxu0 %v3321_v22  ;;  %v3311_v22 = vld [vmem:[%s5453_s8 + $0x20] sm:$0xff] }
 0x392   :  { %v2845_v9 = vpop.f32.mrf.mxu2  ;;  %v2868_v38 = vpop.f32.mrf.mxu3 }
 0x393   :  { %v2846_v15 = vadd.f32 %v2845_v9, %v2823_v8  ;;  %v3349_v9 = vld [vmem:[%s5453_s8 + $0x150] sm:$0xff] }
 0x394   :  { %3428 = vmatpush.msra.mxu2 %v3349_v9  ;;  %v3317_v8 = vld [vmem:[%s5453_s8 + $0x50] sm:$0xff]  ;;  %v3339_v9 = vld [vmem:[%s5453_s8 + $0x100] sm:$0xff] }
 0x395   :  { %v2802_v29 = vpop.f32.mrf.mxu0  ;;  %v2825_v36 = vpop.f32.mrf.mxu1 }
 0x396   :  { %v2803_v25 = vadd.f32 %v2802_v29, %v4794_v21  ;;  %v2869_v21 = vadd.f32 %v2868_v38, %v2846_v15  ;;  %v3320_v38 = vld [vmem:[%s5453_s8 + $0x68] sm:$0xff]  ;;  %v3333_v15 = vld [vmem:[%s5453_s8 + $0xd0] sm:$0xff] }
 0x397   :  { %v3336_v29 = vld [vmem:[%s5453_s8 + $0xe8] sm:$0xff]  ;;  %3385 = vmatpush.msra.mxu0 %v3320_v38 }
 0x398   :  { %v2826_v34 = vadd.f32 %v2825_v36, %v2803_v25  ;;  %v3348_v25 = vld [vmem:[%s5453_s8 + $0x148] sm:$0xff]  ;;  %3405 = vmatpush.msra.mxu1 %v3336_v29  ;;  %v3290_v29 = vld [vmem:[%s5452_s7 + $0x178] sm:$0xff] }
 0x399   :  { %3429 = vmatpush.msra.mxu2 %v3348_v25  ;;  %v3306_v25 = vld [vmem:[%s5452_s7 + $0x1f8] sm:$0xff] }
 0x39a   :  { %3406 = vmatpush.msra.mxu1 %v3335_v20  ;;  %v3289_v20 = vld [vmem:[%s5452_s7 + $0x170] sm:$0xff] }
 0x39c   :  { %v2848_v26 = vpop.f32.mrf.mxu2  ;;  %v2871_v53 = vpop.f32.mrf.mxu3 }
 0x39d   :  { %v2849_v3 = vadd.f32 %v2848_v26, %v2826_v34  ;;  %v3319_v34 = vld [vmem:[%s5453_s8 + $0x60] sm:$0xff] }
 0x39e   :  { %v3347_v26 = vld [vmem:[%s5453_s8 + $0x140] sm:$0xff]  ;;  %3386 = vmatpush.msra.mxu0 %v3319_v34 }
 0x39f   :  { %v2872_v47 = vadd.f32 %v2871_v53, %v2849_v3  ;;  %v3363_v3 = vld [vmem:[%s5453_s8 + $0x1c0] sm:$0xff]  ;;  %3430 = vmatpush.msra.mxu2 %v3347_v26  ;;  %v3305_v26 = vld [vmem:[%s5452_s7 + $0x1f0] sm:$0xff] }
 0x3a0   :  { %3387 = vmatpush.msra.mxu0 %v3318_v61 }
 0x3a1   :  { %3431 = vmatpush.msra.mxu2 %v3346_v28  ;;  %v3288_v28 = vld [vmem:[%s5452_s7 + $0x168] sm:$0xff] }
 0x3a2   :  { %3388 = vmatpush.msra.mxu0 %v3317_v8 }
 0x3af   :  { %v2891_v62 = vpop.f32.mrf.mxu0  ;;  %v2914_v40 = vpop.f32.mrf.mxu1 }
 0x3b0   :  { %v2892_v23 = vadd.f32 %v2891_v62, %v2869_v21  ;;  %v3345_v62 = vld [vmem:[%s5453_s8 + $0x130] sm:$0xff] }
 0x3b1   :  { %3432 = vmatpush.msra.mxu2 %v3345_v62 }
 0x3b2   :  { %v2915_v16 = vadd.f32 %v2914_v40, %v2892_v23  ;;  %v3361_v23 = vld [vmem:[%s5453_s8 + $0x1b0] sm:$0xff]  ;;  %v3316_v40 = vld [vmem:[%s5453_s8 + $0x48] sm:$0xff] }
 0x3b3   :  { %3389 = vmatpush.msra.mxu0 %v3316_v40  ;;  %v3287_v40 = vld [vmem:[%s5452_s7 + $0x160] sm:$0xff] }
 0x3b6   :  { %v2937_v30 = vpop.f32.mrf.mxu2  ;;  %v2960_v32 = vpop.f32.mrf.mxu3 }
 0x3b7   :  { %v2938_v18 = vadd.f32 %v2937_v30, %v2915_v16 }
 0x3b9   :  { %v2961_v17 = vadd.f32 %v2960_v32, %v2938_v18  ;;  %v2894_v7 = vpop.f32.mrf.mxu0  ;;  %v2917_v57 = vpop.f32.mrf.mxu1  ;;  %v3344_v18 = vld [vmem:[%s5453_s8 + $0x128] sm:$0xff] }
 0x3ba   :  { %v2895_v1 = vadd.f32 %v2894_v7, %v2872_v47  ;;  %v3334_v47 = vld [vmem:[%s5453_s8 + $0xd8] sm:$0xff]  ;;  %v3315_v7 = vld [vmem:[%s5453_s8 + $0x40] sm:$0xff]  ;;  %3433 = vmatpush.msra.mxu2 %v3344_v18 }
 0x3bb   :  { %v3156_v54 = vadd.f32 %v3152_v4, %v2961_v17  ;;  %3407 = vmatpush.msra.mxu1 %v3334_v47  ;;  %3390 = vmatpush.msra.mxu0 %v3315_v7  ;;  %v3307_v18 = vld [vmem:[%s5453_s8] sm:$0xff]  ;;  %v3274_v7 = vld [vmem:[%s5452_s7 + $0xf8] sm:$0xff] }
 0x3bc   :  { %v2918_v51 = vadd.f32 %v2917_v57, %v2895_v1  ;;  %v3343_v1 = vld [vmem:[%s5453_s8 + $0x120] sm:$0xff] }
 0x3bd   :  { %vm3160_vm0 = vcmp.ge.f32.partialorder %v3156_v54, 0.0  ;;  %v3164_v5 = vmul.f32 0.2, %v3156_v54  ;;  %3408 = vmatpush.msra.mxu1 %v3333_v15  ;;  %3434 = vmatpush.msra.mxu2 %v3343_v1  ;;  %v3308_v15 = vld [vmem:[%s5453_s8 + $0x8] sm:$0xff]  ;;  %v3286_v1 = vld [vmem:[%s5452_s7 + $0x158] sm:$0xff] }
 0x3bf   :  { %v4837_v10 = vsel %vm3160_vm0, %v3156_v54, %v3164_v5  ;;  %v3331_v54 = vld [vmem:[%s5453_s8 + $0xc0] sm:$0xff] }
 0x3c0   :  { %3179 = vst [vmem:[#allocation1] sm:$0xff] %v4837_v10  ;;  %v2940_v2 = vpop.f32.mrf.mxu2  ;;  %v2963_v55 = vpop.f32.mrf.mxu3  ;;  %v3359_v5 = vld [vmem:[%s5453_s8 + $0x1a0] sm:$0xff] }
 0x3c1   :  { %v2941_v33 = vadd.f32 %v2940_v2, %v2918_v51  ;;  %v3314_v2 = vld [vmem:[%s5453_s8 + $0x38] sm:$0xff] }
 0x3c2   :  { %3391 = vmatpush.msra.mxu0 %v3314_v2  ;;  %v3273_v2 = vld [vmem:[%s5452_s7 + $0xf0] sm:$0xff] }
 0x3c3   :  { %v2964_v6 = vadd.f32 %v2963_v55, %v2941_v33  ;;  %v3330_v33 = vld [vmem:[%s5453_s8 + $0xb8] sm:$0xff] }
 0x3c5   :  { %v4840_v0 = vadd.f32 %v3152_v4, %v2964_v6  ;;  %v3360_v4 = vld [vmem:[%s5453_s8 + $0x1a8] sm:$0xff]  ;;  %v3342_v6 = vld [vmem:[%s5453_s8 + $0x118] sm:$0xff] }
 0x3c6   :  { %3435 = vmatpush.msra.mxu2 %v3342_v6 }
 0x3c7   :  { %vm3162_vm6 = vcmp.ge.f32.partialorder %v4840_v0, 0.0 }
 0x3c8   :  { %3436 = vmatpush.msra.mxu2 %v3341_v63 }
 0x3ca   :  { %3437 = vmatpush.msra.mxu2 %v3340_v56 }
 0x3cc   :  { %3438 = vmatpush.msra.mxu2 %v3339_v9  ;;  %v3297_v9 = vld [vmem:[%s5452_s7 + $0x1b0] sm:$0xff] }
 0x3ce   :  { %3503 = vmatpush.msrb.mxu2 %v3290_v29  ;;  %v3296_v29 = vld [vmem:[%s5452_s7 + $0x1a8] sm:$0xff] }
 0x3d0   :  { %3504 = vmatpush.msrb.mxu2 %v3289_v20 }
 0x3d2   :  { %3505 = vmatpush.msrb.mxu2 %v3288_v28 }
 0x3d3   :  { %v2983_v27 = vpop.f32.mrf.mxu0  ;;  %v3006_v19 = vpop.f32.mrf.mxu1 }
 0x3d4   :  { %v2984_v44 = vadd.f32 %v2983_v27, %v4809_v49  ;;  %v3365_v49 = vld [vmem:[%s5453_s8 + $0x1d0] sm:$0xff]  ;;  %3506 = vmatpush.msrb.mxu2 %v3287_v40  ;;  %v3292_v40 = vld [vmem:[%s5452_s7 + $0x188] sm:$0xff] }
 0x3d5   :  { %3448 = vmatpush.msra.mxu3 %v3365_v49  ;;  %v3313_v27 = vld [vmem:[%s5453_s8 + $0x30] sm:$0xff]  ;;  %v3355_v49 = vld [vmem:[%s5453_s8 + $0x180] sm:$0xff] }
 0x3d6   :  { %v3007_v36 = vadd.f32 %v3006_v19, %v2984_v44  ;;  %v3312_v19 = vld [vmem:[%s5453_s8 + $0x28] sm:$0xff]  ;;  %3392 = vmatpush.msra.mxu0 %v3313_v27  ;;  %3507 = vmatpush.msrb.mxu2 %v3286_v1 }
 0x3d7   :  { %3449 = vmatpush.msra.mxu3 %v3364_v39  ;;  %v3310_v39 = vld [vmem:[%s5453_s8 + $0x18] sm:$0xff]  ;;  %v3284_v27 = vld [vmem:[%s5452_s7 + $0x148] sm:$0xff] }
 0x3d8   :  { %3393 = vmatpush.msra.mxu0 %v3312_v19  ;;  %v3244_v1 = vld [vmem:[%s5452_s7 + $0x8] sm:$0xff] }
 0x3d9   :  { %3450 = vmatpush.msra.mxu3 %v3363_v3  ;;  %v3309_v3 = vld [vmem:[%s5453_s8 + $0x10] sm:$0xff] }
 0x3da   :  { %v3029_v24 = vpop.f32.mrf.mxu2  ;;  %v3052_v45 = vpop.f32.mrf.mxu3  ;;  %3394 = vmatpush.msra.mxu0 %v3311_v22  ;;  %v3269_v22 = vld [vmem:[%s5452_s7 + $0xd0] sm:$0xff] }
 0x3db   :  { %v3030_v53 = vadd.f32 %v3029_v24, %v3007_v36  ;;  %3451 = vmatpush.msra.mxu3 %v3362_v52  ;;  %v3326_v36 = vld [vmem:[%s5453_s8 + $0x98] sm:$0xff]  ;;  %v3304_v52 = vld [vmem:[%s5452_s7 + $0x1e8] sm:$0xff] }
 0x3dc   :  { %3395 = vmatpush.msra.mxu0 %v3310_v39  ;;  %v3267_v39 = vld [vmem:[%s5452_s7 + $0xc0] sm:$0xff] }
 0x3dd   :  { %v2986_v42 = vpop.f32.mrf.mxu0  ;;  %v3009_v50 = vpop.f32.mrf.mxu1  ;;  %v3053_v32 = vadd.f32 %v3052_v45, %v3030_v53  ;;  %3452 = vmatpush.msra.mxu3 %v3361_v23  ;;  %v3325_v53 = vld [vmem:[%s5453_s8 + $0x90] sm:$0xff] }
 0x3de   :  { %v2987_v21 = vadd.f32 %v2986_v42, %v4816_v48  ;;  %v3332_v48 = vld [vmem:[%s5453_s8 + $0xc8] sm:$0xff]  ;;  %3396 = vmatpush.msra.mxu0 %v3309_v3  ;;  %v3278_v3 = vld [vmem:[%s5452_s7 + $0x118] sm:$0xff] }
 0x3df   :  { %3409 = vmatpush.msra.mxu1 %v3332_v48  ;;  %3453 = vmatpush.msra.mxu3 %v3360_v4  ;;  %v3323_v4 = vld [vmem:[%s5453_s8 + $0x80] sm:$0xff] }
 0x3e0   :  { %v3010_v57 = vadd.f32 %v3009_v50, %v2987_v21  ;;  %v3324_v21 = vld [vmem:[%s5453_s8 + $0x88] sm:$0xff]  ;;  %3397 = vmatpush.msra.mxu0 %v3308_v15 }
 0x3e1   :  { %3410 = vmatpush.msra.mxu1 %v3331_v54  ;;  %3454 = vmatpush.msra.mxu3 %v3359_v5  ;;  %v3302_v5 = vld [vmem:[%s5452_s7 + $0x1d8] sm:$0xff]  ;;  %v3248_v15 = vld [vmem:[%s5452_s7 + $0x28] sm:$0xff] }
 0x3e2   :  { %3398 = vmatpush.msra.mxu0 %v3307_v18  ;;  %v3291_v18 = vld [vmem:[%s5452_s7 + $0x180] sm:$0xff] }
 0x3e3   :  { %3411 = vmatpush.msra.mxu1 %v3330_v33  ;;  %3455 = vmatpush.msra.mxu3 %v3358_v58  ;;  %v3166_v33 = vmul.f32 0.2, %v4840_v0  ;;  %v3256_v58 = vld [vmem:[%s5452_s7 + $0x68] sm:$0xff] }
 0x3e4   :  { %v3032_v16 = vpop.f32.mrf.mxu2  ;;  %v3055_v30 = vpop.f32.mrf.mxu3 }
 0x3e5   :  { %v3033_v41 = vadd.f32 %v3032_v16, %v3010_v57  ;;  %3412 = vmatpush.msra.mxu1 %v3329_v37  ;;  %3456 = vmatpush.msra.mxu3 %v3357_v31  ;;  %v3303_v16 = vld [vmem:[%s5452_s7 + $0x1e0] sm:$0xff]  ;;  %v3300_v37 = vld [vmem:[%s5452_s7 + $0x1c8] sm:$0xff]  ;;  %v3170_v56 = vsel %vm3162_vm6, %v4840_v0, %v3166_v33  ;;  %v3282_v0 = vld [vmem:[%s5452_s7 + $0x138] sm:$0xff] }
 0x3e6   :  { %v3255_v31 = vld [vmem:[%s5452_s7 + $0x60] sm:$0xff] }
 0x3e7   :  { %v3056_v24 = vadd.f32 %v3055_v30, %v3033_v41  ;;  %3413 = vmatpush.msra.mxu1 %v3328_v59  ;;  %3457 = vmatpush.msra.mxu3 %v3356_v14  ;;  %v3272_v41 = vld [vmem:[%s5452_s7 + $0xe8] sm:$0xff]  ;;  %v3254_v14 = vld [vmem:[%s5452_s7 + $0x58] sm:$0xff] }
 0x3e9   :  { %3414 = vmatpush.msra.mxu1 %v3327_v11  ;;  %3458 = vmatpush.msra.mxu3 %v3355_v49  ;;  %v3281_v11 = vld [vmem:[%s5452_s7 + $0x130] sm:$0xff]  ;;  %v3252_v49 = vld [vmem:[%s5452_s7 + $0x48] sm:$0xff] }
 0x3eb   :  { %3523 = vmatpush.msrb.mxu3 %v3306_v25  ;;  %3415 = vmatpush.msra.mxu1 %v3326_v36  ;;  %v3251_v25 = vld [vmem:[%s5452_s7 + $0x40] sm:$0xff] }
 0x3ec   :  { %v3279_v36 = vld [vmem:[%s5452_s7 + $0x120] sm:$0xff] }
 0x3ed   :  { %3524 = vmatpush.msrb.mxu3 %v3305_v26  ;;  %3416 = vmatpush.msra.mxu1 %v3325_v53  ;;  %v3250_v26 = vld [vmem:[%s5452_s7 + $0x38] sm:$0xff] }
 0x3ee   :  { %v3294_v53 = vld [vmem:[%s5452_s7 + $0x198] sm:$0xff] }
 0x3ef   :  { %3525 = vmatpush.msrb.mxu3 %v3304_v52  ;;  %3417 = vmatpush.msra.mxu1 %v3324_v21  ;;  %v3277_v52 = vld [vmem:[%s5452_s7 + $0x110] sm:$0xff]  ;;  %v3264_v21 = vld [vmem:[%s5452_s7 + $0xa8] sm:$0xff] }
 0x3f1   :  { %3526 = vmatpush.msrb.mxu3 %v3303_v16  ;;  %3418 = vmatpush.msra.mxu1 %v3323_v4  ;;  %v3247_v16 = vld [vmem:[%s5452_s7 + $0x20] sm:$0xff]  ;;  %v3246_v4 = vld [vmem:[%s5452_s7 + $0x18] sm:$0xff] }
 0x3f3   :  { %3483 = vmatpush.msrb.mxu1 %v3274_v7  ;;  %3527 = vmatpush.msrb.mxu3 %v3302_v5  ;;  %v3261_v7 = vld [vmem:[%s5452_s7 + $0x90] sm:$0xff]  ;;  %v3260_v5 = vld [vmem:[%s5452_s7 + $0x88] sm:$0xff] }
 0x3f5   :  { %3484 = vmatpush.msrb.mxu1 %v3273_v2  ;;  %3528 = vmatpush.msrb.mxu3 %v3301_v46 }
 0x3f7   :  { %v3075_v17 = vpop.f32.mrf.mxu0  ;;  %v3098_v55 = vpop.f32.mrf.mxu1  ;;  %3485 = vmatpush.msrb.mxu1 %v3272_v41  ;;  %3529 = vmatpush.msrb.mxu3 %v3300_v37 }
 0x3f8   :  { %v3076_v51 = vadd.f32 %v3075_v17, %v3053_v32  ;;  %v3258_v17 = vld [vmem:[%s5452_s7 + $0x78] sm:$0xff] }
 0x3f9   :  { %3463 = vmatpush.msrb.mxu0 %v3258_v17  ;;  %v3245_v17 = vld [vmem:[%s5452_s7 + $0x10] sm:$0xff] }
 0x3fa   :  { %v3099_v13 = vadd.f32 %v3098_v55, %v3076_v51  ;;  %v3257_v51 = vld [vmem:[%s5452_s7 + $0x70] sm:$0xff] }
 0x3fb   :  { %v3285_v55 = vld [vmem:[%s5452_s7 + $0x150] sm:$0xff]  ;;  %3464 = vmatpush.msrb.mxu0 %v3257_v51  ;;  %v3259_v51 = vld [vmem:[%s5452_s7 + $0x80] sm:$0xff] }
 0x3fc   :  { %3508 = vmatpush.msrb.mxu2 %v3285_v55 }
 0x3fd   :  { %3465 = vmatpush.msrb.mxu0 %v3256_v58 }
 0x3fe   :  { %v3121_v43 = vpop.f32.mrf.mxu2  ;;  %v3144_v35 = vpop.f32.mrf.mxu3  ;;  %3509 = vmatpush.msrb.mxu2 %v3284_v27 }
 0x3ff   :  { %v3122_v45 = vadd.f32 %v3121_v43, %v3099_v13  ;;  %v3078_v44 = vpop.f32.mrf.mxu0  ;;  %v3101_v50 = vpop.f32.mrf.mxu1  ;;  %v3271_v13 = vld [vmem:[%s5452_s7 + $0xe0] sm:$0xff]  ;;  %3466 = vmatpush.msrb.mxu0 %v3255_v31 }
 0x400   :  { %v3079_v38 = vadd.f32 %v3078_v44, %v3056_v24  ;;  %v3283_v43 = vld [vmem:[%s5452_s7 + $0x140] sm:$0xff]  ;;  %v3270_v24 = vld [vmem:[%s5452_s7 + $0xd8] sm:$0xff]  ;;  %3486 = vmatpush.msrb.mxu1 %v3271_v13  ;;  %v3253_v44 = vld [vmem:[%s5452_s7 + $0x50] sm:$0xff] }
 0x401   :  { %v3145_v42 = vadd.f32 %v3144_v35, %v3122_v45  ;;  %v3299_v35 = vld [vmem:[%s5452_s7 + $0x1c0] sm:$0xff]  ;;  %3510 = vmatpush.msrb.mxu2 %v3283_v43  ;;  %3467 = vmatpush.msrb.mxu0 %v3254_v14  ;;  %v3629_v43 = vld [vmem:[#allocation13 + $0xf8] sm:$0xff]  ;;  %v3612_v14 = vld [vmem:[#allocation13 + $0x70] sm:$0xff] }
 0x402   :  { %v3102_v47 = vadd.f32 %v3101_v50, %v3079_v38  ;;  %3530 = vmatpush.msrb.mxu3 %v3299_v35  ;;  %3487 = vmatpush.msrb.mxu1 %v3270_v24  ;;  %v3280_v38 = vld [vmem:[%s5452_s7 + $0x128] sm:$0xff]  ;;  %v3266_v50 = vld [vmem:[%s5452_s7 + $0xb8] sm:$0xff]  ;;  %v3580_v35 = vld [vmem:[%s5455_s10 + $0x70] sm:$0xff] }
 0x403   :  { %v3157_v34 = vadd.f32 %v3153_v60, %v3145_v42  ;;  %3511 = vmatpush.msrb.mxu2 %v3282_v0  ;;  %v3268_v42 = vld [vmem:[%s5452_s7 + $0xc8] sm:$0xff]  ;;  %3468 = vmatpush.msrb.mxu0 %v3253_v44 }
 0x404   :  { %3488 = vmatpush.msrb.mxu1 %v3269_v22  ;;  %v3628_v24 = vld [vmem:[#allocation13 + $0xf0] sm:$0xff]  ;;  %v3627_v44 = vld [vmem:[#allocation13 + $0xe8] sm:$0xff] }
 0x405   :  { %vm3161_vm3 = vcmp.ge.f32.partialorder %v3157_v34, 0.0  ;;  %v3165_v61 = vmul.f32 0.2, %v3157_v34  ;;  %3512 = vmatpush.msrb.mxu2 %v3281_v11  ;;  %3469 = vmatpush.msrb.mxu0 %v3252_v49  ;;  %v3595_v0 = vld [vmem:[%s5455_s10 + $0xe8] sm:$0xff]  ;;  %v3578_v22 = vld [vmem:[%s5455_s10 + $0x60] sm:$0xff] }
 0x406   :  { %v3124_v8 = vpop.f32.mrf.mxu2  ;;  %v3147_v48 = vpop.f32.mrf.mxu3  ;;  %3489 = vmatpush.msrb.mxu1 %v3268_v42  ;;  %v3594_v11 = vld [vmem:[%s5455_s10 + $0xe0] sm:$0xff]  ;;  %v3577_v42 = vld [vmem:[%s5455_s10 + $0x58] sm:$0xff] }
 0x407   :  { %v5071_v62 = vsel %vm3161_vm3, %v3157_v34, %v3165_v61  ;;  %v3125_v23 = vadd.f32 %v3124_v8, %v3102_v47  ;;  %v3295_v34 = vld [vmem:[%s5452_s7 + $0x1a0] sm:$0xff]  ;;  %3513 = vmatpush.msrb.mxu2 %v3280_v38  ;;  %3470 = vmatpush.msrb.mxu0 %v3251_v25  ;;  %v3249_v61 = vld [vmem:[%s5452_s7 + $0x30] sm:$0xff]  ;;  %v3593_v38 = vld [vmem:[%s5455_s10 + $0xd8] sm:$0xff] }
 0x408   :  { %v3174_v30 = vrot.slane %v5071_v62, 7  ;;  %3180 = vst [vmem:[#allocation1 + $0x9] sm:$0xff] %v5071_v62  ;;  %3490 = vmatpush.msrb.mxu1 %v3267_v39  ;;  %v3265_v47 = vld [vmem:[%s5452_s7 + $0xb0] sm:$0xff]  ;;  %v3626_v49 = vld [vmem:[#allocation13 + $0xe0] sm:$0xff] }
 0x409   :  { %v3148_v32 = vadd.f32 %v3147_v48, %v3125_v23  ;;  %3514 = vmatpush.msrb.mxu2 %v3279_v36  ;;  %3471 = vmatpush.msrb.mxu0 %v3250_v26  ;;  %v3293_v8 = vld [vmem:[%s5452_s7 + $0x190] sm:$0xff]  ;;  %v3276_v23 = vld [vmem:[%s5452_s7 + $0x108] sm:$0xff]  ;;  %v3275_v48 = vld [vmem:[%s5452_s7 + $0x100] sm:$0xff] }
 0x40a   :  { %v3175_v54 = vsel %vm1647_vm5, %v4837_v10, %v3174_v30  ;;  %3491 = vmatpush.msrb.mxu1 %v3266_v50  ;;  %v3263_v30 = vld [vmem:[%s5452_s7 + $0xa0] sm:$0xff]  ;;  %v3625_v25 = vld [vmem:[#allocation13 + $0xd8] sm:$0xff]  ;;  %v3575_v26 = vld [vmem:[%s5455_s10 + $0x48] sm:$0xff] }
 0x40b   :  { %3177 = vst.msk [vmem:[#allocation3] ss:$8 sm:$0x3] %vm4843_vm2, %v3175_v54  ;;  %v3159_v57 = vadd.f32 %v3153_v60, %v3148_v32  ;;  %v3298_v60 = vld [vmem:[%s5452_s7 + $0x1b8] sm:$0xff]  ;;  %3515 = vmatpush.msrb.mxu2 %v3278_v3  ;;  %3472 = vmatpush.msrb.mxu0 %v3249_v61  ;;  %v3576_v39 = vld [vmem:[%s5455_s10 + $0x50] sm:$0xff]  ;;  %v3591_v50 = vld [vmem:[%s5455_s10 + $0xc8] sm:$0xff] }
 0x40c   :  { %3531 = vmatpush.msrb.mxu3 %v3298_v60  ;;  %3492 = vmatpush.msrb.mxu1 %v3265_v47  ;;  %v3262_v32 = vld [vmem:[%s5452_s7 + $0x98] sm:$0xff]  ;;  %v3611_v60 = vld [vmem:[#allocation13 + $0x68] sm:$0xff]  ;;  %v3592_v36 = vld [vmem:[%s5455_s10 + $0xd0] sm:$0xff] }
 0x40d   :  { %vm3163_vm4 = vcmp.ge.f32.partialorder %v3159_v57, 0.0  ;;  %v3167_v6 = vmul.f32 0.2, %v3159_v57  ;;  %3516 = vmatpush.msrb.mxu2 %v3277_v52  ;;  %3473 = vmatpush.msrb.mxu0 %v3248_v15  ;;  %v3607_v3 = vld [vmem:[#allocation13 + $0x48] sm:$0xff]  ;;  %v3622_v52 = vld [vmem:[#allocation13 + $0xc0] sm:$0xff] }
 0x40e   :  { %3532 = vmatpush.msrb.mxu3 %v3297_v9  ;;  %3493 = vmatpush.msrb.mxu1 %v3264_v21  ;;  %v3610_v9 = vld [vmem:[#allocation13 + $0x60] sm:$0xff]  ;;  %v3605_v21 = vld [vmem:[#allocation13 + $0x38] sm:$0xff] }
 0x40f   :  { %v3171_v63 = vsel %vm3163_vm4, %v3159_v57, %v3167_v6  ;;  %v3182_v19 = vld [vmem:[#allocation1 + $0x1] ss:$9 sm:$0xff]  ;;  %3517 = vmatpush.msrb.mxu2 %v3276_v23  ;;  %3474 = vmatpush.msrb.mxu0 %v3247_v16 }
 0x410   :  { %v3229_v59 = vrot.slane %v3171_v63, 7  ;;  %3185 = vst.msk [vmem:[#allocation3 + $0x11] ss:$8 sm:$0x3] %vm4843_vm2, %v3182_v19  ;;  %3533 = vmatpush.msrb.mxu3 %v3296_v29  ;;  %3494 = vmatpush.msrb.mxu1 %v3263_v30  ;;  %v3243_v57 = vld [vmem:[%s5452_s7] sm:$0xff]  ;;  %v3581_v19 = vld [vmem:[%s5455_s10 + $0x78] sm:$0xff] }
 0x411   :  { %3187 = vst [vmem:[#allocation1] sm:$0xff] %v4837_v10  ;;  %3518 = vmatpush.msrb.mxu2 %v3275_v48  ;;  %3475 = vmatpush.msrb.mxu0 %v3246_v4  ;;  %v3609_v29 = vld [vmem:[#allocation13 + $0x58] sm:$0xff]  ;;  %v3574_v61 = vld [vmem:[%s5455_s10 + $0x40] sm:$0xff]  ;;  %v3604_v30 = vld [vmem:[#allocation13 + $0x30] sm:$0xff] }
 0x412   :  { %v3230_v45 = vsel %vm1647_vm5, %v3170_v56, %v3229_v59  ;;  %3188 = vst [vmem:[#allocation1 + $0x9] sm:$0xff] %v5071_v62  ;;  %3534 = vmatpush.msrb.mxu3 %v3295_v34  ;;  %3495 = vmatpush.msrb.mxu1 %v3262_v32  ;;  %v3613_v59 = vld [vmem:[#allocation13 + $0x78] sm:$0xff]  ;;  %v3608_v34 = vld [vmem:[#allocation13 + $0x50] sm:$0xff]  ;;  %v3590_v47 = vld [vmem:[%s5455_s10 + $0xc0] sm:$0xff] }
 0x413   :  { %3233 = vst.msk [vmem:[#allocation3 + $0x15] ss:$8 sm:$0x3] %vm4843_vm2, %v3230_v45  ;;  %3476 = vmatpush.msrb.mxu0 %v3245_v17  ;;  %v3596_v56 = vld [vmem:[%s5455_s10 + $0xf0] sm:$0xff]  ;;  %v3579_v45 = vld [vmem:[%s5455_s10 + $0x68] sm:$0xff]  ;;  %v3589_v15 = vld [vmem:[%s5455_s10 + $0xb8] sm:$0xff] }
 0x414   :  { %3535 = vmatpush.msrb.mxu3 %v3294_v53  ;;  %3496 = vmatpush.msrb.mxu1 %v3261_v7  ;;  %v3623_v53 = vld [vmem:[#allocation13 + $0xc8] sm:$0xff]  ;;  %v3621_v23 = vld [vmem:[#allocation13 + $0xb8] sm:$0xff]  ;;  %v3620_v48 = vld [vmem:[#allocation13 + $0xb0] sm:$0xff] }
 0x415   :  { %3477 = vmatpush.msrb.mxu0 %v3244_v1  ;;  %v3588_v16 = vld [vmem:[%s5455_s10 + $0xb0] sm:$0xff]  ;;  %v3587_v4 = vld [vmem:[%s5455_s10 + $0xa8] sm:$0xff]  ;;  %v3570_v7 = vld [vmem:[%s5455_s10 + $0x20] sm:$0xff] }
 0x416   :  { %3536 = vmatpush.msrb.mxu3 %v3293_v8  ;;  %3497 = vmatpush.msrb.mxu1 %v3260_v5  ;;  %v3573_v8 = vld [vmem:[%s5455_s10 + $0x38] sm:$0xff]  ;;  %v3603_v32 = vld [vmem:[#allocation13 + $0x28] sm:$0xff] }
 0x417   :  { %3478 = vmatpush.msrb.mxu0 %v3243_v57  ;;  %v3619_v17 = vld [vmem:[#allocation13 + $0xa8] sm:$0xff]  ;;  %v3602_v1 = vld [vmem:[#allocation13 + $0x20] sm:$0xff] }
 0x418   :  { %3537 = vmatpush.msrb.mxu3 %v3292_v40  ;;  %3498 = vmatpush.msrb.mxu1 %v3259_v51  ;;  %v3572_v40 = vld [vmem:[%s5455_s10 + $0x30] sm:$0xff]  ;;  %v3618_v5 = vld [vmem:[#allocation13 + $0xa0] sm:$0xff] }
 0x419   :  { %v3190_v20 = vld [vmem:[#allocation1 + $0x2] ss:$9 sm:$0xff] }
 0x41a   :  { %3195 = vst [vmem:[#allocation1] sm:$0xff] %v4837_v10  ;;  %3538 = vmatpush.msrb.mxu3 %v3291_v18  ;;  %v3571_v18 = vld [vmem:[%s5455_s10 + $0x28] sm:$0xff]  ;;  %v3569_v57 = vld [vmem:[%s5455_s10 + $0x18] sm:$0xff] }
 0x41b   :  { %3196 = vst [vmem:[#allocation1 + $0x9] sm:$0xff] %v5071_v62  ;;  %v3585_v51 = vld [vmem:[%s5455_s10 + $0x98] sm:$0xff] }
 0x41c   :  { %3193 = vst.msk [vmem:[#allocation3 + $0x1] ss:$8 sm:$0x3] %vm4843_vm2, %v3190_v20  ;;  %v3624_v20 = vld [vmem:[#allocation13 + $0xd0] sm:$0xff] }
 0x422   :  { %v3198_v28 = vld [vmem:[#allocation1 + $0x3] ss:$9 sm:$0xff] }
 0x423   :  { %3201 = vst.msk [vmem:[#allocation3 + $0x12] ss:$8 sm:$0x3] %vm4843_vm2, %v3198_v28  ;;  %v3606_v28 = vld [vmem:[#allocation13 + $0x40] sm:$0xff] }
 0x424   :  { %3203 = vst [vmem:[#allocation1] sm:$0xff] %v4837_v10 }
 0x425   :  { %3204 = vst [vmem:[#allocation1 + $0x9] sm:$0xff] %v5071_v62 }
 0x42c   :  { %v3206_v54 = vld [vmem:[#allocation1 + $0x5] ss:$9 sm:$0xff] }
 0x42d   :  { %3211 = vst [vmem:[#allocation1] sm:$0xff] %v4837_v10 }
 0x42e   :  { %3212 = vst [vmem:[#allocation1 + $0x9] sm:$0xff] %v5071_v62 }
 0x42f   :  { %3209 = vst.msk [vmem:[#allocation3 + $0x3] ss:$8 sm:$0x3] %vm4843_vm2, %v3206_v54  ;;  %v3586_v54 = vld [vmem:[%s5455_s10 + $0xa0] sm:$0xff] }
 0x435   :  { %v3214_v2 = vld [vmem:[#allocation1 + $0x6] ss:$9 sm:$0xff] }
 0x436   :  { %3217 = vst.msk [vmem:[#allocation3 + $0x14] ss:$8 sm:$0x3] %vm4843_vm2, %v3214_v2  ;;  %v3601_v2 = vld [vmem:[#allocation13 + $0x18] sm:$0xff] }
 0x437   :  { %3219 = vst [vmem:[#allocation1] sm:$0xff] %v4837_v10 }
 0x438   :  { %3220 = vst [vmem:[#allocation1 + $0x9] sm:$0xff] %v5071_v62 }
 0x43d   :  { %v3241_v33 = vld [vmem:[#allocation3 + $0x10] sm:$0x7e]  ;;  %v3242_v55 = vld [vmem:[#allocation3 + $0x18] sm:$0x7e] }
 0x43e   :  { %v3377_v46 = vrot.slane %v3241_v33, 1  ;;  %v3378_v6 = vrot.slane %v3242_v55, 1  ;;  %v3237_v41 = vld [vmem:[#allocation3 + $0x10] sm:$0x3f]  ;;  %v3238_v63 = vld [vmem:[#allocation3 + $0x18] sm:$0x3f] }
 0x43f   :  { %v3222_v58 = vld [vmem:[#allocation1 + $0x7] ss:$9 sm:$0xff] }
 0x440   :  { %3439 = vmatmul.f32.vlgmr.msra.gmra.mxu2 %v3377_v46  ;;  %3459 = vmatmul.f32.vlgmr.msra.gmra.mxu3 %v3378_v6  ;;  %3225 = vst.msk [vmem:[#allocation3 + $0x4] ss:$8 sm:$0x3] %vm4843_vm2, %v3222_v58  ;;  %v3617_v33 = vld [vmem:[#allocation13 + $0x98] sm:$0xff]  ;;  %v3600_v6 = vld [vmem:[#allocation13 + $0x10] sm:$0xff] }
 0x441   :  { %3676 = vmatpush.msra.mxu2 %v3581_v19  ;;  %3696 = vmatpush.msra.mxu3 %v3597_v12  ;;  %v3568_v55 = vld [vmem:[%s5455_s10 + $0x10] sm:$0xff] }
 0x442   :  { %v3584_v46 = vld [vmem:[%s5455_s10 + $0x90] sm:$0xff] }
 0x443   :  { %3677 = vmatpush.msra.mxu2 %v3580_v35  ;;  %3697 = vmatpush.msra.mxu3 %v3596_v56  ;;  %v3616_v58 = vld [vmem:[#allocation13 + $0x90] sm:$0xff] }
 0x445   :  { %3678 = vmatpush.msra.mxu2 %v3579_v45  ;;  %3698 = vmatpush.msra.mxu3 %v3595_v0  ;;  %v3741_v45 = vld [vmem:[%s5458_s13 + $0x68] sm:$0xff] }
 0x447   :  { %v3239_v27 = vld [vmem:[#allocation3] sm:$0x7e]  ;;  %v3240_v37 = vld [vmem:[#allocation3 + $0x8] sm:$0x7e]  ;;  %3679 = vmatpush.msra.mxu2 %v3578_v22  ;;  %3699 = vmatpush.msra.mxu3 %v3594_v11 }
 0x448   :  { %v3375_v31 = vrot.slane %v3239_v27, 1  ;;  %v3376_v13 = vrot.slane %v3240_v37, 1  ;;  %3519 = vmatmul.f32.vlgmr.msrb.gmra.mxu2 %v3237_v41  ;;  %3539 = vmatmul.f32.vlgmr.msrb.gmra.mxu3 %v3238_v63  ;;  %v3235_v10 = vld [vmem:[#allocation3] sm:$0x3f]  ;;  %v3236_v62 = vld [vmem:[#allocation3 + $0x8] sm:$0x3f] }
 0x449   :  { %3680 = vmatpush.msra.mxu2 %v3577_v42  ;;  %3700 = vmatpush.msra.mxu3 %v3593_v38  ;;  %v3567_v41 = vld [vmem:[%s5455_s10 + $0x8] sm:$0xff]  ;;  %v3738_v38 = vld [vmem:[%s5458_s13 + $0x50] sm:$0xff] }
 0x44a   :  { %3399 = vmatmul.f32.vlgmr.msra.gmra.mxu0 %v3375_v31  ;;  %3419 = vmatmul.f32.vlgmr.msra.gmra.mxu1 %v3376_v13  ;;  %v3583_v27 = vld [vmem:[%s5455_s10 + $0x88] sm:$0xff]  ;;  %v3566_v31 = vld [vmem:[%s5455_s10] sm:$0xff] }
 0x44b   :  { %3636 = vmatpush.msra.mxu0 %v3613_v59  ;;  %3656 = vmatpush.msra.mxu1 %v3629_v43  ;;  %v3599_v37 = vld [vmem:[#allocation13 + $0x8] sm:$0xff]  ;;  %v3598_v59 = vld [vmem:[#allocation13] sm:$0xff] }
 0x44c   :  { %3681 = vmatpush.msra.mxu2 %v3576_v39  ;;  %3701 = vmatpush.msra.mxu3 %v3592_v36  ;;  %v3615_v63 = vld [vmem:[#allocation13 + $0x88] sm:$0xff]  ;;  %v3614_v43 = vld [vmem:[#allocation13 + $0x80] sm:$0xff] }
 0x44d   :  { %3637 = vmatpush.msra.mxu0 %v3612_v14  ;;  %3657 = vmatpush.msra.mxu1 %v3628_v24  ;;  %v3582_v13 = vld [vmem:[%s5455_s10 + $0x80] sm:$0xff]  ;;  %v3743_v14 = vld [vmem:[%s5458_s13 + $0x78] sm:$0xff]  ;;  %v3742_v24 = vld [vmem:[%s5458_s13 + $0x70] sm:$0xff] }
 0x44e   :  { %3682 = vmatpush.msra.mxu2 %v3575_v26  ;;  %3702 = vmatpush.msra.mxu3 %v3591_v50  ;;  %v3737_v36 = vld [vmem:[%s5458_s13 + $0x48] sm:$0xff] }
 0x44f   :  { %3638 = vmatpush.msra.mxu0 %v3611_v60  ;;  %3658 = vmatpush.msra.mxu1 %v3627_v44  ;;  %v3740_v44 = vld [vmem:[%s5458_s13 + $0x60] sm:$0xff] }
 0x450   :  { %3683 = vmatpush.msra.mxu2 %v3574_v61  ;;  %3703 = vmatpush.msra.mxu3 %v3590_v47 }
 0x451   :  { %3639 = vmatpush.msra.mxu0 %v3610_v9  ;;  %3659 = vmatpush.msra.mxu1 %v3626_v49  ;;  %v3739_v9 = vld [vmem:[%s5458_s13 + $0x58] sm:$0xff] }
 0x452   :  { %3479 = vmatmul.f32.vlgmr.msrb.gmra.mxu0 %v3235_v10  ;;  %3499 = vmatmul.f32.vlgmr.msrb.gmra.mxu1 %v3236_v62 }
 0x453   :  { %3640 = vmatpush.msra.mxu0 %v3609_v29  ;;  %3660 = vmatpush.msra.mxu1 %v3625_v25  ;;  %v3789_v25 = vld [vmem:[%s5454_s9] ss:$0 sm:$0xff] }
 0x454   :  { %3684 = vmatpush.msra.mxu2 %v3573_v8  ;;  %3704 = vmatpush.msra.mxu3 %v3589_v15 }
 0x455   :  { %3641 = vmatpush.msra.mxu0 %v3608_v34  ;;  %3661 = vmatpush.msra.mxu1 %v3624_v20 }
 0x456   :  { %3685 = vmatpush.msra.mxu2 %v3572_v40  ;;  %3705 = vmatpush.msra.mxu3 %v3588_v16  ;;  %v3735_v40 = vld [vmem:[%s5458_s13 + $0x38] sm:$0xff]  ;;  %v3734_v16 = vld [vmem:[%s5458_s13 + $0x30] sm:$0xff] }
 0x457   :  { %3642 = vmatpush.msra.mxu0 %v3607_v3  ;;  %3662 = vmatpush.msra.mxu1 %v3623_v53 }
 0x458   :  { %3686 = vmatpush.msra.mxu2 %v3571_v18  ;;  %3706 = vmatpush.msra.mxu3 %v3587_v4  ;;  %v3731_v18 = vld [vmem:[%s5458_s13 + $0x18] sm:$0xff]  ;;  %v3730_v4 = vld [vmem:[%s5458_s13 + $0x10] sm:$0xff] }
 0x459   :  { %3643 = vmatpush.msra.mxu0 %v3606_v28  ;;  %3663 = vmatpush.msra.mxu1 %v3622_v52 }
 0x45a   :  { %3687 = vmatpush.msra.mxu2 %v3570_v7  ;;  %3707 = vmatpush.msra.mxu3 %v3586_v54 }
 0x45b   :  { %3644 = vmatpush.msra.mxu0 %v3605_v21  ;;  %3664 = vmatpush.msra.mxu1 %v3621_v23  ;;  %v3736_v23 = vld [vmem:[%s5458_s13 + $0x40] sm:$0xff] }
 0x45c   :  { %3688 = vmatpush.msra.mxu2 %v3569_v57  ;;  %3708 = vmatpush.msra.mxu3 %v3585_v51  ;;  %v3790_v51 = vld [vmem:[%s5457_s12] ss:$0 sm:$0xff] }
 0x45d   :  { %3645 = vmatpush.msra.mxu0 %v3604_v30  ;;  %3665 = vmatpush.msra.mxu1 %v3620_v48  ;;  %v3733_v30 = vld [vmem:[%s5458_s13 + $0x28] sm:$0xff]  ;;  %v3732_v48 = vld [vmem:[%s5458_s13 + $0x20] sm:$0xff] }
 0x45e   :  { %3689 = vmatpush.msra.mxu2 %v3568_v55  ;;  %3709 = vmatpush.msra.mxu3 %v3584_v46 }
 0x45f   :  { %3646 = vmatpush.msra.mxu0 %v3603_v32  ;;  %3666 = vmatpush.msra.mxu1 %v3619_v17  ;;  %v3729_v32 = vld [vmem:[%s5458_s13 + $0x8] sm:$0xff]  ;;  %v3728_v17 = vld [vmem:[%s5458_s13] sm:$0xff] }
 0x460   :  { %3690 = vmatpush.msra.mxu2 %v3567_v41  ;;  %3710 = vmatpush.msra.mxu3 %v3583_v27  ;;  %v3791_v27 = vld [vmem:[#allocation5] ss:$0 sm:$0xff] }
 0x461   :  { %3647 = vmatpush.msra.mxu0 %v3602_v1  ;;  %3667 = vmatpush.msra.mxu1 %v3618_v5 }
 0x462   :  { %3691 = vmatpush.msra.mxu2 %v3566_v31  ;;  %3711 = vmatpush.msra.mxu3 %v3582_v13 }
 0x463   :  { %3648 = vmatpush.msra.mxu0 %v3601_v2  ;;  %3668 = vmatpush.msra.mxu1 %v3617_v33 }
 0x465   :  { %3649 = vmatpush.msra.mxu0 %v3600_v6  ;;  %3669 = vmatpush.msra.mxu1 %v3616_v58 }
 0x467   :  { %3650 = vmatpush.msra.mxu0 %v3599_v37  ;;  %3670 = vmatpush.msra.mxu1 %v3615_v63 }
 0x469   :  { %3651 = vmatpush.msra.mxu0 %v3598_v59  ;;  %3671 = vmatpush.msra.mxu1 %v3614_v43 }
 0x46b   :  { %3748 = vmatpush.msrb.mxu0 %v3743_v14 }
 0x46d   :  { %3749 = vmatpush.msrb.mxu0 %v3742_v24 }
 0x46f   :  { %3750 = vmatpush.msrb.mxu0 %v3741_v45 }
 0x471   :  { %3751 = vmatpush.msrb.mxu0 %v3740_v44 }
 0x473   :  { %3752 = vmatpush.msrb.mxu0 %v3739_v9 }
 0x475   :  { %3753 = vmatpush.msrb.mxu0 %v3738_v38 }
 0x477   :  { %3754 = vmatpush.msrb.mxu0 %v3737_v36 }
 0x479   :  { %3755 = vmatpush.msrb.mxu0 %v3736_v23 }
 0x47b   :  { %3756 = vmatpush.msrb.mxu0 %v3735_v40 }
 0x47d   :  { %3757 = vmatpush.msrb.mxu0 %v3734_v16 }
 0x47f   :  { %3758 = vmatpush.msrb.mxu0 %v3733_v30 }
 0x481   :  { %3759 = vmatpush.msrb.mxu0 %v3732_v48 }
 0x483   :  { %3760 = vmatpush.msrb.mxu0 %v3731_v18 }
 0x485   :  { %3761 = vmatpush.msrb.mxu0 %v3730_v4 }
 0x487   :  { %3762 = vmatpush.msrb.mxu0 %v3729_v32 }
 0x489   :  { %3763 = vmatpush.msrb.mxu0 %v3728_v17 }
 0x4c3   :  { %v3440_v12 = vpop.f32.mrf.mxu2  ;;  %v3460_v56 = vpop.f32.mrf.mxu3 }
 0x4c7   :  { %v3400_v10 = vpop.f32.mrf.mxu0  ;;  %v3420_v62 = vpop.f32.mrf.mxu1 }
 0x4c8   :  { %v3421_v19 = vadd.f32 %v3420_v62, %v3400_v10 }
 0x4ca   :  { %v3441_v35 = vadd.f32 %v3440_v12, %v3421_v19 }
 0x4cb   :  { %v3520_v42 = vpop.f32.mrf.mxu2  ;;  %v3540_v39 = vpop.f32.mrf.mxu3 }
 0x4cc   :  { %v3461_v0 = vadd.f32 %v3460_v56, %v3441_v35 }
 0x4cf   :  { %v3480_v60 = vpop.f32.mrf.mxu0  ;;  %v3500_v11 = vpop.f32.mrf.mxu1 }
 0x4d0   :  { %v3481_v22 = vadd.f32 %v3480_v60, %v3461_v0 }
 0x4d2   :  { %v3501_v49 = vadd.f32 %v3500_v11, %v3481_v22 }
 0x4d4   :  { %v3521_v29 = vadd.f32 %v3520_v42, %v3501_v49 }
 0x4d6   :  { %v3541_v34 = vadd.f32 %v3540_v39, %v3521_v29 }
 0x4d8   :  { %v3547_v20 = vadd.f32 %v3789_v25, %v3541_v34 }
 0x4da   :  { %vm3548_vm7 = vcmp.ge.f32.partialorder %v3547_v20, 0.0  ;;  %v3549_v26 = vmul.f32 0.2, %v3547_v20 }
 0x4dc   :  { %v3550_v50 = vsel %vm3548_vm7, %v3547_v20, %v3549_v26 }
 0x4dd   :  { %3551 = vst [vmem:[#allocation4] sm:$0x1] %v3550_v50  ;;  %v3553_v3 = vrot.slane %v3550_v50, 1  ;;  %v3556_v53 = vrot.slane %v3550_v50, 3  ;;  %v3559_v61 = vrot.slane %v3550_v50, 4 }
 0x4df   :  { %3555 = vst [vmem:[#allocation4 + $0x9] sm:$0x1] %v3553_v3 }
 0x4e0   :  { %3558 = vst [vmem:[#allocation4 + $0x2] sm:$0x1] %v3556_v53 }
 0x4e1   :  { %3561 = vst [vmem:[#allocation4 + $0xb] sm:$0x1] %v3559_v61 }
 0x4e7   :  { %v3562_v47 = vld [vmem:[#allocation4] sm:$0xf] }
 0x4e8   :  { %v3564_v28 = vld [vmem:[#allocation4] sm:$0x1e]  ;;  %3692 = vmatmul.f32.vlgmr.msra.gmra.mxu2 %v3562_v47  ;;  %v3563_v52 = vld [vmem:[#allocation4 + $0x8] sm:$0xf] }
 0x4e9   :  { %v3632_v8 = vrot.slane %v3564_v28, 1  ;;  %v3565_v15 = vld [vmem:[#allocation4 + $0x8] sm:$0x1e]  ;;  %3712 = vmatmul.f32.vlgmr.msra.gmra.mxu3 %v3563_v52 }
 0x4ea   :  { %v3633_v21 = vrot.slane %v3565_v15, 1 }
 0x4eb   :  { %3652 = vmatmul.f32.vlgmr.msra.gmra.mxu0 %v3632_v8 }
 0x4ec   :  { %3672 = vmatmul.f32.vlgmr.msra.gmra.mxu1 %v3633_v21 }
 0x568   :  { %v3653_v7 = vpop.f32.mrf.mxu0 }
 0x569   :  { %v3673_v54 = vpop.f32.mrf.mxu1 }
 0x56a   :  { %v3674_v1 = vadd.f32 %v3673_v54, %v3653_v7 }
 0x56b   :  { %v3693_v5 = vpop.f32.mrf.mxu2 }
 0x56c   :  { %v3694_v57 = vadd.f32 %v3693_v5, %v3674_v1  ;;  %v3713_v2 = vpop.f32.mrf.mxu3 }
 0x56e   :  { %v3714_v33 = vadd.f32 %v3713_v2, %v3694_v57 }
 0x570   :  { %v3720_v55 = vadd.f32 %v3790_v51, %v3714_v33 }
 0x572   :  { %vm3721_vm8 = vcmp.ge.f32.partialorder %v3720_v55, 0.0  ;;  %v3722_v46 = vmul.f32 0.2, %v3720_v55 }
 0x574   :  { %v3723_v6 = vsel %vm3721_vm8, %v3720_v55, %v3722_v46 }
 0x575   :  { %v3725_v58 = vrot.slane %v3723_v6, 1 }
 0x577   :  { %v3727_v41 = vsel %vm1647_vm5, %v3723_v6, %v3725_v58 }
 0x578   :  { %3764 = vmatmul.f32.vlgmr.msrb.gmra.mxu0 %v3727_v41 }
 0x5f5   :  { %v3765_v37 = vpop.f32.mrf.mxu0 }
 0x5f6   :  { %v3766_v63 = vadd.f32 %v3791_v27, %v3765_v37 }
 0x5f8   :  { %3769 = vst.msk [vmem:[%s5460_s15] sm:$0x3] %vm3768_vm9, %v3766_v63 }
 0x5f9   :  { %3774 = vsyncpa [#allocation7], 1 }
 0x5fa   :  { %3775 = vsyncpa [#allocation9], 1 }
 0x5fb   :  { %3776 = vsyncpa [#allocation12], 1 }

</bundles_post_ra>
